<compile_context>
chip_gen: v6e
topology: v6e:2x2x1
jax: 0.10.0
libtpu: 0.0.40
codegen_flags: <defaults>
</compile_context>

<pallas_src>
import functools
import math

import jax
import jax.numpy as jnp
from jax.experimental import pallas as pl
from jax.experimental.pallas import tpu as pltpu

LAYER_DEPTH = 6
DELTAT = 4.0 / LAYER_DEPTH
SQRT_DT = math.sqrt(DELTAT)
SIGMA = 0.5
HID = 100          # diffusion hidden width: nn.Linear(1, 100)
LANES = 128        # batch elements per vreg row


# ---------------------------------------------------------------------------
# Kernels
# ---------------------------------------------------------------------------
def _diffusion_mlp(out, w1_ref, b1_ref, w2_ref, b_diff2):
    """fc2(relu(fc1(out))) with batch-on-lanes; scalar weight loop over HID."""
    acc = jnp.full_like(out, b_diff2)
    # Unrolled scalar loop: weight reads go to the (free) scalar slots, all
    # vector work is plain VALU FMAs on the (tile_rows, 128) activation tile.
    for k in range(HID):
        h = jnp.maximum(out * w1_ref[k] + b1_ref[k], 0.0)
        acc = acc + h * w2_ref[k]
    return acc


def _sde_kernel(scal_ref, w1_ref, b1_ref, w2_ref, x_ref, noise_ref,
                mean_ref, sigma_ref):
    # scalar parameters (SMEM)
    w_down = scal_ref[0]
    b_down = scal_ref[1]
    w_drift = scal_ref[2]
    b_drift = scal_ref[3]
    b_diff2 = scal_ref[4]
    w_fc = scal_ref[5]
    b_fc = scal_ref[6]

    x = x_ref[...]                                   # (tile_rows, 128)
    out = x * w_down + b_down                        # downsampling Linear(1,1)

    # diffusion(0, out) = sigmoid(fc2(relu(fc1(out)))), scaled by sigma=0.5
    d = _diffusion_mlp(out, w1_ref, b1_ref, w2_ref, b_diff2)
    diffusion_term = SIGMA * jax.nn.sigmoid(d)

    # drift(0, out) = relu(Linear(1,1)(out))
    drift_term = jnp.maximum(out * w_drift + b_drift, 0.0)

    # Euler-Maruyama loop collapsed analytically: drift/diffusion are computed
    # once before the loop in the PyTorch module, so
    #   out += L*dt*drift + sqrt(dt)*diffusion*sum_i(wiener_i)
    # noise_ref already holds sum_i(wiener_i).
    out = (out
           + drift_term * (LAYER_DEPTH * DELTAT)
           + diffusion_term * (SQRT_DT) * noise_ref[...])

    # fc_layers = Sequential(ReLU, Linear(1,1))
    final = jnp.maximum(out, 0.0) * w_fc + b_fc
    mean_ref[...] = final                            # mean = final_out[:, 0]
    sigma_ref[...] = jax.nn.softplus(final) + 0.001  # sigma = softplus(final)+1e-3


def _diffusion_kernel(scal_ref, w1_ref, b1_ref, w2_ref, x_ref, out_ref):
    # training_diffusion=True branch: diffusion(0, downsample(x).detach())
    w_down = scal_ref[0]
    b_down = scal_ref[1]
    b_diff2 = scal_ref[4]
    out = x_ref[...] * w_down + b_down
    d = _diffusion_mlp(out, w1_ref, b1_ref, w2_ref, b_diff2)
    out_ref[...] = jax.nn.sigmoid(d)


# ---------------------------------------------------------------------------
# Wrappers
# ---------------------------------------------------------------------------
def _specs(tile_rows):
    smem_spec = pl.BlockSpec(memory_space=pltpu.MemorySpace.SMEM)
    act_spec = pl.BlockSpec((tile_rows, LANES), lambda i: (i, 0))
    return smem_spec, act_spec


def _lane_dense(v_flat, n, n_pad):
    """(n,) -> zero-padded (n_pad // 128, 128), batch on lanes."""
    padded = jnp.zeros((n_pad,), jnp.float32).at[:n].set(v_flat)
    return padded.reshape(n_pad // LANES, LANES)


@functools.partial(jax.jit, static_argnames=("tile_rows",))
def sdenet_forward(scalars, w1, b1, w2, x, noise, *, tile_rows=8):
    """training_diffusion=False path.

    x:      (N, 1) float32
    noise:  (LAYER_DEPTH, N, 1) float32 Wiener increments (torch.randn_like)
    Returns (mean (N,), sigma (N, 1)).
    """
    n = x.shape[0]
    block = tile_rows * LANES
    n_pad = ((n + block - 1) // block) * block
    rows = n_pad // LANES

    x2 = _lane_dense(x.reshape(-1), n, n_pad)
    # Drift/diffusion are frozen across steps -> only the summed increment
    # matters; pre-summing cuts noise DMA 6x and is mathematically exact.
    noise_sum = _lane_dense(jnp.sum(noise, axis=0).reshape(-1), n, n_pad)

    smem_spec, act_spec = _specs(tile_rows)
    mean, sigma = pl.pallas_call(
        _sde_kernel,
        out_shape=(jax.ShapeDtypeStruct((rows, LANES), jnp.float32),
                   jax.ShapeDtypeStruct((rows, LANES), jnp.float32)),
        grid_spec=pltpu.PrefetchScalarGridSpec(
            num_scalar_prefetch=0,
            grid=(rows // tile_rows,),
            in_specs=[smem_spec, smem_spec, smem_spec, smem_spec,
                      act_spec, act_spec],
            out_specs=(act_spec, act_spec)),
        compiler_params=pltpu.CompilerParams(
            dimension_semantics=("parallel",)),
    )(scalars, w1, b1, w2, x2, noise_sum)

    mean = mean.reshape(-1)[:n]
    sigma = sigma.reshape(-1)[:n].reshape(n, 1)
    return mean, sigma


@functools.partial(jax.jit, static_argnames=("tile_rows",))
def sdenet_forward_training_diffusion(scalars, w1, b1, w2, x, *, tile_rows=8):
    """training_diffusion=True path. Returns (N, 1)."""
    n = x.shape[0]
    block = tile_rows * LANES
    n_pad = ((n + block - 1) // block) * block
    rows = n_pad // LANES

    x2 = _lane_dense(x.reshape(-1), n, n_pad)
    smem_spec, act_spec = _specs(tile_rows)
    out = pl.pallas_call(
        _diffusion_kernel,
        out_shape=jax.ShapeDtypeStruct((rows, LANES), jnp.float32),
        grid_spec=pltpu.PrefetchScalarGridSpec(
            num_scalar_prefetch=0,
            grid=(rows // tile_rows,),
            in_specs=[smem_spec, smem_spec, smem_spec, smem_spec, act_spec],
            out_specs=act_spec),
        compiler_params=pltpu.CompilerParams(
            dimension_semantics=("parallel",)),
    )(scalars, w1, b1, w2, x2)
    return out.reshape(-1)[:n].reshape(n, 1)


# ---------------------------------------------------------------------------
# Parameters + pure-JAX reference (for a correctness spot-check)
# ---------------------------------------------------------------------------
def init_params(key):
    """Deterministic synthetic params matching the PyTorch module's shapes."""
    ks = jax.random.split(key, 10)

    def uni(k, fan_in, shape):
        b = 1.0 / math.sqrt(fan_in)
        return jax.random.uniform(k, shape, jnp.float32, -b, b)

    w_down = uni(ks[0], 1, ())        # downsampling_layers: Linear(1,1)
    b_down = uni(ks[1], 1, ())
    w_drift = uni(ks[2], 1, ())       # Drift.fc: Linear(1,1)
    b_drift = uni(ks[3], 1, ())
    w1 = uni(ks[4], 1, (HID,))        # Diffusion.fc1: Linear(1,100) weight
    b1 = uni(ks[5], 1, (HID,))        # Diffusion.fc1 bias
    w2 = uni(ks[6], HID, (HID,))      # Diffusion.fc2: Linear(100,1) weight
    b_diff2 = uni(ks[7], HID, ())     # Diffusion.fc2 bias
    w_fc = uni(ks[8], 1, ())          # fc_layers[1]: Linear(1,1)
    b_fc = uni(ks[9], 1, ())

    scalars = jnp.array(
        [w_down, b_down, w_drift, b_drift, b_diff2, w_fc, b_fc, 0.0],
        dtype=jnp.float32)
    return scalars, w1, b1, w2


def _ref_forward(scalars, w1, b1, w2, x, noise):
    """Plain-JAX transcription of the PyTorch forward (training_diffusion=False)."""
    w_down, b_down, w_drift, b_drift, b_diff2, w_fc, b_fc = (
        scalars[0], scalars[1], scalars[2], scalars[3], scalars[4],
        scalars[5], scalars[6])
    out = x * w_down + b_down                                    # (N, 1)
    h = jnp.maximum(out * w1[None, :] + b1[None, :], 0.0)        # (N, HID)
    d = h @ w2 + b_diff2                                         # (N,)
    diffusion_term = SIGMA * jax.nn.sigmoid(d)[:, None]
    drift_term = jnp.maximum(out * w_drift + b_drift, 0.0)
    for i in range(LAYER_DEPTH):
        out = out + drift_term * DELTAT + diffusion_term * SQRT_DT * noise[i]
    final = jnp.maximum(out, 0.0) * w_fc + b_fc
    return final[:, 0], jax.nn.softplus(final) + 0.001


def _ref_diffusion(scalars, w1, b1, w2, x):
    w_down, b_down, b_diff2 = scalars[0], scalars[1], scalars[4]
    out = x * w_down + b_down
    h = jnp.maximum(out * w1[None, :] + b1[None, :], 0.0)
    d = h @ w2 + b_diff2
    return jax.nn.sigmoid(d)[:, None]


# ---------------------------------------------------------------------------
if __name__ == "__main__":
    key = jax.random.PRNGKey(0)
    k_param, k_x, k_noise = jax.random.split(key, 3)

    N, TILE_ROWS = 4096, 8                       # 4 grid steps of 1024 samples
    scalars, w1, b1, w2 = init_params(k_param)
    x = jax.random.normal(k_x, (N, 1), jnp.float32)
    # Wiener increments: one standard-normal draw per SDE step (torch.randn_like)
    noise = jax.random.normal(k_noise, (LAYER_DEPTH, N, 1), jnp.float32)

    mean, sigma = sdenet_forward(scalars, w1, b1, w2, x, noise,
                                 tile_rows=TILE_ROWS)
    diff_out = sdenet_forward_training_diffusion(scalars, w1, b1, w2, x,
                                                 tile_rows=TILE_ROWS)
    jax.block_until_ready((mean, sigma, diff_out))

    assert mean.shape == (N,) and sigma.shape == (N, 1)
    assert diff_out.shape == (N, 1)

    # Spot-check against a pure-JAX reference of the PyTorch forward.
    ref_mean, ref_sigma = _ref_forward(scalars, w1, b1, w2, x, noise)
    ref_diff = _ref_diffusion(scalars, w1, b1, w2, x)
    assert jnp.allclose(mean, ref_mean, atol=1e-3, rtol=1e-3)
    assert jnp.allclose(sigma, ref_sigma, atol=1e-3, rtol=1e-3)
    assert jnp.allclose(diff_out, ref_diff, atol=1e-3, rtol=1e-3)

    print("KERNEL_OK")
</pallas_src>

<mosaic_0001>
module attributes {stable_mosaic.version = 11 : i64} {
  func.func @_sde_kernel(%arg0: i32, %arg1: memref<8xf32, #tpu.memory_space<smem>>, %arg2: memref<100xf32, #tpu.memory_space<smem>>, %arg3: memref<100xf32, #tpu.memory_space<smem>>, %arg4: memref<100xf32, #tpu.memory_space<smem>>, %arg5: memref<8x128xf32, #tpu.memory_space<vmem>>, %arg6: memref<8x128xf32, #tpu.memory_space<vmem>>, %arg7: memref<8x128xf32, #tpu.memory_space<vmem>>, %arg8: memref<8x128xf32, #tpu.memory_space<vmem>>) attributes {dimension_semantics = [#tpu.dimension_semantics<parallel>], iteration_bounds = array<i64: 4>, scalar_prefetch = 0 : i64, scratch_operands = 0 : i64, tpu.core_type = #tpu.core_type<tc>, window_params = [{transform_indices = @transform_0, window_bounds = array<i64: 8>}, {transform_indices = @transform_1, window_bounds = array<i64: 100>}, {transform_indices = @transform_2, window_bounds = array<i64: 100>}, {transform_indices = @transform_3, window_bounds = array<i64: 100>}, {transform_indices = @transform_4, window_bounds = array<i64: 8, 128>}, {transform_indices = @transform_5, window_bounds = array<i64: 8, 128>}, {transform_indices = @transform_6, window_bounds = array<i64: 8, 128>}, {transform_indices = @transform_7, window_bounds = array<i64: 8, 128>}]} {
    %c0 = arith.constant 0 : index
    %0 = memref.load %arg1[%c0] : memref<8xf32, #tpu.memory_space<smem>>
    %c1 = arith.constant 1 : index
    %1 = memref.load %arg1[%c1] : memref<8xf32, #tpu.memory_space<smem>>
    %c2 = arith.constant 2 : index
    %2 = memref.load %arg1[%c2] : memref<8xf32, #tpu.memory_space<smem>>
    %c3 = arith.constant 3 : index
    %3 = memref.load %arg1[%c3] : memref<8xf32, #tpu.memory_space<smem>>
    %c4 = arith.constant 4 : index
    %4 = memref.load %arg1[%c4] : memref<8xf32, #tpu.memory_space<smem>>
    %c5 = arith.constant 5 : index
    %5 = memref.load %arg1[%c5] : memref<8xf32, #tpu.memory_space<smem>>
    %c6 = arith.constant 6 : index
    %6 = memref.load %arg1[%c6] : memref<8xf32, #tpu.memory_space<smem>>
    %c0_0 = arith.constant 0 : index
    %c0_1 = arith.constant 0 : index
    %7 = vector.load %arg5[%c0_0, %c0_1] : memref<8x128xf32, #tpu.memory_space<vmem>>, vector<8x128xf32>
    %8 = vector.broadcast %0 : f32 to vector<8x128xf32>
    %9 = arith.mulf %7, %8 : vector<8x128xf32>
    %10 = vector.broadcast %1 : f32 to vector<8x128xf32>
    %11 = arith.addf %9, %10 : vector<8x128xf32>
    %12 = vector.broadcast %4 : f32 to vector<8x128xf32>
    %c0_2 = arith.constant 0 : index
    %13 = memref.load %arg2[%c0_2] : memref<100xf32, #tpu.memory_space<smem>>
    %14 = vector.broadcast %13 : f32 to vector<8x128xf32>
    %15 = arith.mulf %11, %14 : vector<8x128xf32>
    %c0_3 = arith.constant 0 : index
    %16 = memref.load %arg3[%c0_3] : memref<100xf32, #tpu.memory_space<smem>>
    %17 = vector.broadcast %16 : f32 to vector<8x128xf32>
    %18 = arith.addf %15, %17 : vector<8x128xf32>
    %cst = arith.constant 0.000000e+00 : f32
    %19 = vector.broadcast %cst : f32 to vector<8x128xf32>
    %20 = arith.maximumf %18, %19 : vector<8x128xf32>
    %c0_4 = arith.constant 0 : index
    %21 = memref.load %arg4[%c0_4] : memref<100xf32, #tpu.memory_space<smem>>
    %22 = vector.broadcast %21 : f32 to vector<8x128xf32>
    %23 = arith.mulf %20, %22 : vector<8x128xf32>
    %24 = arith.addf %12, %23 : vector<8x128xf32>
    %c1_5 = arith.constant 1 : index
    %25 = memref.load %arg2[%c1_5] : memref<100xf32, #tpu.memory_space<smem>>
    %26 = vector.broadcast %25 : f32 to vector<8x128xf32>
    %27 = arith.mulf %11, %26 : vector<8x128xf32>
    %c1_6 = arith.constant 1 : index
    %28 = memref.load %arg3[%c1_6] : memref<100xf32, #tpu.memory_space<smem>>
    %29 = vector.broadcast %28 : f32 to vector<8x128xf32>
    %30 = arith.addf %27, %29 : vector<8x128xf32>
    %cst_7 = arith.constant 0.000000e+00 : f32
    %31 = vector.broadcast %cst_7 : f32 to vector<8x128xf32>
    %32 = arith.maximumf %30, %31 : vector<8x128xf32>
    %c1_8 = arith.constant 1 : index
    %33 = memref.load %arg4[%c1_8] : memref<100xf32, #tpu.memory_space<smem>>
    %34 = vector.broadcast %33 : f32 to vector<8x128xf32>
    %35 = arith.mulf %32, %34 : vector<8x128xf32>
    %36 = arith.addf %24, %35 : vector<8x128xf32>
    %c2_9 = arith.constant 2 : index
    %37 = memref.load %arg2[%c2_9] : memref<100xf32, #tpu.memory_space<smem>>
    %38 = vector.broadcast %37 : f32 to vector<8x128xf32>
    %39 = arith.mulf %11, %38 : vector<8x128xf32>
    %c2_10 = arith.constant 2 : index
    %40 = memref.load %arg3[%c2_10] : memref<100xf32, #tpu.memory_space<smem>>
    %41 = vector.broadcast %40 : f32 to vector<8x128xf32>
    %42 = arith.addf %39, %41 : vector<8x128xf32>
    %cst_11 = arith.constant 0.000000e+00 : f32
    %43 = vector.broadcast %cst_11 : f32 to vector<8x128xf32>
    %44 = arith.maximumf %42, %43 : vector<8x128xf32>
    %c2_12 = arith.constant 2 : index
    %45 = memref.load %arg4[%c2_12] : memref<100xf32, #tpu.memory_space<smem>>
    %46 = vector.broadcast %45 : f32 to vector<8x128xf32>
    %47 = arith.mulf %44, %46 : vector<8x128xf32>
    %48 = arith.addf %36, %47 : vector<8x128xf32>
    %c3_13 = arith.constant 3 : index
    %49 = memref.load %arg2[%c3_13] : memref<100xf32, #tpu.memory_space<smem>>
    %50 = vector.broadcast %49 : f32 to vector<8x128xf32>
    %51 = arith.mulf %11, %50 : vector<8x128xf32>
    %c3_14 = arith.constant 3 : index
    %52 = memref.load %arg3[%c3_14] : memref<100xf32, #tpu.memory_space<smem>>
    %53 = vector.broadcast %52 : f32 to vector<8x128xf32>
    %54 = arith.addf %51, %53 : vector<8x128xf32>
    %cst_15 = arith.constant 0.000000e+00 : f32
    %55 = vector.broadcast %cst_15 : f32 to vector<8x128xf32>
    %56 = arith.maximumf %54, %55 : vector<8x128xf32>
    %c3_16 = arith.constant 3 : index
    %57 = memref.load %arg4[%c3_16] : memref<100xf32, #tpu.memory_space<smem>>
    %58 = vector.broadcast %57 : f32 to vector<8x128xf32>
    %59 = arith.mulf %56, %58 : vector<8x128xf32>
    %60 = arith.addf %48, %59 : vector<8x128xf32>
    %c4_17 = arith.constant 4 : index
    %61 = memref.load %arg2[%c4_17] : memref<100xf32, #tpu.memory_space<smem>>
    %62 = vector.broadcast %61 : f32 to vector<8x128xf32>
    %63 = arith.mulf %11, %62 : vector<8x128xf32>
    %c4_18 = arith.constant 4 : index
    %64 = memref.load %arg3[%c4_18] : memref<100xf32, #tpu.memory_space<smem>>
    %65 = vector.broadcast %64 : f32 to vector<8x128xf32>
    %66 = arith.addf %63, %65 : vector<8x128xf32>
    %cst_19 = arith.constant 0.000000e+00 : f32
    %67 = vector.broadcast %cst_19 : f32 to vector<8x128xf32>
    %68 = arith.maximumf %66, %67 : vector<8x128xf32>
    %c4_20 = arith.constant 4 : index
    %69 = memref.load %arg4[%c4_20] : memref<100xf32, #tpu.memory_space<smem>>
    %70 = vector.broadcast %69 : f32 to vector<8x128xf32>
    %71 = arith.mulf %68, %70 : vector<8x128xf32>
    %72 = arith.addf %60, %71 : vector<8x128xf32>
    %c5_21 = arith.constant 5 : index
    %73 = memref.load %arg2[%c5_21] : memref<100xf32, #tpu.memory_space<smem>>
    %74 = vector.broadcast %73 : f32 to vector<8x128xf32>
    %75 = arith.mulf %11, %74 : vector<8x128xf32>
    %c5_22 = arith.constant 5 : index
    %76 = memref.load %arg3[%c5_22] : memref<100xf32, #tpu.memory_space<smem>>
    %77 = vector.broadcast %76 : f32 to vector<8x128xf32>
    %78 = arith.addf %75, %77 : vector<8x128xf32>
    %cst_23 = arith.constant 0.000000e+00 : f32
    %79 = vector.broadcast %cst_23 : f32 to vector<8x128xf32>
    %80 = arith.maximumf %78, %79 : vector<8x128xf32>
    %c5_24 = arith.constant 5 : index
    %81 = memref.load %arg4[%c5_24] : memref<100xf32, #tpu.memory_space<smem>>
    %82 = vector.broadcast %81 : f32 to vector<8x128xf32>
    %83 = arith.mulf %80, %82 : vector<8x128xf32>
    %84 = arith.addf %72, %83 : vector<8x128xf32>
    %c6_25 = arith.constant 6 : index
    %85 = memref.load %arg2[%c6_25] : memref<100xf32, #tpu.memory_space<smem>>
    %86 = vector.broadcast %85 : f32 to vector<8x128xf32>
    %87 = arith.mulf %11, %86 : vector<8x128xf32>
    %c6_26 = arith.constant 6 : index
    %88 = memref.load %arg3[%c6_26] : memref<100xf32, #tpu.memory_space<smem>>
    %89 = vector.broadcast %88 : f32 to vector<8x128xf32>
    %90 = arith.addf %87, %89 : vector<8x128xf32>
    %cst_27 = arith.constant 0.000000e+00 : f32
    %91 = vector.broadcast %cst_27 : f32 to vector<8x128xf32>
    %92 = arith.maximumf %90, %91 : vector<8x128xf32>
    %c6_28 = arith.constant 6 : index
    %93 = memref.load %arg4[%c6_28] : memref<100xf32, #tpu.memory_space<smem>>
    %94 = vector.broadcast %93 : f32 to vector<8x128xf32>
    %95 = arith.mulf %92, %94 : vector<8x128xf32>
    %96 = arith.addf %84, %95 : vector<8x128xf32>
    %c7 = arith.constant 7 : index
    %97 = memref.load %arg2[%c7] : memref<100xf32, #tpu.memory_space<smem>>
    %98 = vector.broadcast %97 : f32 to vector<8x128xf32>
    %99 = arith.mulf %11, %98 : vector<8x128xf32>
    %c7_29 = arith.constant 7 : index
    %100 = memref.load %arg3[%c7_29] : memref<100xf32, #tpu.memory_space<smem>>
    %101 = vector.broadcast %100 : f32 to vector<8x128xf32>
    %102 = arith.addf %99, %101 : vector<8x128xf32>
    %cst_30 = arith.constant 0.000000e+00 : f32
    %103 = vector.broadcast %cst_30 : f32 to vector<8x128xf32>
    %104 = arith.maximumf %102, %103 : vector<8x128xf32>
    %c7_31 = arith.constant 7 : index
    %105 = memref.load %arg4[%c7_31] : memref<100xf32, #tpu.memory_space<smem>>
    %106 = vector.broadcast %105 : f32 to vector<8x128xf32>
    %107 = arith.mulf %104, %106 : vector<8x128xf32>
    %108 = arith.addf %96, %107 : vector<8x128xf32>
    %c8 = arith.constant 8 : index
    %109 = memref.load %arg2[%c8] : memref<100xf32, #tpu.memory_space<smem>>
    %110 = vector.broadcast %109 : f32 to vector<8x128xf32>
    %111 = arith.mulf %11, %110 : vector<8x128xf32>
    %c8_32 = arith.constant 8 : index
    %112 = memref.load %arg3[%c8_32] : memref<100xf32, #tpu.memory_space<smem>>
    %113 = vector.broadcast %112 : f32 to vector<8x128xf32>
    %114 = arith.addf %111, %113 : vector<8x128xf32>
    %cst_33 = arith.constant 0.000000e+00 : f32
    %115 = vector.broadcast %cst_33 : f32 to vector<8x128xf32>
    %116 = arith.maximumf %114, %115 : vector<8x128xf32>
    %c8_34 = arith.constant 8 : index
    %117 = memref.load %arg4[%c8_34] : memref<100xf32, #tpu.memory_space<smem>>
    %118 = vector.broadcast %117 : f32 to vector<8x128xf32>
    %119 = arith.mulf %116, %118 : vector<8x128xf32>
    %120 = arith.addf %108, %119 : vector<8x128xf32>
    %c9 = arith.constant 9 : index
    %121 = memref.load %arg2[%c9] : memref<100xf32, #tpu.memory_space<smem>>
    %122 = vector.broadcast %121 : f32 to vector<8x128xf32>
    %123 = arith.mulf %11, %122 : vector<8x128xf32>
    %c9_35 = arith.constant 9 : index
    %124 = memref.load %arg3[%c9_35] : memref<100xf32, #tpu.memory_space<smem>>
    %125 = vector.broadcast %124 : f32 to vector<8x128xf32>
    %126 = arith.addf %123, %125 : vector<8x128xf32>
    %cst_36 = arith.constant 0.000000e+00 : f32
    %127 = vector.broadcast %cst_36 : f32 to vector<8x128xf32>
    %128 = arith.maximumf %126, %127 : vector<8x128xf32>
    %c9_37 = arith.constant 9 : index
    %129 = memref.load %arg4[%c9_37] : memref<100xf32, #tpu.memory_space<smem>>
    %130 = vector.broadcast %129 : f32 to vector<8x128xf32>
    %131 = arith.mulf %128, %130 : vector<8x128xf32>
    %132 = arith.addf %120, %131 : vector<8x128xf32>
    %c10 = arith.constant 10 : index
    %133 = memref.load %arg2[%c10] : memref<100xf32, #tpu.memory_space<smem>>
    %134 = vector.broadcast %133 : f32 to vector<8x128xf32>
    %135 = arith.mulf %11, %134 : vector<8x128xf32>
    %c10_38 = arith.constant 10 : index
    %136 = memref.load %arg3[%c10_38] : memref<100xf32, #tpu.memory_space<smem>>
    %137 = vector.broadcast %136 : f32 to vector<8x128xf32>
    %138 = arith.addf %135, %137 : vector<8x128xf32>
    %cst_39 = arith.constant 0.000000e+00 : f32
    %139 = vector.broadcast %cst_39 : f32 to vector<8x128xf32>
    %140 = arith.maximumf %138, %139 : vector<8x128xf32>
    %c10_40 = arith.constant 10 : index
    %141 = memref.load %arg4[%c10_40] : memref<100xf32, #tpu.memory_space<smem>>
    %142 = vector.broadcast %141 : f32 to vector<8x128xf32>
    %143 = arith.mulf %140, %142 : vector<8x128xf32>
    %144 = arith.addf %132, %143 : vector<8x128xf32>
    %c11 = arith.constant 11 : index
    %145 = memref.load %arg2[%c11] : memref<100xf32, #tpu.memory_space<smem>>
    %146 = vector.broadcast %145 : f32 to vector<8x128xf32>
    %147 = arith.mulf %11, %146 : vector<8x128xf32>
    %c11_41 = arith.constant 11 : index
    %148 = memref.load %arg3[%c11_41] : memref<100xf32, #tpu.memory_space<smem>>
    %149 = vector.broadcast %148 : f32 to vector<8x128xf32>
    %150 = arith.addf %147, %149 : vector<8x128xf32>
    %cst_42 = arith.constant 0.000000e+00 : f32
    %151 = vector.broadcast %cst_42 : f32 to vector<8x128xf32>
    %152 = arith.maximumf %150, %151 : vector<8x128xf32>
    %c11_43 = arith.constant 11 : index
    %153 = memref.load %arg4[%c11_43] : memref<100xf32, #tpu.memory_space<smem>>
    %154 = vector.broadcast %153 : f32 to vector<8x128xf32>
    %155 = arith.mulf %152, %154 : vector<8x128xf32>
    %156 = arith.addf %144, %155 : vector<8x128xf32>
    %c12 = arith.constant 12 : index
    %157 = memref.load %arg2[%c12] : memref<100xf32, #tpu.memory_space<smem>>
    %158 = vector.broadcast %157 : f32 to vector<8x128xf32>
    %159 = arith.mulf %11, %158 : vector<8x128xf32>
    %c12_44 = arith.constant 12 : index
    %160 = memref.load %arg3[%c12_44] : memref<100xf32, #tpu.memory_space<smem>>
    %161 = vector.broadcast %160 : f32 to vector<8x128xf32>
    %162 = arith.addf %159, %161 : vector<8x128xf32>
    %cst_45 = arith.constant 0.000000e+00 : f32
    %163 = vector.broadcast %cst_45 : f32 to vector<8x128xf32>
    %164 = arith.maximumf %162, %163 : vector<8x128xf32>
    %c12_46 = arith.constant 12 : index
    %165 = memref.load %arg4[%c12_46] : memref<100xf32, #tpu.memory_space<smem>>
    %166 = vector.broadcast %165 : f32 to vector<8x128xf32>
    %167 = arith.mulf %164, %166 : vector<8x128xf32>
    %168 = arith.addf %156, %167 : vector<8x128xf32>
    %c13 = arith.constant 13 : index
    %169 = memref.load %arg2[%c13] : memref<100xf32, #tpu.memory_space<smem>>
    %170 = vector.broadcast %169 : f32 to vector<8x128xf32>
    %171 = arith.mulf %11, %170 : vector<8x128xf32>
    %c13_47 = arith.constant 13 : index
    %172 = memref.load %arg3[%c13_47] : memref<100xf32, #tpu.memory_space<smem>>
    %173 = vector.broadcast %172 : f32 to vector<8x128xf32>
    %174 = arith.addf %171, %173 : vector<8x128xf32>
    %cst_48 = arith.constant 0.000000e+00 : f32
    %175 = vector.broadcast %cst_48 : f32 to vector<8x128xf32>
    %176 = arith.maximumf %174, %175 : vector<8x128xf32>
    %c13_49 = arith.constant 13 : index
    %177 = memref.load %arg4[%c13_49] : memref<100xf32, #tpu.memory_space<smem>>
    %178 = vector.broadcast %177 : f32 to vector<8x128xf32>
    %179 = arith.mulf %176, %178 : vector<8x128xf32>
    %180 = arith.addf %168, %179 : vector<8x128xf32>
    %c14 = arith.constant 14 : index
    %181 = memref.load %arg2[%c14] : memref<100xf32, #tpu.memory_space<smem>>
    %182 = vector.broadcast %181 : f32 to vector<8x128xf32>
    %183 = arith.mulf %11, %182 : vector<8x128xf32>
    %c14_50 = arith.constant 14 : index
    %184 = memref.load %arg3[%c14_50] : memref<100xf32, #tpu.memory_space<smem>>
    %185 = vector.broadcast %184 : f32 to vector<8x128xf32>
    %186 = arith.addf %183, %185 : vector<8x128xf32>
    %cst_51 = arith.constant 0.000000e+00 : f32
    %187 = vector.broadcast %cst_51 : f32 to vector<8x128xf32>
    %188 = arith.maximumf %186, %187 : vector<8x128xf32>
    %c14_52 = arith.constant 14 : index
    %189 = memref.load %arg4[%c14_52] : memref<100xf32, #tpu.memory_space<smem>>
    %190 = vector.broadcast %189 : f32 to vector<8x128xf32>
    %191 = arith.mulf %188, %190 : vector<8x128xf32>
    %192 = arith.addf %180, %191 : vector<8x128xf32>
    %c15 = arith.constant 15 : index
    %193 = memref.load %arg2[%c15] : memref<100xf32, #tpu.memory_space<smem>>
    %194 = vector.broadcast %193 : f32 to vector<8x128xf32>
    %195 = arith.mulf %11, %194 : vector<8x128xf32>
    %c15_53 = arith.constant 15 : index
    %196 = memref.load %arg3[%c15_53] : memref<100xf32, #tpu.memory_space<smem>>
    %197 = vector.broadcast %196 : f32 to vector<8x128xf32>
    %198 = arith.addf %195, %197 : vector<8x128xf32>
    %cst_54 = arith.constant 0.000000e+00 : f32
    %199 = vector.broadcast %cst_54 : f32 to vector<8x128xf32>
    %200 = arith.maximumf %198, %199 : vector<8x128xf32>
    %c15_55 = arith.constant 15 : index
    %201 = memref.load %arg4[%c15_55] : memref<100xf32, #tpu.memory_space<smem>>
    %202 = vector.broadcast %201 : f32 to vector<8x128xf32>
    %203 = arith.mulf %200, %202 : vector<8x128xf32>
    %204 = arith.addf %192, %203 : vector<8x128xf32>
    %c16 = arith.constant 16 : index
    %205 = memref.load %arg2[%c16] : memref<100xf32, #tpu.memory_space<smem>>
    %206 = vector.broadcast %205 : f32 to vector<8x128xf32>
    %207 = arith.mulf %11, %206 : vector<8x128xf32>
    %c16_56 = arith.constant 16 : index
    %208 = memref.load %arg3[%c16_56] : memref<100xf32, #tpu.memory_space<smem>>
    %209 = vector.broadcast %208 : f32 to vector<8x128xf32>
    %210 = arith.addf %207, %209 : vector<8x128xf32>
    %cst_57 = arith.constant 0.000000e+00 : f32
    %211 = vector.broadcast %cst_57 : f32 to vector<8x128xf32>
    %212 = arith.maximumf %210, %211 : vector<8x128xf32>
    %c16_58 = arith.constant 16 : index
    %213 = memref.load %arg4[%c16_58] : memref<100xf32, #tpu.memory_space<smem>>
    %214 = vector.broadcast %213 : f32 to vector<8x128xf32>
    %215 = arith.mulf %212, %214 : vector<8x128xf32>
    %216 = arith.addf %204, %215 : vector<8x128xf32>
    %c17 = arith.constant 17 : index
    %217 = memref.load %arg2[%c17] : memref<100xf32, #tpu.memory_space<smem>>
    %218 = vector.broadcast %217 : f32 to vector<8x128xf32>
    %219 = arith.mulf %11, %218 : vector<8x128xf32>
    %c17_59 = arith.constant 17 : index
    %220 = memref.load %arg3[%c17_59] : memref<100xf32, #tpu.memory_space<smem>>
    %221 = vector.broadcast %220 : f32 to vector<8x128xf32>
    %222 = arith.addf %219, %221 : vector<8x128xf32>
    %cst_60 = arith.constant 0.000000e+00 : f32
    %223 = vector.broadcast %cst_60 : f32 to vector<8x128xf32>
    %224 = arith.maximumf %222, %223 : vector<8x128xf32>
    %c17_61 = arith.constant 17 : index
    %225 = memref.load %arg4[%c17_61] : memref<100xf32, #tpu.memory_space<smem>>
    %226 = vector.broadcast %225 : f32 to vector<8x128xf32>
    %227 = arith.mulf %224, %226 : vector<8x128xf32>
    %228 = arith.addf %216, %227 : vector<8x128xf32>
    %c18 = arith.constant 18 : index
    %229 = memref.load %arg2[%c18] : memref<100xf32, #tpu.memory_space<smem>>
    %230 = vector.broadcast %229 : f32 to vector<8x128xf32>
    %231 = arith.mulf %11, %230 : vector<8x128xf32>
    %c18_62 = arith.constant 18 : index
    %232 = memref.load %arg3[%c18_62] : memref<100xf32, #tpu.memory_space<smem>>
    %233 = vector.broadcast %232 : f32 to vector<8x128xf32>
    %234 = arith.addf %231, %233 : vector<8x128xf32>
    %cst_63 = arith.constant 0.000000e+00 : f32
    %235 = vector.broadcast %cst_63 : f32 to vector<8x128xf32>
    %236 = arith.maximumf %234, %235 : vector<8x128xf32>
    %c18_64 = arith.constant 18 : index
    %237 = memref.load %arg4[%c18_64] : memref<100xf32, #tpu.memory_space<smem>>
    %238 = vector.broadcast %237 : f32 to vector<8x128xf32>
    %239 = arith.mulf %236, %238 : vector<8x128xf32>
    %240 = arith.addf %228, %239 : vector<8x128xf32>
    %c19 = arith.constant 19 : index
    %241 = memref.load %arg2[%c19] : memref<100xf32, #tpu.memory_space<smem>>
    %242 = vector.broadcast %241 : f32 to vector<8x128xf32>
    %243 = arith.mulf %11, %242 : vector<8x128xf32>
    %c19_65 = arith.constant 19 : index
    %244 = memref.load %arg3[%c19_65] : memref<100xf32, #tpu.memory_space<smem>>
    %245 = vector.broadcast %244 : f32 to vector<8x128xf32>
    %246 = arith.addf %243, %245 : vector<8x128xf32>
    %cst_66 = arith.constant 0.000000e+00 : f32
    %247 = vector.broadcast %cst_66 : f32 to vector<8x128xf32>
    %248 = arith.maximumf %246, %247 : vector<8x128xf32>
    %c19_67 = arith.constant 19 : index
    %249 = memref.load %arg4[%c19_67] : memref<100xf32, #tpu.memory_space<smem>>
    %250 = vector.broadcast %249 : f32 to vector<8x128xf32>
    %251 = arith.mulf %248, %250 : vector<8x128xf32>
    %252 = arith.addf %240, %251 : vector<8x128xf32>
    %c20 = arith.constant 20 : index
    %253 = memref.load %arg2[%c20] : memref<100xf32, #tpu.memory_space<smem>>
    %254 = vector.broadcast %253 : f32 to vector<8x128xf32>
    %255 = arith.mulf %11, %254 : vector<8x128xf32>
    %c20_68 = arith.constant 20 : index
    %256 = memref.load %arg3[%c20_68] : memref<100xf32, #tpu.memory_space<smem>>
    %257 = vector.broadcast %256 : f32 to vector<8x128xf32>
    %258 = arith.addf %255, %257 : vector<8x128xf32>
    %cst_69 = arith.constant 0.000000e+00 : f32
    %259 = vector.broadcast %cst_69 : f32 to vector<8x128xf32>
    %260 = arith.maximumf %258, %259 : vector<8x128xf32>
    %c20_70 = arith.constant 20 : index
    %261 = memref.load %arg4[%c20_70] : memref<100xf32, #tpu.memory_space<smem>>
    %262 = vector.broadcast %261 : f32 to vector<8x128xf32>
    %263 = arith.mulf %260, %262 : vector<8x128xf32>
    %264 = arith.addf %252, %263 : vector<8x128xf32>
    %c21 = arith.constant 21 : index
    %265 = memref.load %arg2[%c21] : memref<100xf32, #tpu.memory_space<smem>>
    %266 = vector.broadcast %265 : f32 to vector<8x128xf32>
    %267 = arith.mulf %11, %266 : vector<8x128xf32>
    %c21_71 = arith.constant 21 : index
    %268 = memref.load %arg3[%c21_71] : memref<100xf32, #tpu.memory_space<smem>>
    %269 = vector.broadcast %268 : f32 to vector<8x128xf32>
    %270 = arith.addf %267, %269 : vector<8x128xf32>
    %cst_72 = arith.constant 0.000000e+00 : f32
    %271 = vector.broadcast %cst_72 : f32 to vector<8x128xf32>
    %272 = arith.maximumf %270, %271 : vector<8x128xf32>
    %c21_73 = arith.constant 21 : index
    %273 = memref.load %arg4[%c21_73] : memref<100xf32, #tpu.memory_space<smem>>
    %274 = vector.broadcast %273 : f32 to vector<8x128xf32>
    %275 = arith.mulf %272, %274 : vector<8x128xf32>
    %276 = arith.addf %264, %275 : vector<8x128xf32>
    %c22 = arith.constant 22 : index
    %277 = memref.load %arg2[%c22] : memref<100xf32, #tpu.memory_space<smem>>
    %278 = vector.broadcast %277 : f32 to vector<8x128xf32>
    %279 = arith.mulf %11, %278 : vector<8x128xf32>
    %c22_74 = arith.constant 22 : index
    %280 = memref.load %arg3[%c22_74] : memref<100xf32, #tpu.memory_space<smem>>
    %281 = vector.broadcast %280 : f32 to vector<8x128xf32>
    %282 = arith.addf %279, %281 : vector<8x128xf32>
    %cst_75 = arith.constant 0.000000e+00 : f32
    %283 = vector.broadcast %cst_75 : f32 to vector<8x128xf32>
    %284 = arith.maximumf %282, %283 : vector<8x128xf32>
    %c22_76 = arith.constant 22 : index
    %285 = memref.load %arg4[%c22_76] : memref<100xf32, #tpu.memory_space<smem>>
    %286 = vector.broadcast %285 : f32 to vector<8x128xf32>
    %287 = arith.mulf %284, %286 : vector<8x128xf32>
    %288 = arith.addf %276, %287 : vector<8x128xf32>
    %c23 = arith.constant 23 : index
    %289 = memref.load %arg2[%c23] : memref<100xf32, #tpu.memory_space<smem>>
    %290 = vector.broadcast %289 : f32 to vector<8x128xf32>
    %291 = arith.mulf %11, %290 : vector<8x128xf32>
    %c23_77 = arith.constant 23 : index
    %292 = memref.load %arg3[%c23_77] : memref<100xf32, #tpu.memory_space<smem>>
    %293 = vector.broadcast %292 : f32 to vector<8x128xf32>
    %294 = arith.addf %291, %293 : vector<8x128xf32>
    %cst_78 = arith.constant 0.000000e+00 : f32
    %295 = vector.broadcast %cst_78 : f32 to vector<8x128xf32>
    %296 = arith.maximumf %294, %295 : vector<8x128xf32>
    %c23_79 = arith.constant 23 : index
    %297 = memref.load %arg4[%c23_79] : memref<100xf32, #tpu.memory_space<smem>>
    %298 = vector.broadcast %297 : f32 to vector<8x128xf32>
    %299 = arith.mulf %296, %298 : vector<8x128xf32>
    %300 = arith.addf %288, %299 : vector<8x128xf32>
    %c24 = arith.constant 24 : index
    %301 = memref.load %arg2[%c24] : memref<100xf32, #tpu.memory_space<smem>>
    %302 = vector.broadcast %301 : f32 to vector<8x128xf32>
    %303 = arith.mulf %11, %302 : vector<8x128xf32>
    %c24_80 = arith.constant 24 : index
    %304 = memref.load %arg3[%c24_80] : memref<100xf32, #tpu.memory_space<smem>>
    %305 = vector.broadcast %304 : f32 to vector<8x128xf32>
    %306 = arith.addf %303, %305 : vector<8x128xf32>
    %cst_81 = arith.constant 0.000000e+00 : f32
    %307 = vector.broadcast %cst_81 : f32 to vector<8x128xf32>
    %308 = arith.maximumf %306, %307 : vector<8x128xf32>
    %c24_82 = arith.constant 24 : index
    %309 = memref.load %arg4[%c24_82] : memref<100xf32, #tpu.memory_space<smem>>
    %310 = vector.broadcast %309 : f32 to vector<8x128xf32>
    %311 = arith.mulf %308, %310 : vector<8x128xf32>
    %312 = arith.addf %300, %311 : vector<8x128xf32>
    %c25 = arith.constant 25 : index
    %313 = memref.load %arg2[%c25] : memref<100xf32, #tpu.memory_space<smem>>
    %314 = vector.broadcast %313 : f32 to vector<8x128xf32>
    %315 = arith.mulf %11, %314 : vector<8x128xf32>
    %c25_83 = arith.constant 25 : index
    %316 = memref.load %arg3[%c25_83] : memref<100xf32, #tpu.memory_space<smem>>
    %317 = vector.broadcast %316 : f32 to vector<8x128xf32>
    %318 = arith.addf %315, %317 : vector<8x128xf32>
    %cst_84 = arith.constant 0.000000e+00 : f32
    %319 = vector.broadcast %cst_84 : f32 to vector<8x128xf32>
    %320 = arith.maximumf %318, %319 : vector<8x128xf32>
    %c25_85 = arith.constant 25 : index
    %321 = memref.load %arg4[%c25_85] : memref<100xf32, #tpu.memory_space<smem>>
    %322 = vector.broadcast %321 : f32 to vector<8x128xf32>
    %323 = arith.mulf %320, %322 : vector<8x128xf32>
    %324 = arith.addf %312, %323 : vector<8x128xf32>
    %c26 = arith.constant 26 : index
    %325 = memref.load %arg2[%c26] : memref<100xf32, #tpu.memory_space<smem>>
    %326 = vector.broadcast %325 : f32 to vector<8x128xf32>
    %327 = arith.mulf %11, %326 : vector<8x128xf32>
    %c26_86 = arith.constant 26 : index
    %328 = memref.load %arg3[%c26_86] : memref<100xf32, #tpu.memory_space<smem>>
    %329 = vector.broadcast %328 : f32 to vector<8x128xf32>
    %330 = arith.addf %327, %329 : vector<8x128xf32>
    %cst_87 = arith.constant 0.000000e+00 : f32
    %331 = vector.broadcast %cst_87 : f32 to vector<8x128xf32>
    %332 = arith.maximumf %330, %331 : vector<8x128xf32>
    %c26_88 = arith.constant 26 : index
    %333 = memref.load %arg4[%c26_88] : memref<100xf32, #tpu.memory_space<smem>>
    %334 = vector.broadcast %333 : f32 to vector<8x128xf32>
    %335 = arith.mulf %332, %334 : vector<8x128xf32>
    %336 = arith.addf %324, %335 : vector<8x128xf32>
    %c27 = arith.constant 27 : index
    %337 = memref.load %arg2[%c27] : memref<100xf32, #tpu.memory_space<smem>>
    %338 = vector.broadcast %337 : f32 to vector<8x128xf32>
    %339 = arith.mulf %11, %338 : vector<8x128xf32>
    %c27_89 = arith.constant 27 : index
    %340 = memref.load %arg3[%c27_89] : memref<100xf32, #tpu.memory_space<smem>>
    %341 = vector.broadcast %340 : f32 to vector<8x128xf32>
    %342 = arith.addf %339, %341 : vector<8x128xf32>
    %cst_90 = arith.constant 0.000000e+00 : f32
    %343 = vector.broadcast %cst_90 : f32 to vector<8x128xf32>
    %344 = arith.maximumf %342, %343 : vector<8x128xf32>
    %c27_91 = arith.constant 27 : index
    %345 = memref.load %arg4[%c27_91] : memref<100xf32, #tpu.memory_space<smem>>
    %346 = vector.broadcast %345 : f32 to vector<8x128xf32>
    %347 = arith.mulf %344, %346 : vector<8x128xf32>
    %348 = arith.addf %336, %347 : vector<8x128xf32>
    %c28 = arith.constant 28 : index
    %349 = memref.load %arg2[%c28] : memref<100xf32, #tpu.memory_space<smem>>
    %350 = vector.broadcast %349 : f32 to vector<8x128xf32>
    %351 = arith.mulf %11, %350 : vector<8x128xf32>
    %c28_92 = arith.constant 28 : index
    %352 = memref.load %arg3[%c28_92] : memref<100xf32, #tpu.memory_space<smem>>
    %353 = vector.broadcast %352 : f32 to vector<8x128xf32>
    %354 = arith.addf %351, %353 : vector<8x128xf32>
    %cst_93 = arith.constant 0.000000e+00 : f32
    %355 = vector.broadcast %cst_93 : f32 to vector<8x128xf32>
    %356 = arith.maximumf %354, %355 : vector<8x128xf32>
    %c28_94 = arith.constant 28 : index
    %357 = memref.load %arg4[%c28_94] : memref<100xf32, #tpu.memory_space<smem>>
    %358 = vector.broadcast %357 : f32 to vector<8x128xf32>
    %359 = arith.mulf %356, %358 : vector<8x128xf32>
    %360 = arith.addf %348, %359 : vector<8x128xf32>
    %c29 = arith.constant 29 : index
    %361 = memref.load %arg2[%c29] : memref<100xf32, #tpu.memory_space<smem>>
    %362 = vector.broadcast %361 : f32 to vector<8x128xf32>
    %363 = arith.mulf %11, %362 : vector<8x128xf32>
    %c29_95 = arith.constant 29 : index
    %364 = memref.load %arg3[%c29_95] : memref<100xf32, #tpu.memory_space<smem>>
    %365 = vector.broadcast %364 : f32 to vector<8x128xf32>
    %366 = arith.addf %363, %365 : vector<8x128xf32>
    %cst_96 = arith.constant 0.000000e+00 : f32
    %367 = vector.broadcast %cst_96 : f32 to vector<8x128xf32>
    %368 = arith.maximumf %366, %367 : vector<8x128xf32>
    %c29_97 = arith.constant 29 : index
    %369 = memref.load %arg4[%c29_97] : memref<100xf32, #tpu.memory_space<smem>>
    %370 = vector.broadcast %369 : f32 to vector<8x128xf32>
    %371 = arith.mulf %368, %370 : vector<8x128xf32>
    %372 = arith.addf %360, %371 : vector<8x128xf32>
    %c30 = arith.constant 30 : index
    %373 = memref.load %arg2[%c30] : memref<100xf32, #tpu.memory_space<smem>>
    %374 = vector.broadcast %373 : f32 to vector<8x128xf32>
    %375 = arith.mulf %11, %374 : vector<8x128xf32>
    %c30_98 = arith.constant 30 : index
    %376 = memref.load %arg3[%c30_98] : memref<100xf32, #tpu.memory_space<smem>>
    %377 = vector.broadcast %376 : f32 to vector<8x128xf32>
    %378 = arith.addf %375, %377 : vector<8x128xf32>
    %cst_99 = arith.constant 0.000000e+00 : f32
    %379 = vector.broadcast %cst_99 : f32 to vector<8x128xf32>
    %380 = arith.maximumf %378, %379 : vector<8x128xf32>
    %c30_100 = arith.constant 30 : index
    %381 = memref.load %arg4[%c30_100] : memref<100xf32, #tpu.memory_space<smem>>
    %382 = vector.broadcast %381 : f32 to vector<8x128xf32>
    %383 = arith.mulf %380, %382 : vector<8x128xf32>
    %384 = arith.addf %372, %383 : vector<8x128xf32>
    %c31 = arith.constant 31 : index
    %385 = memref.load %arg2[%c31] : memref<100xf32, #tpu.memory_space<smem>>
    %386 = vector.broadcast %385 : f32 to vector<8x128xf32>
    %387 = arith.mulf %11, %386 : vector<8x128xf32>
    %c31_101 = arith.constant 31 : index
    %388 = memref.load %arg3[%c31_101] : memref<100xf32, #tpu.memory_space<smem>>
    %389 = vector.broadcast %388 : f32 to vector<8x128xf32>
    %390 = arith.addf %387, %389 : vector<8x128xf32>
    %cst_102 = arith.constant 0.000000e+00 : f32
    %391 = vector.broadcast %cst_102 : f32 to vector<8x128xf32>
    %392 = arith.maximumf %390, %391 : vector<8x128xf32>
    %c31_103 = arith.constant 31 : index
    %393 = memref.load %arg4[%c31_103] : memref<100xf32, #tpu.memory_space<smem>>
    %394 = vector.broadcast %393 : f32 to vector<8x128xf32>
    %395 = arith.mulf %392, %394 : vector<8x128xf32>
    %396 = arith.addf %384, %395 : vector<8x128xf32>
    %c32 = arith.constant 32 : index
    %397 = memref.load %arg2[%c32] : memref<100xf32, #tpu.memory_space<smem>>
    %398 = vector.broadcast %397 : f32 to vector<8x128xf32>
    %399 = arith.mulf %11, %398 : vector<8x128xf32>
    %c32_104 = arith.constant 32 : index
    %400 = memref.load %arg3[%c32_104] : memref<100xf32, #tpu.memory_space<smem>>
    %401 = vector.broadcast %400 : f32 to vector<8x128xf32>
    %402 = arith.addf %399, %401 : vector<8x128xf32>
    %cst_105 = arith.constant 0.000000e+00 : f32
    %403 = vector.broadcast %cst_105 : f32 to vector<8x128xf32>
    %404 = arith.maximumf %402, %403 : vector<8x128xf32>
    %c32_106 = arith.constant 32 : index
    %405 = memref.load %arg4[%c32_106] : memref<100xf32, #tpu.memory_space<smem>>
    %406 = vector.broadcast %405 : f32 to vector<8x128xf32>
    %407 = arith.mulf %404, %406 : vector<8x128xf32>
    %408 = arith.addf %396, %407 : vector<8x128xf32>
    %c33 = arith.constant 33 : index
    %409 = memref.load %arg2[%c33] : memref<100xf32, #tpu.memory_space<smem>>
    %410 = vector.broadcast %409 : f32 to vector<8x128xf32>
    %411 = arith.mulf %11, %410 : vector<8x128xf32>
    %c33_107 = arith.constant 33 : index
    %412 = memref.load %arg3[%c33_107] : memref<100xf32, #tpu.memory_space<smem>>
    %413 = vector.broadcast %412 : f32 to vector<8x128xf32>
    %414 = arith.addf %411, %413 : vector<8x128xf32>
    %cst_108 = arith.constant 0.000000e+00 : f32
    %415 = vector.broadcast %cst_108 : f32 to vector<8x128xf32>
    %416 = arith.maximumf %414, %415 : vector<8x128xf32>
    %c33_109 = arith.constant 33 : index
    %417 = memref.load %arg4[%c33_109] : memref<100xf32, #tpu.memory_space<smem>>
    %418 = vector.broadcast %417 : f32 to vector<8x128xf32>
    %419 = arith.mulf %416, %418 : vector<8x128xf32>
    %420 = arith.addf %408, %419 : vector<8x128xf32>
    %c34 = arith.constant 34 : index
    %421 = memref.load %arg2[%c34] : memref<100xf32, #tpu.memory_space<smem>>
    %422 = vector.broadcast %421 : f32 to vector<8x128xf32>
    %423 = arith.mulf %11, %422 : vector<8x128xf32>
    %c34_110 = arith.constant 34 : index
    %424 = memref.load %arg3[%c34_110] : memref<100xf32, #tpu.memory_space<smem>>
    %425 = vector.broadcast %424 : f32 to vector<8x128xf32>
    %426 = arith.addf %423, %425 : vector<8x128xf32>
    %cst_111 = arith.constant 0.000000e+00 : f32
    %427 = vector.broadcast %cst_111 : f32 to vector<8x128xf32>
    %428 = arith.maximumf %426, %427 : vector<8x128xf32>
    %c34_112 = arith.constant 34 : index
    %429 = memref.load %arg4[%c34_112] : memref<100xf32, #tpu.memory_space<smem>>
    %430 = vector.broadcast %429 : f32 to vector<8x128xf32>
    %431 = arith.mulf %428, %430 : vector<8x128xf32>
    %432 = arith.addf %420, %431 : vector<8x128xf32>
    %c35 = arith.constant 35 : index
    %433 = memref.load %arg2[%c35] : memref<100xf32, #tpu.memory_space<smem>>
    %434 = vector.broadcast %433 : f32 to vector<8x128xf32>
    %435 = arith.mulf %11, %434 : vector<8x128xf32>
    %c35_113 = arith.constant 35 : index
    %436 = memref.load %arg3[%c35_113] : memref<100xf32, #tpu.memory_space<smem>>
    %437 = vector.broadcast %436 : f32 to vector<8x128xf32>
    %438 = arith.addf %435, %437 : vector<8x128xf32>
    %cst_114 = arith.constant 0.000000e+00 : f32
    %439 = vector.broadcast %cst_114 : f32 to vector<8x128xf32>
    %440 = arith.maximumf %438, %439 : vector<8x128xf32>
    %c35_115 = arith.constant 35 : index
    %441 = memref.load %arg4[%c35_115] : memref<100xf32, #tpu.memory_space<smem>>
    %442 = vector.broadcast %441 : f32 to vector<8x128xf32>
    %443 = arith.mulf %440, %442 : vector<8x128xf32>
    %444 = arith.addf %432, %443 : vector<8x128xf32>
    %c36 = arith.constant 36 : index
    %445 = memref.load %arg2[%c36] : memref<100xf32, #tpu.memory_space<smem>>
    %446 = vector.broadcast %445 : f32 to vector<8x128xf32>
    %447 = arith.mulf %11, %446 : vector<8x128xf32>
    %c36_116 = arith.constant 36 : index
    %448 = memref.load %arg3[%c36_116] : memref<100xf32, #tpu.memory_space<smem>>
    %449 = vector.broadcast %448 : f32 to vector<8x128xf32>
    %450 = arith.addf %447, %449 : vector<8x128xf32>
    %cst_117 = arith.constant 0.000000e+00 : f32
    %451 = vector.broadcast %cst_117 : f32 to vector<8x128xf32>
    %452 = arith.maximumf %450, %451 : vector<8x128xf32>
    %c36_118 = arith.constant 36 : index
    %453 = memref.load %arg4[%c36_118] : memref<100xf32, #tpu.memory_space<smem>>
    %454 = vector.broadcast %453 : f32 to vector<8x128xf32>
    %455 = arith.mulf %452, %454 : vector<8x128xf32>
    %456 = arith.addf %444, %455 : vector<8x128xf32>
    %c37 = arith.constant 37 : index
    %457 = memref.load %arg2[%c37] : memref<100xf32, #tpu.memory_space<smem>>
    %458 = vector.broadcast %457 : f32 to vector<8x128xf32>
    %459 = arith.mulf %11, %458 : vector<8x128xf32>
    %c37_119 = arith.constant 37 : index
    %460 = memref.load %arg3[%c37_119] : memref<100xf32, #tpu.memory_space<smem>>
    %461 = vector.broadcast %460 : f32 to vector<8x128xf32>
    %462 = arith.addf %459, %461 : vector<8x128xf32>
    %cst_120 = arith.constant 0.000000e+00 : f32
    %463 = vector.broadcast %cst_120 : f32 to vector<8x128xf32>
    %464 = arith.maximumf %462, %463 : vector<8x128xf32>
    %c37_121 = arith.constant 37 : index
    %465 = memref.load %arg4[%c37_121] : memref<100xf32, #tpu.memory_space<smem>>
    %466 = vector.broadcast %465 : f32 to vector<8x128xf32>
    %467 = arith.mulf %464, %466 : vector<8x128xf32>
    %468 = arith.addf %456, %467 : vector<8x128xf32>
    %c38 = arith.constant 38 : index
    %469 = memref.load %arg2[%c38] : memref<100xf32, #tpu.memory_space<smem>>
    %470 = vector.broadcast %469 : f32 to vector<8x128xf32>
    %471 = arith.mulf %11, %470 : vector<8x128xf32>
    %c38_122 = arith.constant 38 : index
    %472 = memref.load %arg3[%c38_122] : memref<100xf32, #tpu.memory_space<smem>>
    %473 = vector.broadcast %472 : f32 to vector<8x128xf32>
    %474 = arith.addf %471, %473 : vector<8x128xf32>
    %cst_123 = arith.constant 0.000000e+00 : f32
    %475 = vector.broadcast %cst_123 : f32 to vector<8x128xf32>
    %476 = arith.maximumf %474, %475 : vector<8x128xf32>
    %c38_124 = arith.constant 38 : index
    %477 = memref.load %arg4[%c38_124] : memref<100xf32, #tpu.memory_space<smem>>
    %478 = vector.broadcast %477 : f32 to vector<8x128xf32>
    %479 = arith.mulf %476, %478 : vector<8x128xf32>
    %480 = arith.addf %468, %479 : vector<8x128xf32>
    %c39 = arith.constant 39 : index
    %481 = memref.load %arg2[%c39] : memref<100xf32, #tpu.memory_space<smem>>
    %482 = vector.broadcast %481 : f32 to vector<8x128xf32>
    %483 = arith.mulf %11, %482 : vector<8x128xf32>
    %c39_125 = arith.constant 39 : index
    %484 = memref.load %arg3[%c39_125] : memref<100xf32, #tpu.memory_space<smem>>
    %485 = vector.broadcast %484 : f32 to vector<8x128xf32>
    %486 = arith.addf %483, %485 : vector<8x128xf32>
    %cst_126 = arith.constant 0.000000e+00 : f32
    %487 = vector.broadcast %cst_126 : f32 to vector<8x128xf32>
    %488 = arith.maximumf %486, %487 : vector<8x128xf32>
    %c39_127 = arith.constant 39 : index
    %489 = memref.load %arg4[%c39_127] : memref<100xf32, #tpu.memory_space<smem>>
    %490 = vector.broadcast %489 : f32 to vector<8x128xf32>
    %491 = arith.mulf %488, %490 : vector<8x128xf32>
    %492 = arith.addf %480, %491 : vector<8x128xf32>
    %c40 = arith.constant 40 : index
    %493 = memref.load %arg2[%c40] : memref<100xf32, #tpu.memory_space<smem>>
    %494 = vector.broadcast %493 : f32 to vector<8x128xf32>
    %495 = arith.mulf %11, %494 : vector<8x128xf32>
    %c40_128 = arith.constant 40 : index
    %496 = memref.load %arg3[%c40_128] : memref<100xf32, #tpu.memory_space<smem>>
    %497 = vector.broadcast %496 : f32 to vector<8x128xf32>
    %498 = arith.addf %495, %497 : vector<8x128xf32>
    %cst_129 = arith.constant 0.000000e+00 : f32
    %499 = vector.broadcast %cst_129 : f32 to vector<8x128xf32>
    %500 = arith.maximumf %498, %499 : vector<8x128xf32>
    %c40_130 = arith.constant 40 : index
    %501 = memref.load %arg4[%c40_130] : memref<100xf32, #tpu.memory_space<smem>>
    %502 = vector.broadcast %501 : f32 to vector<8x128xf32>
    %503 = arith.mulf %500, %502 : vector<8x128xf32>
    %504 = arith.addf %492, %503 : vector<8x128xf32>
    %c41 = arith.constant 41 : index
    %505 = memref.load %arg2[%c41] : memref<100xf32, #tpu.memory_space<smem>>
    %506 = vector.broadcast %505 : f32 to vector<8x128xf32>
    %507 = arith.mulf %11, %506 : vector<8x128xf32>
    %c41_131 = arith.constant 41 : index
    %508 = memref.load %arg3[%c41_131] : memref<100xf32, #tpu.memory_space<smem>>
    %509 = vector.broadcast %508 : f32 to vector<8x128xf32>
    %510 = arith.addf %507, %509 : vector<8x128xf32>
    %cst_132 = arith.constant 0.000000e+00 : f32
    %511 = vector.broadcast %cst_132 : f32 to vector<8x128xf32>
    %512 = arith.maximumf %510, %511 : vector<8x128xf32>
    %c41_133 = arith.constant 41 : index
    %513 = memref.load %arg4[%c41_133] : memref<100xf32, #tpu.memory_space<smem>>
    %514 = vector.broadcast %513 : f32 to vector<8x128xf32>
    %515 = arith.mulf %512, %514 : vector<8x128xf32>
    %516 = arith.addf %504, %515 : vector<8x128xf32>
    %c42 = arith.constant 42 : index
    %517 = memref.load %arg2[%c42] : memref<100xf32, #tpu.memory_space<smem>>
    %518 = vector.broadcast %517 : f32 to vector<8x128xf32>
    %519 = arith.mulf %11, %518 : vector<8x128xf32>
    %c42_134 = arith.constant 42 : index
    %520 = memref.load %arg3[%c42_134] : memref<100xf32, #tpu.memory_space<smem>>
    %521 = vector.broadcast %520 : f32 to vector<8x128xf32>
    %522 = arith.addf %519, %521 : vector<8x128xf32>
    %cst_135 = arith.constant 0.000000e+00 : f32
    %523 = vector.broadcast %cst_135 : f32 to vector<8x128xf32>
    %524 = arith.maximumf %522, %523 : vector<8x128xf32>
    %c42_136 = arith.constant 42 : index
    %525 = memref.load %arg4[%c42_136] : memref<100xf32, #tpu.memory_space<smem>>
    %526 = vector.broadcast %525 : f32 to vector<8x128xf32>
    %527 = arith.mulf %524, %526 : vector<8x128xf32>
    %528 = arith.addf %516, %527 : vector<8x128xf32>
    %c43 = arith.constant 43 : index
    %529 = memref.load %arg2[%c43] : memref<100xf32, #tpu.memory_space<smem>>
    %530 = vector.broadcast %529 : f32 to vector<8x128xf32>
    %531 = arith.mulf %11, %530 : vector<8x128xf32>
    %c43_137 = arith.constant 43 : index
    %532 = memref.load %arg3[%c43_137] : memref<100xf32, #tpu.memory_space<smem>>
    %533 = vector.broadcast %532 : f32 to vector<8x128xf32>
    %534 = arith.addf %531, %533 : vector<8x128xf32>
    %cst_138 = arith.constant 0.000000e+00 : f32
    %535 = vector.broadcast %cst_138 : f32 to vector<8x128xf32>
    %536 = arith.maximumf %534, %535 : vector<8x128xf32>
    %c43_139 = arith.constant 43 : index
    %537 = memref.load %arg4[%c43_139] : memref<100xf32, #tpu.memory_space<smem>>
    %538 = vector.broadcast %537 : f32 to vector<8x128xf32>
    %539 = arith.mulf %536, %538 : vector<8x128xf32>
    %540 = arith.addf %528, %539 : vector<8x128xf32>
    %c44 = arith.constant 44 : index
    %541 = memref.load %arg2[%c44] : memref<100xf32, #tpu.memory_space<smem>>
    %542 = vector.broadcast %541 : f32 to vector<8x128xf32>
    %543 = arith.mulf %11, %542 : vector<8x128xf32>
    %c44_140 = arith.constant 44 : index
    %544 = memref.load %arg3[%c44_140] : memref<100xf32, #tpu.memory_space<smem>>
    %545 = vector.broadcast %544 : f32 to vector<8x128xf32>
    %546 = arith.addf %543, %545 : vector<8x128xf32>
    %cst_141 = arith.constant 0.000000e+00 : f32
    %547 = vector.broadcast %cst_141 : f32 to vector<8x128xf32>
    %548 = arith.maximumf %546, %547 : vector<8x128xf32>
    %c44_142 = arith.constant 44 : index
    %549 = memref.load %arg4[%c44_142] : memref<100xf32, #tpu.memory_space<smem>>
    %550 = vector.broadcast %549 : f32 to vector<8x128xf32>
    %551 = arith.mulf %548, %550 : vector<8x128xf32>
    %552 = arith.addf %540, %551 : vector<8x128xf32>
    %c45 = arith.constant 45 : index
    %553 = memref.load %arg2[%c45] : memref<100xf32, #tpu.memory_space<smem>>
    %554 = vector.broadcast %553 : f32 to vector<8x128xf32>
    %555 = arith.mulf %11, %554 : vector<8x128xf32>
    %c45_143 = arith.constant 45 : index
    %556 = memref.load %arg3[%c45_143] : memref<100xf32, #tpu.memory_space<smem>>
    %557 = vector.broadcast %556 : f32 to vector<8x128xf32>
    %558 = arith.addf %555, %557 : vector<8x128xf32>
    %cst_144 = arith.constant 0.000000e+00 : f32
    %559 = vector.broadcast %cst_144 : f32 to vector<8x128xf32>
    %560 = arith.maximumf %558, %559 : vector<8x128xf32>
    %c45_145 = arith.constant 45 : index
    %561 = memref.load %arg4[%c45_145] : memref<100xf32, #tpu.memory_space<smem>>
    %562 = vector.broadcast %561 : f32 to vector<8x128xf32>
    %563 = arith.mulf %560, %562 : vector<8x128xf32>
    %564 = arith.addf %552, %563 : vector<8x128xf32>
    %c46 = arith.constant 46 : index
    %565 = memref.load %arg2[%c46] : memref<100xf32, #tpu.memory_space<smem>>
    %566 = vector.broadcast %565 : f32 to vector<8x128xf32>
    %567 = arith.mulf %11, %566 : vector<8x128xf32>
    %c46_146 = arith.constant 46 : index
    %568 = memref.load %arg3[%c46_146] : memref<100xf32, #tpu.memory_space<smem>>
    %569 = vector.broadcast %568 : f32 to vector<8x128xf32>
    %570 = arith.addf %567, %569 : vector<8x128xf32>
    %cst_147 = arith.constant 0.000000e+00 : f32
    %571 = vector.broadcast %cst_147 : f32 to vector<8x128xf32>
    %572 = arith.maximumf %570, %571 : vector<8x128xf32>
    %c46_148 = arith.constant 46 : index
    %573 = memref.load %arg4[%c46_148] : memref<100xf32, #tpu.memory_space<smem>>
    %574 = vector.broadcast %573 : f32 to vector<8x128xf32>
    %575 = arith.mulf %572, %574 : vector<8x128xf32>
    %576 = arith.addf %564, %575 : vector<8x128xf32>
    %c47 = arith.constant 47 : index
    %577 = memref.load %arg2[%c47] : memref<100xf32, #tpu.memory_space<smem>>
    %578 = vector.broadcast %577 : f32 to vector<8x128xf32>
    %579 = arith.mulf %11, %578 : vector<8x128xf32>
    %c47_149 = arith.constant 47 : index
    %580 = memref.load %arg3[%c47_149] : memref<100xf32, #tpu.memory_space<smem>>
    %581 = vector.broadcast %580 : f32 to vector<8x128xf32>
    %582 = arith.addf %579, %581 : vector<8x128xf32>
    %cst_150 = arith.constant 0.000000e+00 : f32
    %583 = vector.broadcast %cst_150 : f32 to vector<8x128xf32>
    %584 = arith.maximumf %582, %583 : vector<8x128xf32>
    %c47_151 = arith.constant 47 : index
    %585 = memref.load %arg4[%c47_151] : memref<100xf32, #tpu.memory_space<smem>>
    %586 = vector.broadcast %585 : f32 to vector<8x128xf32>
    %587 = arith.mulf %584, %586 : vector<8x128xf32>
    %588 = arith.addf %576, %587 : vector<8x128xf32>
    %c48 = arith.constant 48 : index
    %589 = memref.load %arg2[%c48] : memref<100xf32, #tpu.memory_space<smem>>
    %590 = vector.broadcast %589 : f32 to vector<8x128xf32>
    %591 = arith.mulf %11, %590 : vector<8x128xf32>
    %c48_152 = arith.constant 48 : index
    %592 = memref.load %arg3[%c48_152] : memref<100xf32, #tpu.memory_space<smem>>
    %593 = vector.broadcast %592 : f32 to vector<8x128xf32>
    %594 = arith.addf %591, %593 : vector<8x128xf32>
    %cst_153 = arith.constant 0.000000e+00 : f32
    %595 = vector.broadcast %cst_153 : f32 to vector<8x128xf32>
    %596 = arith.maximumf %594, %595 : vector<8x128xf32>
    %c48_154 = arith.constant 48 : index
    %597 = memref.load %arg4[%c48_154] : memref<100xf32, #tpu.memory_space<smem>>
    %598 = vector.broadcast %597 : f32 to vector<8x128xf32>
    %599 = arith.mulf %596, %598 : vector<8x128xf32>
    %600 = arith.addf %588, %599 : vector<8x128xf32>
    %c49 = arith.constant 49 : index
    %601 = memref.load %arg2[%c49] : memref<100xf32, #tpu.memory_space<smem>>
    %602 = vector.broadcast %601 : f32 to vector<8x128xf32>
    %603 = arith.mulf %11, %602 : vector<8x128xf32>
    %c49_155 = arith.constant 49 : index
    %604 = memref.load %arg3[%c49_155] : memref<100xf32, #tpu.memory_space<smem>>
    %605 = vector.broadcast %604 : f32 to vector<8x128xf32>
    %606 = arith.addf %603, %605 : vector<8x128xf32>
    %cst_156 = arith.constant 0.000000e+00 : f32
    %607 = vector.broadcast %cst_156 : f32 to vector<8x128xf32>
    %608 = arith.maximumf %606, %607 : vector<8x128xf32>
    %c49_157 = arith.constant 49 : index
    %609 = memref.load %arg4[%c49_157] : memref<100xf32, #tpu.memory_space<smem>>
    %610 = vector.broadcast %609 : f32 to vector<8x128xf32>
    %611 = arith.mulf %608, %610 : vector<8x128xf32>
    %612 = arith.addf %600, %611 : vector<8x128xf32>
    %c50 = arith.constant 50 : index
    %613 = memref.load %arg2[%c50] : memref<100xf32, #tpu.memory_space<smem>>
    %614 = vector.broadcast %613 : f32 to vector<8x128xf32>
    %615 = arith.mulf %11, %614 : vector<8x128xf32>
    %c50_158 = arith.constant 50 : index
    %616 = memref.load %arg3[%c50_158] : memref<100xf32, #tpu.memory_space<smem>>
    %617 = vector.broadcast %616 : f32 to vector<8x128xf32>
    %618 = arith.addf %615, %617 : vector<8x128xf32>
    %cst_159 = arith.constant 0.000000e+00 : f32
    %619 = vector.broadcast %cst_159 : f32 to vector<8x128xf32>
    %620 = arith.maximumf %618, %619 : vector<8x128xf32>
    %c50_160 = arith.constant 50 : index
    %621 = memref.load %arg4[%c50_160] : memref<100xf32, #tpu.memory_space<smem>>
    %622 = vector.broadcast %621 : f32 to vector<8x128xf32>
    %623 = arith.mulf %620, %622 : vector<8x128xf32>
    %624 = arith.addf %612, %623 : vector<8x128xf32>
    %c51 = arith.constant 51 : index
    %625 = memref.load %arg2[%c51] : memref<100xf32, #tpu.memory_space<smem>>
    %626 = vector.broadcast %625 : f32 to vector<8x128xf32>
    %627 = arith.mulf %11, %626 : vector<8x128xf32>
    %c51_161 = arith.constant 51 : index
    %628 = memref.load %arg3[%c51_161] : memref<100xf32, #tpu.memory_space<smem>>
    %629 = vector.broadcast %628 : f32 to vector<8x128xf32>
    %630 = arith.addf %627, %629 : vector<8x128xf32>
    %cst_162 = arith.constant 0.000000e+00 : f32
    %631 = vector.broadcast %cst_162 : f32 to vector<8x128xf32>
    %632 = arith.maximumf %630, %631 : vector<8x128xf32>
    %c51_163 = arith.constant 51 : index
    %633 = memref.load %arg4[%c51_163] : memref<100xf32, #tpu.memory_space<smem>>
    %634 = vector.broadcast %633 : f32 to vector<8x128xf32>
    %635 = arith.mulf %632, %634 : vector<8x128xf32>
    %636 = arith.addf %624, %635 : vector<8x128xf32>
    %c52 = arith.constant 52 : index
    %637 = memref.load %arg2[%c52] : memref<100xf32, #tpu.memory_space<smem>>
    %638 = vector.broadcast %637 : f32 to vector<8x128xf32>
    %639 = arith.mulf %11, %638 : vector<8x128xf32>
    %c52_164 = arith.constant 52 : index
    %640 = memref.load %arg3[%c52_164] : memref<100xf32, #tpu.memory_space<smem>>
    %641 = vector.broadcast %640 : f32 to vector<8x128xf32>
    %642 = arith.addf %639, %641 : vector<8x128xf32>
    %cst_165 = arith.constant 0.000000e+00 : f32
    %643 = vector.broadcast %cst_165 : f32 to vector<8x128xf32>
    %644 = arith.maximumf %642, %643 : vector<8x128xf32>
    %c52_166 = arith.constant 52 : index
    %645 = memref.load %arg4[%c52_166] : memref<100xf32, #tpu.memory_space<smem>>
    %646 = vector.broadcast %645 : f32 to vector<8x128xf32>
    %647 = arith.mulf %644, %646 : vector<8x128xf32>
    %648 = arith.addf %636, %647 : vector<8x128xf32>
    %c53 = arith.constant 53 : index
    %649 = memref.load %arg2[%c53] : memref<100xf32, #tpu.memory_space<smem>>
    %650 = vector.broadcast %649 : f32 to vector<8x128xf32>
    %651 = arith.mulf %11, %650 : vector<8x128xf32>
    %c53_167 = arith.constant 53 : index
    %652 = memref.load %arg3[%c53_167] : memref<100xf32, #tpu.memory_space<smem>>
    %653 = vector.broadcast %652 : f32 to vector<8x128xf32>
    %654 = arith.addf %651, %653 : vector<8x128xf32>
    %cst_168 = arith.constant 0.000000e+00 : f32
    %655 = vector.broadcast %cst_168 : f32 to vector<8x128xf32>
    %656 = arith.maximumf %654, %655 : vector<8x128xf32>
    %c53_169 = arith.constant 53 : index
    %657 = memref.load %arg4[%c53_169] : memref<100xf32, #tpu.memory_space<smem>>
    %658 = vector.broadcast %657 : f32 to vector<8x128xf32>
    %659 = arith.mulf %656, %658 : vector<8x128xf32>
    %660 = arith.addf %648, %659 : vector<8x128xf32>
    %c54 = arith.constant 54 : index
    %661 = memref.load %arg2[%c54] : memref<100xf32, #tpu.memory_space<smem>>
    %662 = vector.broadcast %661 : f32 to vector<8x128xf32>
    %663 = arith.mulf %11, %662 : vector<8x128xf32>
    %c54_170 = arith.constant 54 : index
    %664 = memref.load %arg3[%c54_170] : memref<100xf32, #tpu.memory_space<smem>>
    %665 = vector.broadcast %664 : f32 to vector<8x128xf32>
    %666 = arith.addf %663, %665 : vector<8x128xf32>
    %cst_171 = arith.constant 0.000000e+00 : f32
    %667 = vector.broadcast %cst_171 : f32 to vector<8x128xf32>
    %668 = arith.maximumf %666, %667 : vector<8x128xf32>
    %c54_172 = arith.constant 54 : index
    %669 = memref.load %arg4[%c54_172] : memref<100xf32, #tpu.memory_space<smem>>
    %670 = vector.broadcast %669 : f32 to vector<8x128xf32>
    %671 = arith.mulf %668, %670 : vector<8x128xf32>
    %672 = arith.addf %660, %671 : vector<8x128xf32>
    %c55 = arith.constant 55 : index
    %673 = memref.load %arg2[%c55] : memref<100xf32, #tpu.memory_space<smem>>
    %674 = vector.broadcast %673 : f32 to vector<8x128xf32>
    %675 = arith.mulf %11, %674 : vector<8x128xf32>
    %c55_173 = arith.constant 55 : index
    %676 = memref.load %arg3[%c55_173] : memref<100xf32, #tpu.memory_space<smem>>
    %677 = vector.broadcast %676 : f32 to vector<8x128xf32>
    %678 = arith.addf %675, %677 : vector<8x128xf32>
    %cst_174 = arith.constant 0.000000e+00 : f32
    %679 = vector.broadcast %cst_174 : f32 to vector<8x128xf32>
    %680 = arith.maximumf %678, %679 : vector<8x128xf32>
    %c55_175 = arith.constant 55 : index
    %681 = memref.load %arg4[%c55_175] : memref<100xf32, #tpu.memory_space<smem>>
    %682 = vector.broadcast %681 : f32 to vector<8x128xf32>
    %683 = arith.mulf %680, %682 : vector<8x128xf32>
    %684 = arith.addf %672, %683 : vector<8x128xf32>
    %c56 = arith.constant 56 : index
    %685 = memref.load %arg2[%c56] : memref<100xf32, #tpu.memory_space<smem>>
    %686 = vector.broadcast %685 : f32 to vector<8x128xf32>
    %687 = arith.mulf %11, %686 : vector<8x128xf32>
    %c56_176 = arith.constant 56 : index
    %688 = memref.load %arg3[%c56_176] : memref<100xf32, #tpu.memory_space<smem>>
    %689 = vector.broadcast %688 : f32 to vector<8x128xf32>
    %690 = arith.addf %687, %689 : vector<8x128xf32>
    %cst_177 = arith.constant 0.000000e+00 : f32
    %691 = vector.broadcast %cst_177 : f32 to vector<8x128xf32>
    %692 = arith.maximumf %690, %691 : vector<8x128xf32>
    %c56_178 = arith.constant 56 : index
    %693 = memref.load %arg4[%c56_178] : memref<100xf32, #tpu.memory_space<smem>>
    %694 = vector.broadcast %693 : f32 to vector<8x128xf32>
    %695 = arith.mulf %692, %694 : vector<8x128xf32>
    %696 = arith.addf %684, %695 : vector<8x128xf32>
    %c57 = arith.constant 57 : index
    %697 = memref.load %arg2[%c57] : memref<100xf32, #tpu.memory_space<smem>>
    %698 = vector.broadcast %697 : f32 to vector<8x128xf32>
    %699 = arith.mulf %11, %698 : vector<8x128xf32>
    %c57_179 = arith.constant 57 : index
    %700 = memref.load %arg3[%c57_179] : memref<100xf32, #tpu.memory_space<smem>>
    %701 = vector.broadcast %700 : f32 to vector<8x128xf32>
    %702 = arith.addf %699, %701 : vector<8x128xf32>
    %cst_180 = arith.constant 0.000000e+00 : f32
    %703 = vector.broadcast %cst_180 : f32 to vector<8x128xf32>
    %704 = arith.maximumf %702, %703 : vector<8x128xf32>
    %c57_181 = arith.constant 57 : index
    %705 = memref.load %arg4[%c57_181] : memref<100xf32, #tpu.memory_space<smem>>
    %706 = vector.broadcast %705 : f32 to vector<8x128xf32>
    %707 = arith.mulf %704, %706 : vector<8x128xf32>
    %708 = arith.addf %696, %707 : vector<8x128xf32>
    %c58 = arith.constant 58 : index
    %709 = memref.load %arg2[%c58] : memref<100xf32, #tpu.memory_space<smem>>
    %710 = vector.broadcast %709 : f32 to vector<8x128xf32>
    %711 = arith.mulf %11, %710 : vector<8x128xf32>
    %c58_182 = arith.constant 58 : index
    %712 = memref.load %arg3[%c58_182] : memref<100xf32, #tpu.memory_space<smem>>
    %713 = vector.broadcast %712 : f32 to vector<8x128xf32>
    %714 = arith.addf %711, %713 : vector<8x128xf32>
    %cst_183 = arith.constant 0.000000e+00 : f32
    %715 = vector.broadcast %cst_183 : f32 to vector<8x128xf32>
    %716 = arith.maximumf %714, %715 : vector<8x128xf32>
    %c58_184 = arith.constant 58 : index
    %717 = memref.load %arg4[%c58_184] : memref<100xf32, #tpu.memory_space<smem>>
    %718 = vector.broadcast %717 : f32 to vector<8x128xf32>
    %719 = arith.mulf %716, %718 : vector<8x128xf32>
    %720 = arith.addf %708, %719 : vector<8x128xf32>
    %c59 = arith.constant 59 : index
    %721 = memref.load %arg2[%c59] : memref<100xf32, #tpu.memory_space<smem>>
    %722 = vector.broadcast %721 : f32 to vector<8x128xf32>
    %723 = arith.mulf %11, %722 : vector<8x128xf32>
    %c59_185 = arith.constant 59 : index
    %724 = memref.load %arg3[%c59_185] : memref<100xf32, #tpu.memory_space<smem>>
    %725 = vector.broadcast %724 : f32 to vector<8x128xf32>
    %726 = arith.addf %723, %725 : vector<8x128xf32>
    %cst_186 = arith.constant 0.000000e+00 : f32
    %727 = vector.broadcast %cst_186 : f32 to vector<8x128xf32>
    %728 = arith.maximumf %726, %727 : vector<8x128xf32>
    %c59_187 = arith.constant 59 : index
    %729 = memref.load %arg4[%c59_187] : memref<100xf32, #tpu.memory_space<smem>>
    %730 = vector.broadcast %729 : f32 to vector<8x128xf32>
    %731 = arith.mulf %728, %730 : vector<8x128xf32>
    %732 = arith.addf %720, %731 : vector<8x128xf32>
    %c60 = arith.constant 60 : index
    %733 = memref.load %arg2[%c60] : memref<100xf32, #tpu.memory_space<smem>>
    %734 = vector.broadcast %733 : f32 to vector<8x128xf32>
    %735 = arith.mulf %11, %734 : vector<8x128xf32>
    %c60_188 = arith.constant 60 : index
    %736 = memref.load %arg3[%c60_188] : memref<100xf32, #tpu.memory_space<smem>>
    %737 = vector.broadcast %736 : f32 to vector<8x128xf32>
    %738 = arith.addf %735, %737 : vector<8x128xf32>
    %cst_189 = arith.constant 0.000000e+00 : f32
    %739 = vector.broadcast %cst_189 : f32 to vector<8x128xf32>
    %740 = arith.maximumf %738, %739 : vector<8x128xf32>
    %c60_190 = arith.constant 60 : index
    %741 = memref.load %arg4[%c60_190] : memref<100xf32, #tpu.memory_space<smem>>
    %742 = vector.broadcast %741 : f32 to vector<8x128xf32>
    %743 = arith.mulf %740, %742 : vector<8x128xf32>
    %744 = arith.addf %732, %743 : vector<8x128xf32>
    %c61 = arith.constant 61 : index
    %745 = memref.load %arg2[%c61] : memref<100xf32, #tpu.memory_space<smem>>
    %746 = vector.broadcast %745 : f32 to vector<8x128xf32>
    %747 = arith.mulf %11, %746 : vector<8x128xf32>
    %c61_191 = arith.constant 61 : index
    %748 = memref.load %arg3[%c61_191] : memref<100xf32, #tpu.memory_space<smem>>
    %749 = vector.broadcast %748 : f32 to vector<8x128xf32>
    %750 = arith.addf %747, %749 : vector<8x128xf32>
    %cst_192 = arith.constant 0.000000e+00 : f32
    %751 = vector.broadcast %cst_192 : f32 to vector<8x128xf32>
    %752 = arith.maximumf %750, %751 : vector<8x128xf32>
    %c61_193 = arith.constant 61 : index
    %753 = memref.load %arg4[%c61_193] : memref<100xf32, #tpu.memory_space<smem>>
    %754 = vector.broadcast %753 : f32 to vector<8x128xf32>
    %755 = arith.mulf %752, %754 : vector<8x128xf32>
    %756 = arith.addf %744, %755 : vector<8x128xf32>
    %c62 = arith.constant 62 : index
    %757 = memref.load %arg2[%c62] : memref<100xf32, #tpu.memory_space<smem>>
    %758 = vector.broadcast %757 : f32 to vector<8x128xf32>
    %759 = arith.mulf %11, %758 : vector<8x128xf32>
    %c62_194 = arith.constant 62 : index
    %760 = memref.load %arg3[%c62_194] : memref<100xf32, #tpu.memory_space<smem>>
    %761 = vector.broadcast %760 : f32 to vector<8x128xf32>
    %762 = arith.addf %759, %761 : vector<8x128xf32>
    %cst_195 = arith.constant 0.000000e+00 : f32
    %763 = vector.broadcast %cst_195 : f32 to vector<8x128xf32>
    %764 = arith.maximumf %762, %763 : vector<8x128xf32>
    %c62_196 = arith.constant 62 : index
    %765 = memref.load %arg4[%c62_196] : memref<100xf32, #tpu.memory_space<smem>>
    %766 = vector.broadcast %765 : f32 to vector<8x128xf32>
    %767 = arith.mulf %764, %766 : vector<8x128xf32>
    %768 = arith.addf %756, %767 : vector<8x128xf32>
    %c63 = arith.constant 63 : index
    %769 = memref.load %arg2[%c63] : memref<100xf32, #tpu.memory_space<smem>>
    %770 = vector.broadcast %769 : f32 to vector<8x128xf32>
    %771 = arith.mulf %11, %770 : vector<8x128xf32>
    %c63_197 = arith.constant 63 : index
    %772 = memref.load %arg3[%c63_197] : memref<100xf32, #tpu.memory_space<smem>>
    %773 = vector.broadcast %772 : f32 to vector<8x128xf32>
    %774 = arith.addf %771, %773 : vector<8x128xf32>
    %cst_198 = arith.constant 0.000000e+00 : f32
    %775 = vector.broadcast %cst_198 : f32 to vector<8x128xf32>
    %776 = arith.maximumf %774, %775 : vector<8x128xf32>
    %c63_199 = arith.constant 63 : index
    %777 = memref.load %arg4[%c63_199] : memref<100xf32, #tpu.memory_space<smem>>
    %778 = vector.broadcast %777 : f32 to vector<8x128xf32>
    %779 = arith.mulf %776, %778 : vector<8x128xf32>
    %780 = arith.addf %768, %779 : vector<8x128xf32>
    %c64 = arith.constant 64 : index
    %781 = memref.load %arg2[%c64] : memref<100xf32, #tpu.memory_space<smem>>
    %782 = vector.broadcast %781 : f32 to vector<8x128xf32>
    %783 = arith.mulf %11, %782 : vector<8x128xf32>
    %c64_200 = arith.constant 64 : index
    %784 = memref.load %arg3[%c64_200] : memref<100xf32, #tpu.memory_space<smem>>
    %785 = vector.broadcast %784 : f32 to vector<8x128xf32>
    %786 = arith.addf %783, %785 : vector<8x128xf32>
    %cst_201 = arith.constant 0.000000e+00 : f32
    %787 = vector.broadcast %cst_201 : f32 to vector<8x128xf32>
    %788 = arith.maximumf %786, %787 : vector<8x128xf32>
    %c64_202 = arith.constant 64 : index
    %789 = memref.load %arg4[%c64_202] : memref<100xf32, #tpu.memory_space<smem>>
    %790 = vector.broadcast %789 : f32 to vector<8x128xf32>
    %791 = arith.mulf %788, %790 : vector<8x128xf32>
    %792 = arith.addf %780, %791 : vector<8x128xf32>
    %c65 = arith.constant 65 : index
    %793 = memref.load %arg2[%c65] : memref<100xf32, #tpu.memory_space<smem>>
    %794 = vector.broadcast %793 : f32 to vector<8x128xf32>
    %795 = arith.mulf %11, %794 : vector<8x128xf32>
    %c65_203 = arith.constant 65 : index
    %796 = memref.load %arg3[%c65_203] : memref<100xf32, #tpu.memory_space<smem>>
    %797 = vector.broadcast %796 : f32 to vector<8x128xf32>
    %798 = arith.addf %795, %797 : vector<8x128xf32>
    %cst_204 = arith.constant 0.000000e+00 : f32
    %799 = vector.broadcast %cst_204 : f32 to vector<8x128xf32>
    %800 = arith.maximumf %798, %799 : vector<8x128xf32>
    %c65_205 = arith.constant 65 : index
    %801 = memref.load %arg4[%c65_205] : memref<100xf32, #tpu.memory_space<smem>>
    %802 = vector.broadcast %801 : f32 to vector<8x128xf32>
    %803 = arith.mulf %800, %802 : vector<8x128xf32>
    %804 = arith.addf %792, %803 : vector<8x128xf32>
    %c66 = arith.constant 66 : index
    %805 = memref.load %arg2[%c66] : memref<100xf32, #tpu.memory_space<smem>>
    %806 = vector.broadcast %805 : f32 to vector<8x128xf32>
    %807 = arith.mulf %11, %806 : vector<8x128xf32>
    %c66_206 = arith.constant 66 : index
    %808 = memref.load %arg3[%c66_206] : memref<100xf32, #tpu.memory_space<smem>>
    %809 = vector.broadcast %808 : f32 to vector<8x128xf32>
    %810 = arith.addf %807, %809 : vector<8x128xf32>
    %cst_207 = arith.constant 0.000000e+00 : f32
    %811 = vector.broadcast %cst_207 : f32 to vector<8x128xf32>
    %812 = arith.maximumf %810, %811 : vector<8x128xf32>
    %c66_208 = arith.constant 66 : index
    %813 = memref.load %arg4[%c66_208] : memref<100xf32, #tpu.memory_space<smem>>
    %814 = vector.broadcast %813 : f32 to vector<8x128xf32>
    %815 = arith.mulf %812, %814 : vector<8x128xf32>
    %816 = arith.addf %804, %815 : vector<8x128xf32>
    %c67 = arith.constant 67 : index
    %817 = memref.load %arg2[%c67] : memref<100xf32, #tpu.memory_space<smem>>
    %818 = vector.broadcast %817 : f32 to vector<8x128xf32>
    %819 = arith.mulf %11, %818 : vector<8x128xf32>
    %c67_209 = arith.constant 67 : index
    %820 = memref.load %arg3[%c67_209] : memref<100xf32, #tpu.memory_space<smem>>
    %821 = vector.broadcast %820 : f32 to vector<8x128xf32>
    %822 = arith.addf %819, %821 : vector<8x128xf32>
    %cst_210 = arith.constant 0.000000e+00 : f32
    %823 = vector.broadcast %cst_210 : f32 to vector<8x128xf32>
    %824 = arith.maximumf %822, %823 : vector<8x128xf32>
    %c67_211 = arith.constant 67 : index
    %825 = memref.load %arg4[%c67_211] : memref<100xf32, #tpu.memory_space<smem>>
    %826 = vector.broadcast %825 : f32 to vector<8x128xf32>
    %827 = arith.mulf %824, %826 : vector<8x128xf32>
    %828 = arith.addf %816, %827 : vector<8x128xf32>
    %c68 = arith.constant 68 : index
    %829 = memref.load %arg2[%c68] : memref<100xf32, #tpu.memory_space<smem>>
    %830 = vector.broadcast %829 : f32 to vector<8x128xf32>
    %831 = arith.mulf %11, %830 : vector<8x128xf32>
    %c68_212 = arith.constant 68 : index
    %832 = memref.load %arg3[%c68_212] : memref<100xf32, #tpu.memory_space<smem>>
    %833 = vector.broadcast %832 : f32 to vector<8x128xf32>
    %834 = arith.addf %831, %833 : vector<8x128xf32>
    %cst_213 = arith.constant 0.000000e+00 : f32
    %835 = vector.broadcast %cst_213 : f32 to vector<8x128xf32>
    %836 = arith.maximumf %834, %835 : vector<8x128xf32>
    %c68_214 = arith.constant 68 : index
    %837 = memref.load %arg4[%c68_214] : memref<100xf32, #tpu.memory_space<smem>>
    %838 = vector.broadcast %837 : f32 to vector<8x128xf32>
    %839 = arith.mulf %836, %838 : vector<8x128xf32>
    %840 = arith.addf %828, %839 : vector<8x128xf32>
    %c69 = arith.constant 69 : index
    %841 = memref.load %arg2[%c69] : memref<100xf32, #tpu.memory_space<smem>>
    %842 = vector.broadcast %841 : f32 to vector<8x128xf32>
    %843 = arith.mulf %11, %842 : vector<8x128xf32>
    %c69_215 = arith.constant 69 : index
    %844 = memref.load %arg3[%c69_215] : memref<100xf32, #tpu.memory_space<smem>>
    %845 = vector.broadcast %844 : f32 to vector<8x128xf32>
    %846 = arith.addf %843, %845 : vector<8x128xf32>
    %cst_216 = arith.constant 0.000000e+00 : f32
    %847 = vector.broadcast %cst_216 : f32 to vector<8x128xf32>
    %848 = arith.maximumf %846, %847 : vector<8x128xf32>
    %c69_217 = arith.constant 69 : index
    %849 = memref.load %arg4[%c69_217] : memref<100xf32, #tpu.memory_space<smem>>
    %850 = vector.broadcast %849 : f32 to vector<8x128xf32>
    %851 = arith.mulf %848, %850 : vector<8x128xf32>
    %852 = arith.addf %840, %851 : vector<8x128xf32>
    %c70 = arith.constant 70 : index
    %853 = memref.load %arg2[%c70] : memref<100xf32, #tpu.memory_space<smem>>
    %854 = vector.broadcast %853 : f32 to vector<8x128xf32>
    %855 = arith.mulf %11, %854 : vector<8x128xf32>
    %c70_218 = arith.constant 70 : index
    %856 = memref.load %arg3[%c70_218] : memref<100xf32, #tpu.memory_space<smem>>
    %857 = vector.broadcast %856 : f32 to vector<8x128xf32>
    %858 = arith.addf %855, %857 : vector<8x128xf32>
    %cst_219 = arith.constant 0.000000e+00 : f32
    %859 = vector.broadcast %cst_219 : f32 to vector<8x128xf32>
    %860 = arith.maximumf %858, %859 : vector<8x128xf32>
    %c70_220 = arith.constant 70 : index
    %861 = memref.load %arg4[%c70_220] : memref<100xf32, #tpu.memory_space<smem>>
    %862 = vector.broadcast %861 : f32 to vector<8x128xf32>
    %863 = arith.mulf %860, %862 : vector<8x128xf32>
    %864 = arith.addf %852, %863 : vector<8x128xf32>
    %c71 = arith.constant 71 : index
    %865 = memref.load %arg2[%c71] : memref<100xf32, #tpu.memory_space<smem>>
    %866 = vector.broadcast %865 : f32 to vector<8x128xf32>
    %867 = arith.mulf %11, %866 : vector<8x128xf32>
    %c71_221 = arith.constant 71 : index
    %868 = memref.load %arg3[%c71_221] : memref<100xf32, #tpu.memory_space<smem>>
    %869 = vector.broadcast %868 : f32 to vector<8x128xf32>
    %870 = arith.addf %867, %869 : vector<8x128xf32>
    %cst_222 = arith.constant 0.000000e+00 : f32
    %871 = vector.broadcast %cst_222 : f32 to vector<8x128xf32>
    %872 = arith.maximumf %870, %871 : vector<8x128xf32>
    %c71_223 = arith.constant 71 : index
    %873 = memref.load %arg4[%c71_223] : memref<100xf32, #tpu.memory_space<smem>>
    %874 = vector.broadcast %873 : f32 to vector<8x128xf32>
    %875 = arith.mulf %872, %874 : vector<8x128xf32>
    %876 = arith.addf %864, %875 : vector<8x128xf32>
    %c72 = arith.constant 72 : index
    %877 = memref.load %arg2[%c72] : memref<100xf32, #tpu.memory_space<smem>>
    %878 = vector.broadcast %877 : f32 to vector<8x128xf32>
    %879 = arith.mulf %11, %878 : vector<8x128xf32>
    %c72_224 = arith.constant 72 : index
    %880 = memref.load %arg3[%c72_224] : memref<100xf32, #tpu.memory_space<smem>>
    %881 = vector.broadcast %880 : f32 to vector<8x128xf32>
    %882 = arith.addf %879, %881 : vector<8x128xf32>
    %cst_225 = arith.constant 0.000000e+00 : f32
    %883 = vector.broadcast %cst_225 : f32 to vector<8x128xf32>
    %884 = arith.maximumf %882, %883 : vector<8x128xf32>
    %c72_226 = arith.constant 72 : index
    %885 = memref.load %arg4[%c72_226] : memref<100xf32, #tpu.memory_space<smem>>
    %886 = vector.broadcast %885 : f32 to vector<8x128xf32>
    %887 = arith.mulf %884, %886 : vector<8x128xf32>
    %888 = arith.addf %876, %887 : vector<8x128xf32>
    %c73 = arith.constant 73 : index
    %889 = memref.load %arg2[%c73] : memref<100xf32, #tpu.memory_space<smem>>
    %890 = vector.broadcast %889 : f32 to vector<8x128xf32>
    %891 = arith.mulf %11, %890 : vector<8x128xf32>
    %c73_227 = arith.constant 73 : index
    %892 = memref.load %arg3[%c73_227] : memref<100xf32, #tpu.memory_space<smem>>
    %893 = vector.broadcast %892 : f32 to vector<8x128xf32>
    %894 = arith.addf %891, %893 : vector<8x128xf32>
    %cst_228 = arith.constant 0.000000e+00 : f32
    %895 = vector.broadcast %cst_228 : f32 to vector<8x128xf32>
    %896 = arith.maximumf %894, %895 : vector<8x128xf32>
    %c73_229 = arith.constant 73 : index
    %897 = memref.load %arg4[%c73_229] : memref<100xf32, #tpu.memory_space<smem>>
    %898 = vector.broadcast %897 : f32 to vector<8x128xf32>
    %899 = arith.mulf %896, %898 : vector<8x128xf32>
    %900 = arith.addf %888, %899 : vector<8x128xf32>
    %c74 = arith.constant 74 : index
    %901 = memref.load %arg2[%c74] : memref<100xf32, #tpu.memory_space<smem>>
    %902 = vector.broadcast %901 : f32 to vector<8x128xf32>
    %903 = arith.mulf %11, %902 : vector<8x128xf32>
    %c74_230 = arith.constant 74 : index
    %904 = memref.load %arg3[%c74_230] : memref<100xf32, #tpu.memory_space<smem>>
    %905 = vector.broadcast %904 : f32 to vector<8x128xf32>
    %906 = arith.addf %903, %905 : vector<8x128xf32>
    %cst_231 = arith.constant 0.000000e+00 : f32
    %907 = vector.broadcast %cst_231 : f32 to vector<8x128xf32>
    %908 = arith.maximumf %906, %907 : vector<8x128xf32>
    %c74_232 = arith.constant 74 : index
    %909 = memref.load %arg4[%c74_232] : memref<100xf32, #tpu.memory_space<smem>>
    %910 = vector.broadcast %909 : f32 to vector<8x128xf32>
    %911 = arith.mulf %908, %910 : vector<8x128xf32>
    %912 = arith.addf %900, %911 : vector<8x128xf32>
    %c75 = arith.constant 75 : index
    %913 = memref.load %arg2[%c75] : memref<100xf32, #tpu.memory_space<smem>>
    %914 = vector.broadcast %913 : f32 to vector<8x128xf32>
    %915 = arith.mulf %11, %914 : vector<8x128xf32>
    %c75_233 = arith.constant 75 : index
    %916 = memref.load %arg3[%c75_233] : memref<100xf32, #tpu.memory_space<smem>>
    %917 = vector.broadcast %916 : f32 to vector<8x128xf32>
    %918 = arith.addf %915, %917 : vector<8x128xf32>
    %cst_234 = arith.constant 0.000000e+00 : f32
    %919 = vector.broadcast %cst_234 : f32 to vector<8x128xf32>
    %920 = arith.maximumf %918, %919 : vector<8x128xf32>
    %c75_235 = arith.constant 75 : index
    %921 = memref.load %arg4[%c75_235] : memref<100xf32, #tpu.memory_space<smem>>
    %922 = vector.broadcast %921 : f32 to vector<8x128xf32>
    %923 = arith.mulf %920, %922 : vector<8x128xf32>
    %924 = arith.addf %912, %923 : vector<8x128xf32>
    %c76 = arith.constant 76 : index
    %925 = memref.load %arg2[%c76] : memref<100xf32, #tpu.memory_space<smem>>
    %926 = vector.broadcast %925 : f32 to vector<8x128xf32>
    %927 = arith.mulf %11, %926 : vector<8x128xf32>
    %c76_236 = arith.constant 76 : index
    %928 = memref.load %arg3[%c76_236] : memref<100xf32, #tpu.memory_space<smem>>
    %929 = vector.broadcast %928 : f32 to vector<8x128xf32>
    %930 = arith.addf %927, %929 : vector<8x128xf32>
    %cst_237 = arith.constant 0.000000e+00 : f32
    %931 = vector.broadcast %cst_237 : f32 to vector<8x128xf32>
    %932 = arith.maximumf %930, %931 : vector<8x128xf32>
    %c76_238 = arith.constant 76 : index
    %933 = memref.load %arg4[%c76_238] : memref<100xf32, #tpu.memory_space<smem>>
    %934 = vector.broadcast %933 : f32 to vector<8x128xf32>
    %935 = arith.mulf %932, %934 : vector<8x128xf32>
    %936 = arith.addf %924, %935 : vector<8x128xf32>
    %c77 = arith.constant 77 : index
    %937 = memref.load %arg2[%c77] : memref<100xf32, #tpu.memory_space<smem>>
    %938 = vector.broadcast %937 : f32 to vector<8x128xf32>
    %939 = arith.mulf %11, %938 : vector<8x128xf32>
    %c77_239 = arith.constant 77 : index
    %940 = memref.load %arg3[%c77_239] : memref<100xf32, #tpu.memory_space<smem>>
    %941 = vector.broadcast %940 : f32 to vector<8x128xf32>
    %942 = arith.addf %939, %941 : vector<8x128xf32>
    %cst_240 = arith.constant 0.000000e+00 : f32
    %943 = vector.broadcast %cst_240 : f32 to vector<8x128xf32>
    %944 = arith.maximumf %942, %943 : vector<8x128xf32>
    %c77_241 = arith.constant 77 : index
    %945 = memref.load %arg4[%c77_241] : memref<100xf32, #tpu.memory_space<smem>>
    %946 = vector.broadcast %945 : f32 to vector<8x128xf32>
    %947 = arith.mulf %944, %946 : vector<8x128xf32>
    %948 = arith.addf %936, %947 : vector<8x128xf32>
    %c78 = arith.constant 78 : index
    %949 = memref.load %arg2[%c78] : memref<100xf32, #tpu.memory_space<smem>>
    %950 = vector.broadcast %949 : f32 to vector<8x128xf32>
    %951 = arith.mulf %11, %950 : vector<8x128xf32>
    %c78_242 = arith.constant 78 : index
    %952 = memref.load %arg3[%c78_242] : memref<100xf32, #tpu.memory_space<smem>>
    %953 = vector.broadcast %952 : f32 to vector<8x128xf32>
    %954 = arith.addf %951, %953 : vector<8x128xf32>
    %cst_243 = arith.constant 0.000000e+00 : f32
    %955 = vector.broadcast %cst_243 : f32 to vector<8x128xf32>
    %956 = arith.maximumf %954, %955 : vector<8x128xf32>
    %c78_244 = arith.constant 78 : index
    %957 = memref.load %arg4[%c78_244] : memref<100xf32, #tpu.memory_space<smem>>
    %958 = vector.broadcast %957 : f32 to vector<8x128xf32>
    %959 = arith.mulf %956, %958 : vector<8x128xf32>
    %960 = arith.addf %948, %959 : vector<8x128xf32>
    %c79 = arith.constant 79 : index
    %961 = memref.load %arg2[%c79] : memref<100xf32, #tpu.memory_space<smem>>
    %962 = vector.broadcast %961 : f32 to vector<8x128xf32>
    %963 = arith.mulf %11, %962 : vector<8x128xf32>
    %c79_245 = arith.constant 79 : index
    %964 = memref.load %arg3[%c79_245] : memref<100xf32, #tpu.memory_space<smem>>
    %965 = vector.broadcast %964 : f32 to vector<8x128xf32>
    %966 = arith.addf %963, %965 : vector<8x128xf32>
    %cst_246 = arith.constant 0.000000e+00 : f32
    %967 = vector.broadcast %cst_246 : f32 to vector<8x128xf32>
    %968 = arith.maximumf %966, %967 : vector<8x128xf32>
    %c79_247 = arith.constant 79 : index
    %969 = memref.load %arg4[%c79_247] : memref<100xf32, #tpu.memory_space<smem>>
    %970 = vector.broadcast %969 : f32 to vector<8x128xf32>
    %971 = arith.mulf %968, %970 : vector<8x128xf32>
    %972 = arith.addf %960, %971 : vector<8x128xf32>
    %c80 = arith.constant 80 : index
    %973 = memref.load %arg2[%c80] : memref<100xf32, #tpu.memory_space<smem>>
    %974 = vector.broadcast %973 : f32 to vector<8x128xf32>
    %975 = arith.mulf %11, %974 : vector<8x128xf32>
    %c80_248 = arith.constant 80 : index
    %976 = memref.load %arg3[%c80_248] : memref<100xf32, #tpu.memory_space<smem>>
    %977 = vector.broadcast %976 : f32 to vector<8x128xf32>
    %978 = arith.addf %975, %977 : vector<8x128xf32>
    %cst_249 = arith.constant 0.000000e+00 : f32
    %979 = vector.broadcast %cst_249 : f32 to vector<8x128xf32>
    %980 = arith.maximumf %978, %979 : vector<8x128xf32>
    %c80_250 = arith.constant 80 : index
    %981 = memref.load %arg4[%c80_250] : memref<100xf32, #tpu.memory_space<smem>>
    %982 = vector.broadcast %981 : f32 to vector<8x128xf32>
    %983 = arith.mulf %980, %982 : vector<8x128xf32>
    %984 = arith.addf %972, %983 : vector<8x128xf32>
    %c81 = arith.constant 81 : index
    %985 = memref.load %arg2[%c81] : memref<100xf32, #tpu.memory_space<smem>>
    %986 = vector.broadcast %985 : f32 to vector<8x128xf32>
    %987 = arith.mulf %11, %986 : vector<8x128xf32>
    %c81_251 = arith.constant 81 : index
    %988 = memref.load %arg3[%c81_251] : memref<100xf32, #tpu.memory_space<smem>>
    %989 = vector.broadcast %988 : f32 to vector<8x128xf32>
    %990 = arith.addf %987, %989 : vector<8x128xf32>
    %cst_252 = arith.constant 0.000000e+00 : f32
    %991 = vector.broadcast %cst_252 : f32 to vector<8x128xf32>
    %992 = arith.maximumf %990, %991 : vector<8x128xf32>
    %c81_253 = arith.constant 81 : index
    %993 = memref.load %arg4[%c81_253] : memref<100xf32, #tpu.memory_space<smem>>
    %994 = vector.broadcast %993 : f32 to vector<8x128xf32>
    %995 = arith.mulf %992, %994 : vector<8x128xf32>
    %996 = arith.addf %984, %995 : vector<8x128xf32>
    %c82 = arith.constant 82 : index
    %997 = memref.load %arg2[%c82] : memref<100xf32, #tpu.memory_space<smem>>
    %998 = vector.broadcast %997 : f32 to vector<8x128xf32>
    %999 = arith.mulf %11, %998 : vector<8x128xf32>
    %c82_254 = arith.constant 82 : index
    %1000 = memref.load %arg3[%c82_254] : memref<100xf32, #tpu.memory_space<smem>>
    %1001 = vector.broadcast %1000 : f32 to vector<8x128xf32>
    %1002 = arith.addf %999, %1001 : vector<8x128xf32>
    %cst_255 = arith.constant 0.000000e+00 : f32
    %1003 = vector.broadcast %cst_255 : f32 to vector<8x128xf32>
    %1004 = arith.maximumf %1002, %1003 : vector<8x128xf32>
    %c82_256 = arith.constant 82 : index
    %1005 = memref.load %arg4[%c82_256] : memref<100xf32, #tpu.memory_space<smem>>
    %1006 = vector.broadcast %1005 : f32 to vector<8x128xf32>
    %1007 = arith.mulf %1004, %1006 : vector<8x128xf32>
    %1008 = arith.addf %996, %1007 : vector<8x128xf32>
    %c83 = arith.constant 83 : index
    %1009 = memref.load %arg2[%c83] : memref<100xf32, #tpu.memory_space<smem>>
    %1010 = vector.broadcast %1009 : f32 to vector<8x128xf32>
    %1011 = arith.mulf %11, %1010 : vector<8x128xf32>
    %c83_257 = arith.constant 83 : index
    %1012 = memref.load %arg3[%c83_257] : memref<100xf32, #tpu.memory_space<smem>>
    %1013 = vector.broadcast %1012 : f32 to vector<8x128xf32>
    %1014 = arith.addf %1011, %1013 : vector<8x128xf32>
    %cst_258 = arith.constant 0.000000e+00 : f32
    %1015 = vector.broadcast %cst_258 : f32 to vector<8x128xf32>
    %1016 = arith.maximumf %1014, %1015 : vector<8x128xf32>
    %c83_259 = arith.constant 83 : index
    %1017 = memref.load %arg4[%c83_259] : memref<100xf32, #tpu.memory_space<smem>>
    %1018 = vector.broadcast %1017 : f32 to vector<8x128xf32>
    %1019 = arith.mulf %1016, %1018 : vector<8x128xf32>
    %1020 = arith.addf %1008, %1019 : vector<8x128xf32>
    %c84 = arith.constant 84 : index
    %1021 = memref.load %arg2[%c84] : memref<100xf32, #tpu.memory_space<smem>>
    %1022 = vector.broadcast %1021 : f32 to vector<8x128xf32>
    %1023 = arith.mulf %11, %1022 : vector<8x128xf32>
    %c84_260 = arith.constant 84 : index
    %1024 = memref.load %arg3[%c84_260] : memref<100xf32, #tpu.memory_space<smem>>
    %1025 = vector.broadcast %1024 : f32 to vector<8x128xf32>
    %1026 = arith.addf %1023, %1025 : vector<8x128xf32>
    %cst_261 = arith.constant 0.000000e+00 : f32
    %1027 = vector.broadcast %cst_261 : f32 to vector<8x128xf32>
    %1028 = arith.maximumf %1026, %1027 : vector<8x128xf32>
    %c84_262 = arith.constant 84 : index
    %1029 = memref.load %arg4[%c84_262] : memref<100xf32, #tpu.memory_space<smem>>
    %1030 = vector.broadcast %1029 : f32 to vector<8x128xf32>
    %1031 = arith.mulf %1028, %1030 : vector<8x128xf32>
    %1032 = arith.addf %1020, %1031 : vector<8x128xf32>
    %c85 = arith.constant 85 : index
    %1033 = memref.load %arg2[%c85] : memref<100xf32, #tpu.memory_space<smem>>
    %1034 = vector.broadcast %1033 : f32 to vector<8x128xf32>
    %1035 = arith.mulf %11, %1034 : vector<8x128xf32>
    %c85_263 = arith.constant 85 : index
    %1036 = memref.load %arg3[%c85_263] : memref<100xf32, #tpu.memory_space<smem>>
    %1037 = vector.broadcast %1036 : f32 to vector<8x128xf32>
    %1038 = arith.addf %1035, %1037 : vector<8x128xf32>
    %cst_264 = arith.constant 0.000000e+00 : f32
    %1039 = vector.broadcast %cst_264 : f32 to vector<8x128xf32>
    %1040 = arith.maximumf %1038, %1039 : vector<8x128xf32>
    %c85_265 = arith.constant 85 : index
    %1041 = memref.load %arg4[%c85_265] : memref<100xf32, #tpu.memory_space<smem>>
    %1042 = vector.broadcast %1041 : f32 to vector<8x128xf32>
    %1043 = arith.mulf %1040, %1042 : vector<8x128xf32>
    %1044 = arith.addf %1032, %1043 : vector<8x128xf32>
    %c86 = arith.constant 86 : index
    %1045 = memref.load %arg2[%c86] : memref<100xf32, #tpu.memory_space<smem>>
    %1046 = vector.broadcast %1045 : f32 to vector<8x128xf32>
    %1047 = arith.mulf %11, %1046 : vector<8x128xf32>
    %c86_266 = arith.constant 86 : index
    %1048 = memref.load %arg3[%c86_266] : memref<100xf32, #tpu.memory_space<smem>>
    %1049 = vector.broadcast %1048 : f32 to vector<8x128xf32>
    %1050 = arith.addf %1047, %1049 : vector<8x128xf32>
    %cst_267 = arith.constant 0.000000e+00 : f32
    %1051 = vector.broadcast %cst_267 : f32 to vector<8x128xf32>
    %1052 = arith.maximumf %1050, %1051 : vector<8x128xf32>
    %c86_268 = arith.constant 86 : index
    %1053 = memref.load %arg4[%c86_268] : memref<100xf32, #tpu.memory_space<smem>>
    %1054 = vector.broadcast %1053 : f32 to vector<8x128xf32>
    %1055 = arith.mulf %1052, %1054 : vector<8x128xf32>
    %1056 = arith.addf %1044, %1055 : vector<8x128xf32>
    %c87 = arith.constant 87 : index
    %1057 = memref.load %arg2[%c87] : memref<100xf32, #tpu.memory_space<smem>>
    %1058 = vector.broadcast %1057 : f32 to vector<8x128xf32>
    %1059 = arith.mulf %11, %1058 : vector<8x128xf32>
    %c87_269 = arith.constant 87 : index
    %1060 = memref.load %arg3[%c87_269] : memref<100xf32, #tpu.memory_space<smem>>
    %1061 = vector.broadcast %1060 : f32 to vector<8x128xf32>
    %1062 = arith.addf %1059, %1061 : vector<8x128xf32>
    %cst_270 = arith.constant 0.000000e+00 : f32
    %1063 = vector.broadcast %cst_270 : f32 to vector<8x128xf32>
    %1064 = arith.maximumf %1062, %1063 : vector<8x128xf32>
    %c87_271 = arith.constant 87 : index
    %1065 = memref.load %arg4[%c87_271] : memref<100xf32, #tpu.memory_space<smem>>
    %1066 = vector.broadcast %1065 : f32 to vector<8x128xf32>
    %1067 = arith.mulf %1064, %1066 : vector<8x128xf32>
    %1068 = arith.addf %1056, %1067 : vector<8x128xf32>
    %c88 = arith.constant 88 : index
    %1069 = memref.load %arg2[%c88] : memref<100xf32, #tpu.memory_space<smem>>
    %1070 = vector.broadcast %1069 : f32 to vector<8x128xf32>
    %1071 = arith.mulf %11, %1070 : vector<8x128xf32>
    %c88_272 = arith.constant 88 : index
    %1072 = memref.load %arg3[%c88_272] : memref<100xf32, #tpu.memory_space<smem>>
    %1073 = vector.broadcast %1072 : f32 to vector<8x128xf32>
    %1074 = arith.addf %1071, %1073 : vector<8x128xf32>
    %cst_273 = arith.constant 0.000000e+00 : f32
    %1075 = vector.broadcast %cst_273 : f32 to vector<8x128xf32>
    %1076 = arith.maximumf %1074, %1075 : vector<8x128xf32>
    %c88_274 = arith.constant 88 : index
    %1077 = memref.load %arg4[%c88_274] : memref<100xf32, #tpu.memory_space<smem>>
    %1078 = vector.broadcast %1077 : f32 to vector<8x128xf32>
    %1079 = arith.mulf %1076, %1078 : vector<8x128xf32>
    %1080 = arith.addf %1068, %1079 : vector<8x128xf32>
    %c89 = arith.constant 89 : index
    %1081 = memref.load %arg2[%c89] : memref<100xf32, #tpu.memory_space<smem>>
    %1082 = vector.broadcast %1081 : f32 to vector<8x128xf32>
    %1083 = arith.mulf %11, %1082 : vector<8x128xf32>
    %c89_275 = arith.constant 89 : index
    %1084 = memref.load %arg3[%c89_275] : memref<100xf32, #tpu.memory_space<smem>>
    %1085 = vector.broadcast %1084 : f32 to vector<8x128xf32>
    %1086 = arith.addf %1083, %1085 : vector<8x128xf32>
    %cst_276 = arith.constant 0.000000e+00 : f32
    %1087 = vector.broadcast %cst_276 : f32 to vector<8x128xf32>
    %1088 = arith.maximumf %1086, %1087 : vector<8x128xf32>
    %c89_277 = arith.constant 89 : index
    %1089 = memref.load %arg4[%c89_277] : memref<100xf32, #tpu.memory_space<smem>>
    %1090 = vector.broadcast %1089 : f32 to vector<8x128xf32>
    %1091 = arith.mulf %1088, %1090 : vector<8x128xf32>
    %1092 = arith.addf %1080, %1091 : vector<8x128xf32>
    %c90 = arith.constant 90 : index
    %1093 = memref.load %arg2[%c90] : memref<100xf32, #tpu.memory_space<smem>>
    %1094 = vector.broadcast %1093 : f32 to vector<8x128xf32>
    %1095 = arith.mulf %11, %1094 : vector<8x128xf32>
    %c90_278 = arith.constant 90 : index
    %1096 = memref.load %arg3[%c90_278] : memref<100xf32, #tpu.memory_space<smem>>
    %1097 = vector.broadcast %1096 : f32 to vector<8x128xf32>
    %1098 = arith.addf %1095, %1097 : vector<8x128xf32>
    %cst_279 = arith.constant 0.000000e+00 : f32
    %1099 = vector.broadcast %cst_279 : f32 to vector<8x128xf32>
    %1100 = arith.maximumf %1098, %1099 : vector<8x128xf32>
    %c90_280 = arith.constant 90 : index
    %1101 = memref.load %arg4[%c90_280] : memref<100xf32, #tpu.memory_space<smem>>
    %1102 = vector.broadcast %1101 : f32 to vector<8x128xf32>
    %1103 = arith.mulf %1100, %1102 : vector<8x128xf32>
    %1104 = arith.addf %1092, %1103 : vector<8x128xf32>
    %c91 = arith.constant 91 : index
    %1105 = memref.load %arg2[%c91] : memref<100xf32, #tpu.memory_space<smem>>
    %1106 = vector.broadcast %1105 : f32 to vector<8x128xf32>
    %1107 = arith.mulf %11, %1106 : vector<8x128xf32>
    %c91_281 = arith.constant 91 : index
    %1108 = memref.load %arg3[%c91_281] : memref<100xf32, #tpu.memory_space<smem>>
    %1109 = vector.broadcast %1108 : f32 to vector<8x128xf32>
    %1110 = arith.addf %1107, %1109 : vector<8x128xf32>
    %cst_282 = arith.constant 0.000000e+00 : f32
    %1111 = vector.broadcast %cst_282 : f32 to vector<8x128xf32>
    %1112 = arith.maximumf %1110, %1111 : vector<8x128xf32>
    %c91_283 = arith.constant 91 : index
    %1113 = memref.load %arg4[%c91_283] : memref<100xf32, #tpu.memory_space<smem>>
    %1114 = vector.broadcast %1113 : f32 to vector<8x128xf32>
    %1115 = arith.mulf %1112, %1114 : vector<8x128xf32>
    %1116 = arith.addf %1104, %1115 : vector<8x128xf32>
    %c92 = arith.constant 92 : index
    %1117 = memref.load %arg2[%c92] : memref<100xf32, #tpu.memory_space<smem>>
    %1118 = vector.broadcast %1117 : f32 to vector<8x128xf32>
    %1119 = arith.mulf %11, %1118 : vector<8x128xf32>
    %c92_284 = arith.constant 92 : index
    %1120 = memref.load %arg3[%c92_284] : memref<100xf32, #tpu.memory_space<smem>>
    %1121 = vector.broadcast %1120 : f32 to vector<8x128xf32>
    %1122 = arith.addf %1119, %1121 : vector<8x128xf32>
    %cst_285 = arith.constant 0.000000e+00 : f32
    %1123 = vector.broadcast %cst_285 : f32 to vector<8x128xf32>
    %1124 = arith.maximumf %1122, %1123 : vector<8x128xf32>
    %c92_286 = arith.constant 92 : index
    %1125 = memref.load %arg4[%c92_286] : memref<100xf32, #tpu.memory_space<smem>>
    %1126 = vector.broadcast %1125 : f32 to vector<8x128xf32>
    %1127 = arith.mulf %1124, %1126 : vector<8x128xf32>
    %1128 = arith.addf %1116, %1127 : vector<8x128xf32>
    %c93 = arith.constant 93 : index
    %1129 = memref.load %arg2[%c93] : memref<100xf32, #tpu.memory_space<smem>>
    %1130 = vector.broadcast %1129 : f32 to vector<8x128xf32>
    %1131 = arith.mulf %11, %1130 : vector<8x128xf32>
    %c93_287 = arith.constant 93 : index
    %1132 = memref.load %arg3[%c93_287] : memref<100xf32, #tpu.memory_space<smem>>
    %1133 = vector.broadcast %1132 : f32 to vector<8x128xf32>
    %1134 = arith.addf %1131, %1133 : vector<8x128xf32>
    %cst_288 = arith.constant 0.000000e+00 : f32
    %1135 = vector.broadcast %cst_288 : f32 to vector<8x128xf32>
    %1136 = arith.maximumf %1134, %1135 : vector<8x128xf32>
    %c93_289 = arith.constant 93 : index
    %1137 = memref.load %arg4[%c93_289] : memref<100xf32, #tpu.memory_space<smem>>
    %1138 = vector.broadcast %1137 : f32 to vector<8x128xf32>
    %1139 = arith.mulf %1136, %1138 : vector<8x128xf32>
    %1140 = arith.addf %1128, %1139 : vector<8x128xf32>
    %c94 = arith.constant 94 : index
    %1141 = memref.load %arg2[%c94] : memref<100xf32, #tpu.memory_space<smem>>
    %1142 = vector.broadcast %1141 : f32 to vector<8x128xf32>
    %1143 = arith.mulf %11, %1142 : vector<8x128xf32>
    %c94_290 = arith.constant 94 : index
    %1144 = memref.load %arg3[%c94_290] : memref<100xf32, #tpu.memory_space<smem>>
    %1145 = vector.broadcast %1144 : f32 to vector<8x128xf32>
    %1146 = arith.addf %1143, %1145 : vector<8x128xf32>
    %cst_291 = arith.constant 0.000000e+00 : f32
    %1147 = vector.broadcast %cst_291 : f32 to vector<8x128xf32>
    %1148 = arith.maximumf %1146, %1147 : vector<8x128xf32>
    %c94_292 = arith.constant 94 : index
    %1149 = memref.load %arg4[%c94_292] : memref<100xf32, #tpu.memory_space<smem>>
    %1150 = vector.broadcast %1149 : f32 to vector<8x128xf32>
    %1151 = arith.mulf %1148, %1150 : vector<8x128xf32>
    %1152 = arith.addf %1140, %1151 : vector<8x128xf32>
    %c95 = arith.constant 95 : index
    %1153 = memref.load %arg2[%c95] : memref<100xf32, #tpu.memory_space<smem>>
    %1154 = vector.broadcast %1153 : f32 to vector<8x128xf32>
    %1155 = arith.mulf %11, %1154 : vector<8x128xf32>
    %c95_293 = arith.constant 95 : index
    %1156 = memref.load %arg3[%c95_293] : memref<100xf32, #tpu.memory_space<smem>>
    %1157 = vector.broadcast %1156 : f32 to vector<8x128xf32>
    %1158 = arith.addf %1155, %1157 : vector<8x128xf32>
    %cst_294 = arith.constant 0.000000e+00 : f32
    %1159 = vector.broadcast %cst_294 : f32 to vector<8x128xf32>
    %1160 = arith.maximumf %1158, %1159 : vector<8x128xf32>
    %c95_295 = arith.constant 95 : index
    %1161 = memref.load %arg4[%c95_295] : memref<100xf32, #tpu.memory_space<smem>>
    %1162 = vector.broadcast %1161 : f32 to vector<8x128xf32>
    %1163 = arith.mulf %1160, %1162 : vector<8x128xf32>
    %1164 = arith.addf %1152, %1163 : vector<8x128xf32>
    %c96 = arith.constant 96 : index
    %1165 = memref.load %arg2[%c96] : memref<100xf32, #tpu.memory_space<smem>>
    %1166 = vector.broadcast %1165 : f32 to vector<8x128xf32>
    %1167 = arith.mulf %11, %1166 : vector<8x128xf32>
    %c96_296 = arith.constant 96 : index
    %1168 = memref.load %arg3[%c96_296] : memref<100xf32, #tpu.memory_space<smem>>
    %1169 = vector.broadcast %1168 : f32 to vector<8x128xf32>
    %1170 = arith.addf %1167, %1169 : vector<8x128xf32>
    %cst_297 = arith.constant 0.000000e+00 : f32
    %1171 = vector.broadcast %cst_297 : f32 to vector<8x128xf32>
    %1172 = arith.maximumf %1170, %1171 : vector<8x128xf32>
    %c96_298 = arith.constant 96 : index
    %1173 = memref.load %arg4[%c96_298] : memref<100xf32, #tpu.memory_space<smem>>
    %1174 = vector.broadcast %1173 : f32 to vector<8x128xf32>
    %1175 = arith.mulf %1172, %1174 : vector<8x128xf32>
    %1176 = arith.addf %1164, %1175 : vector<8x128xf32>
    %c97 = arith.constant 97 : index
    %1177 = memref.load %arg2[%c97] : memref<100xf32, #tpu.memory_space<smem>>
    %1178 = vector.broadcast %1177 : f32 to vector<8x128xf32>
    %1179 = arith.mulf %11, %1178 : vector<8x128xf32>
    %c97_299 = arith.constant 97 : index
    %1180 = memref.load %arg3[%c97_299] : memref<100xf32, #tpu.memory_space<smem>>
    %1181 = vector.broadcast %1180 : f32 to vector<8x128xf32>
    %1182 = arith.addf %1179, %1181 : vector<8x128xf32>
    %cst_300 = arith.constant 0.000000e+00 : f32
    %1183 = vector.broadcast %cst_300 : f32 to vector<8x128xf32>
    %1184 = arith.maximumf %1182, %1183 : vector<8x128xf32>
    %c97_301 = arith.constant 97 : index
    %1185 = memref.load %arg4[%c97_301] : memref<100xf32, #tpu.memory_space<smem>>
    %1186 = vector.broadcast %1185 : f32 to vector<8x128xf32>
    %1187 = arith.mulf %1184, %1186 : vector<8x128xf32>
    %1188 = arith.addf %1176, %1187 : vector<8x128xf32>
    %c98 = arith.constant 98 : index
    %1189 = memref.load %arg2[%c98] : memref<100xf32, #tpu.memory_space<smem>>
    %1190 = vector.broadcast %1189 : f32 to vector<8x128xf32>
    %1191 = arith.mulf %11, %1190 : vector<8x128xf32>
    %c98_302 = arith.constant 98 : index
    %1192 = memref.load %arg3[%c98_302] : memref<100xf32, #tpu.memory_space<smem>>
    %1193 = vector.broadcast %1192 : f32 to vector<8x128xf32>
    %1194 = arith.addf %1191, %1193 : vector<8x128xf32>
    %cst_303 = arith.constant 0.000000e+00 : f32
    %1195 = vector.broadcast %cst_303 : f32 to vector<8x128xf32>
    %1196 = arith.maximumf %1194, %1195 : vector<8x128xf32>
    %c98_304 = arith.constant 98 : index
    %1197 = memref.load %arg4[%c98_304] : memref<100xf32, #tpu.memory_space<smem>>
    %1198 = vector.broadcast %1197 : f32 to vector<8x128xf32>
    %1199 = arith.mulf %1196, %1198 : vector<8x128xf32>
    %1200 = arith.addf %1188, %1199 : vector<8x128xf32>
    %c99 = arith.constant 99 : index
    %1201 = memref.load %arg2[%c99] : memref<100xf32, #tpu.memory_space<smem>>
    %1202 = vector.broadcast %1201 : f32 to vector<8x128xf32>
    %1203 = arith.mulf %11, %1202 : vector<8x128xf32>
    %c99_305 = arith.constant 99 : index
    %1204 = memref.load %arg3[%c99_305] : memref<100xf32, #tpu.memory_space<smem>>
    %1205 = vector.broadcast %1204 : f32 to vector<8x128xf32>
    %1206 = arith.addf %1203, %1205 : vector<8x128xf32>
    %cst_306 = arith.constant 0.000000e+00 : f32
    %1207 = vector.broadcast %cst_306 : f32 to vector<8x128xf32>
    %1208 = arith.maximumf %1206, %1207 : vector<8x128xf32>
    %c99_307 = arith.constant 99 : index
    %1209 = memref.load %arg4[%c99_307] : memref<100xf32, #tpu.memory_space<smem>>
    %1210 = vector.broadcast %1209 : f32 to vector<8x128xf32>
    %1211 = arith.mulf %1208, %1210 : vector<8x128xf32>
    %1212 = arith.addf %1200, %1211 : vector<8x128xf32>
    %1213 = arith.negf %1212 : vector<8x128xf32>
    %1214 = math.exp %1213 : vector<8x128xf32>
    %cst_308 = arith.constant 1.000000e+00 : f32
    %1215 = vector.broadcast %cst_308 : f32 to vector<8x128xf32>
    %1216 = arith.addf %1215, %1214 : vector<8x128xf32>
    %1217 = arith.divf %1215, %1216 : vector<8x128xf32>
    %cst_309 = arith.constant 5.000000e-01 : f32
    %1218 = vector.broadcast %cst_309 : f32 to vector<8x128xf32>
    %1219 = arith.mulf %1218, %1217 : vector<8x128xf32>
    %1220 = vector.broadcast %2 : f32 to vector<8x128xf32>
    %1221 = arith.mulf %11, %1220 : vector<8x128xf32>
    %1222 = vector.broadcast %3 : f32 to vector<8x128xf32>
    %1223 = arith.addf %1221, %1222 : vector<8x128xf32>
    %cst_310 = arith.constant 0.000000e+00 : f32
    %1224 = vector.broadcast %cst_310 : f32 to vector<8x128xf32>
    %1225 = arith.maximumf %1223, %1224 : vector<8x128xf32>
    %cst_311 = arith.constant 4.000000e+00 : f32
    %1226 = vector.broadcast %cst_311 : f32 to vector<8x128xf32>
    %1227 = arith.mulf %1225, %1226 : vector<8x128xf32>
    %1228 = arith.addf %11, %1227 : vector<8x128xf32>
    %cst_312 = arith.constant 0.816496611 : f32
    %1229 = vector.broadcast %cst_312 : f32 to vector<8x128xf32>
    %1230 = arith.mulf %1219, %1229 : vector<8x128xf32>
    %c0_313 = arith.constant 0 : index
    %c0_314 = arith.constant 0 : index
    %1231 = vector.load %arg6[%c0_313, %c0_314] : memref<8x128xf32, #tpu.memory_space<vmem>>, vector<8x128xf32>
    %1232 = arith.mulf %1230, %1231 : vector<8x128xf32>
    %1233 = arith.addf %1228, %1232 : vector<8x128xf32>
    %cst_315 = arith.constant 0.000000e+00 : f32
    %1234 = vector.broadcast %cst_315 : f32 to vector<8x128xf32>
    %1235 = arith.maximumf %1233, %1234 : vector<8x128xf32>
    %1236 = vector.broadcast %5 : f32 to vector<8x128xf32>
    %1237 = arith.mulf %1235, %1236 : vector<8x128xf32>
    %1238 = vector.broadcast %6 : f32 to vector<8x128xf32>
    %1239 = arith.addf %1237, %1238 : vector<8x128xf32>
    %c0_316 = arith.constant 0 : index
    %c0_317 = arith.constant 0 : index
    %1240 = vector.load %arg7[%c0_316, %c0_317] : memref<8x128xf32, #tpu.memory_space<vmem>>, vector<8x128xf32>
    tpu.vector_store %arg7[%c0_316, %c0_317], %1239 {strides = array<i32>} : memref<8x128xf32, #tpu.memory_space<vmem>>, vector<8x128xf32>,
    %cst_318 = arith.constant 0.000000e+00 : f32
    %1241 = vector.broadcast %cst_318 : f32 to vector<8x128xf32>
    %1242 = arith.maximumf %1239, %1241 : vector<8x128xf32>
    %1243 = vector.broadcast %cst_318 : f32 to vector<8x128xf32>
    %1244 = arith.subf %1239, %1243 : vector<8x128xf32>
    %1245 = arith.cmpf one, %1244, %1244 : vector<8x128xf32>
    %1246 = vector.broadcast %cst_318 : f32 to vector<8x128xf32>
    %1247 = arith.addf %1239, %1246 : vector<8x128xf32>
    %1248 = math.absf %1244 : vector<8x128xf32>
    %cst_319 = arith.constant 0.000000e+00 : f32
    %1249 = vector.broadcast %cst_319 : f32 to vector<8x128xf32>
    %1250 = arith.subf %1249, %1248 : vector<8x128xf32>
    %1251 = math.exp %1250 : vector<8x128xf32>
    %1252 = math.log1p %1251 : vector<8x128xf32>
    %1253 = arith.addf %1242, %1252 : vector<8x128xf32>
    %1254 = arith.select %1245, %1247, %1253 : vector<8x128xi1>, vector<8x128xf32>
    %cst_320 = arith.constant 1.000000e-03 : f32
    %1255 = vector.broadcast %cst_320 : f32 to vector<8x128xf32>
    %1256 = arith.addf %1254, %1255 : vector<8x128xf32>
    %c0_321 = arith.constant 0 : index
    %c0_322 = arith.constant 0 : index
    %1257 = vector.load %arg8[%c0_321, %c0_322] : memref<8x128xf32, #tpu.memory_space<vmem>>, vector<8x128xf32>
    tpu.vector_store %arg8[%c0_321, %c0_322], %1256 {strides = array<i32>} : memref<8x128xf32, #tpu.memory_space<vmem>>, vector<8x128xf32>,
    return
  }
  func.func @transform_0(%arg0: i32) -> i32 {
    %c0_i32 = arith.constant 0 : i32
    %c0_i32_0 = arith.constant 0 : i32
    return %c0_i32 : i32
  }
  func.func @transform_1(%arg0: i32) -> i32 {
    %c0_i32 = arith.constant 0 : i32
    %c0_i32_0 = arith.constant 0 : i32
    return %c0_i32 : i32
  }
  func.func @transform_2(%arg0: i32) -> i32 {
    %c0_i32 = arith.constant 0 : i32
    %c0_i32_0 = arith.constant 0 : i32
    return %c0_i32 : i32
  }
  func.func @transform_3(%arg0: i32) -> i32 {
    %c0_i32 = arith.constant 0 : i32
    %c0_i32_0 = arith.constant 0 : i32
    return %c0_i32 : i32
  }
  func.func @transform_4(%arg0: i32) -> (i32, i32) {
    %c0_i32 = arith.constant 0 : i32
    %c0_i32_0 = arith.constant 0 : i32
    return %arg0, %c0_i32 : i32, i32
  }
  func.func @transform_5(%arg0: i32) -> (i32, i32) {
    %c0_i32 = arith.constant 0 : i32
    %c0_i32_0 = arith.constant 0 : i32
    return %arg0, %c0_i32 : i32, i32
  }
  func.func @transform_6(%arg0: i32) -> (i32, i32) {
    %c0_i32 = arith.constant 0 : i32
    %c0_i32_0 = arith.constant 0 : i32
    return %arg0, %c0_i32 : i32, i32
  }
  func.func @transform_7(%arg0: i32) -> (i32, i32) {
    %c0_i32 = arith.constant 0 : i32
    %c0_i32_0 = arith.constant 0 : i32
    return %arg0, %c0_i32 : i32, i32
  }
}

</mosaic_0001>

<bundles_post_ra>
// kernel: sdenet_forward.1
= control target key start
LH: loop header
LB: loop body
LE: loop exit
PB: predicated region body
PF: predicated region fallthrough
CT: control target
= control target key end

     0   :  { %s2917_s0 = inlined_call_operand.vmem [shape: f32[8], index: 0, kind: input, shape index: {}]   ;;  %s2918_s1 = inlined_call_operand.vmem [shape: f32[100], index: 1, kind: input, shape index: {}]   ;;  %s2919_s2 = inlined_call_operand.vmem [shape: f32[100], index: 2, kind: input, shape index: {}]   ;;  %s2920_s3 = inlined_call_operand.vmem [shape: f32[100], index: 3, kind: input, shape index: {}]   ;;  %s2921_s4 = inlined_call_operand.vmem [shape: f32[32,128], index: 4, kind: input, shape index: {}]   ;;  %s2922_s5 = inlined_call_operand.vmem [shape: f32[32,128], index: 5, kind: input, shape index: {}]   ;;  %s2923_s6 = inlined_call_operand.hbm [shape: f32[32,128], index: 6, kind: output, shape index: {0}]   ;;  %s2924_s7 = inlined_call_operand.hbm [shape: f32[32,128], index: 7, kind: output, shape index: {1}]  }
   0x1   :  { %2928 = sst [smem:[#allocation18_spill]] %s2917_s0 }
   0x2   :  { %13 = vsyncpa [#allocation4], 0 }
   0x3   :  { %14 = vsyncpa [#allocation6], 0 }
   0x4   :  { %15 = vsyncpa [#allocation9], 0 }
   0x5   :  { %16 = vsyncpa [#allocation3], 0 }
   0x6   :  { %18 = vsyncpa [#allocation3 + $0x1], 0 }
   0x7   :  { %19 = vsyncpa [#allocation12], 0 }
   0x8   :  { %21 = vsyncpa [#allocation12 + $0x1], 0  ;;  %s2316_s24 = smov 0   ;;  %s2318_s25 = smov 0  }
   0x9   :  { %s2320_s26 = smov 0   ;;  %s2322_s27 = smov 0  }
   0xa LB: > { %s2337_s28 = sadd.s32 4294967295, %s2268_s27   ;;  %s1687_s29 = sadd.s32 4294967294, %s2268_s27   ;;  %s2268_s27 = sphi %s2322_s27, %s2946_s27   ;;  %s2264_s26 = sphi %s2320_s26, %s2945_s26   ;;  %s2260_s25 = sphi %s2318_s25, %s2944_s25   ;;  %s2256_s24 = sphi %s2316_s24, %s2943_s24  }
   0xb   : > { %s2341_s30 = sadd.s32 1, %s2268_s27   ;;  %s170_s8 = sadd.s32 1, %s2264_s26 }
   0xc   : > { %s167_s9 = ssub.s32 %s2268_s27, %s2341_s30  ;;  %p180_p0 = scmp.ne.s32.totalorder %s2264_s26, %s2260_s25 }
   0xd   : > { %p168_p1 = scmp.eq.s32.totalorder %s167_s9, 0  ;;  %p181_p2 = scmp.eq.s32.totalorder %s2337_s28, 3 }
   0xe   : > { %p186_p3 = scmp.ne.s32.totalorder %s2260_s25, %s2256_s24  ;;  %p187_p4 = scmp.eq.s32.totalorder %s1687_s29, 3 }
   0xf   : > { %s2352_s10 = scalar_select %p168_p1, %s2264_s26, %s170_s8  }
  0x10   : > { %p2354_p5 = por %p181_p2, %p180_p0  ;;  %p2358_p6 = por %p187_p4, %p186_p3 }
  0x11   : > { %p1688_p7 = scmp.ge.s32.totalorder %s2268_s27, 1  ;;  %p220_p8 = scmp.lt.s32.totalorder %s2268_s27, 5 }
  0x12   : > { %s2929_s11 = scalar_select %p2354_p5, 1, 0 }
  0x13   : > { %s2930_s12 = scalar_select %p2358_p6, 1, 0 }
  0x14   : > { %p2925_p9 = scmp.eq.s32.totalorder %s2337_s28, 0  ;;  %p2365_p10 = pnand %p1688_p7, %p220_p8 }
  0x15   : > { %s244_s16 = sshll.u32 %s2918_s1, 4  ;;  %s2932_s0 = sld [smem:[#allocation18_spill]]  ;;  %s245_s16 = int_to_ptr.vmem [resolvable:$true] %s244_s16 }
  0x16   : > { %s2931_s13 = scalar_select %p2365_p10, 1, 0 }
  0x17   : > { %p2033_p11 = pneg %p2365_p10  ;;  %s255_s23 = sshll.u32 %s2919_s2, 4  ;;  %s2386_s23 = int_to_ptr.vmem [resolvable:$true] %s255_s23 }
  0x18   : > { %s266_s9 = sshll.u32 %s2920_s3, 4  ;;  %s2106_s14 = scalar_lea.vmem %s245_s16, 16  ;;  %s267_s9 = int_to_ptr.vmem [resolvable:$true] %s266_s9 }
  0x19   : > { %p2379_p12 = pnand %p2925_p9, %p2033_p11  ;;  %p2107_p13 = scmp.ne.s32.totalorder %s245_s16, %s2106_s14 }
  0x1a   : > { %p2114_p3 = scmp.lt.s32.totalorder %s245_s16, %s245_s16  ;;  %p2115_p4 = scmp.lt.s32.totalorder %s2106_s14, %s2106_s14 }
  0x1b   : > { %s233_s19 = sshll.u32 %s2932_s0, 4  ;;  %p2108_p0 = pneg %p2379_p12  ;;  %s234_s19 = int_to_ptr.vmem [resolvable:$true] %s233_s19 }
  0x1c   : > { %p2116_p7 = por %p2115_p4, %p2114_p3 }
  0x1d   : > { %p2109_p1 = pnand %p2108_p0, %p2107_p13 }
  0x1f   : > { %p2110_p2 = pneg %p2109_p1 }
  0x21   : > { %p2117_p8 = pnand %p2116_p7, %p2110_p2 }
  0x23   : > { %2120 = shalt.err (!%p2117_p8)
}
  0x24   : > { %s2270_s15 = smov [#allocation5]   ;;  %s2121_s17 = scalar_lea.vmem %s234_s19, 16 }
  0x25   : > { %2039 = dma.vmem_to_smem (!%p2379_p12), %s245_s16, 16, %s2270_s15, [#allocation6]  }
  0x26   : > { %p2122_p11 = scmp.ne.s32.totalorder %s234_s19, %s2121_s17  ;;  %p2129_p5 = scmp.lt.s32.totalorder %s234_s19, %s234_s19 }
  0x27   : > { %p2130_p10 = scmp.lt.s32.totalorder %s2121_s17, %s2121_s17 }
  0x28   : > { %p2124_p9 = pnand %p2122_p11, %p2108_p0 }
  0x29   : > { %p2131_p13 = por %p2130_p10, %p2129_p5 }
  0x2a   : > { %p2125_p6 = pneg %p2124_p9 }
  0x2c   : > { %p2132_p1 = pnand %p2131_p13, %p2125_p6 }
  0x2e   : > { %2135 = shalt.err (!%p2132_p1)
}
  0x2f   : > { %s2271_s18 = smov [#allocation2]   ;;  %s2136_s16 = scalar_lea.vmem %s2386_s23, 16 }
  0x30   : > { %2036 = dma.vmem_to_smem (!%p2379_p12), %s234_s19, 16, %s2271_s18, [#allocation4]  }
  0x31   : > { %p2137_p2 = scmp.ne.s32.totalorder %s2386_s23, %s2136_s16  ;;  %p2144_p9 = scmp.lt.s32.totalorder %s2386_s23, %s2386_s23 }
  0x32   : > { %p2145_p7 = scmp.lt.s32.totalorder %s2136_s16, %s2136_s16 }
  0x33   : > { %p2139_p3 = pnand %p2137_p2, %p2108_p0 }
  0x34   : > { %p2146_p5 = por %p2145_p7, %p2144_p9 }
  0x35   : > { %p2140_p4 = pneg %p2139_p3 }
  0x37   : > { %p2147_p6 = pnand %p2146_p5, %p2140_p4 }
  0x39   : > { %2150 = shalt.err (!%p2147_p6)
}
  0x3a   : > { %s2272_s21 = smov [#allocation7]   ;;  %s2151_s29 = scalar_lea.vmem %s267_s9, 16 }
  0x3b   : > { %2042 = dma.vmem_to_smem (!%p2379_p12), %s2386_s23, 16, %s2272_s21, [#allocation6]  }
  0x3c   : > { %p2152_p10 = scmp.ne.s32.totalorder %s267_s9, %s2151_s29  ;;  %p2159_p13 = scmp.lt.s32.totalorder %s267_s9, %s267_s9 }
  0x3d   : > { %p2160_p1 = scmp.lt.s32.totalorder %s2151_s29, %s2151_s29 }
  0x3e   : > { %p2154_p8 = pnand %p2152_p10, %p2108_p0 }
  0x3f   : > { %p2161_p2 = por %p2160_p1, %p2159_p13 }
  0x40   : > { %p2155_p11 = pneg %p2154_p8 }
  0x42   : > { %p2162_p3 = pnand %p2161_p2, %p2155_p11 }
  0x44   : > { %2165 = shalt.err (!%p2162_p3)
}
  0x45   : > { %s2273_s8 = smov [#allocation8]   ;;  %p2934_p4 = scmp.ne.s32.totalorder %s2931_s13, 0 }
  0x46   : > { %2045 = dma.vmem_to_smem (!%p2379_p12), %s267_s9, 16, %s2273_s8, [#allocation9]  }
  0x47   : > { %293 = sbr.rel (%p2934_p4) target bundleno = 518 (0x206), region = 44  ;;  %p2935_p9 = scmp.eq.s32.totalorder (!%p2934_p4), %s2337_s28, 0 }
  0x4c   : > { %2235 = dma.done.wait (%p2935_p9), [#allocation4], 16   ;;  %p2936_p7 = pmov %p2935_p9 }
  0x4e   : > { %2237 = vsyncadd (%p2936_p7), [#allocation4], 4294967280  ;;  %p2937_p0 = pmov %p2936_p7 }
  0x50   : > { %2239 = dma.done.wait (%p2937_p0), [#allocation6], 32   ;;  %p2938_p5 = pmov %p2937_p0 }
  0x51   : > { %p2939_p6 = pmov %p2937_p0 }
  0x52   : > { %2241 = vsyncadd (%p2938_p5), [#allocation6], 4294967264 }
  0x53   : > { %2243 = dma.done.wait (%p2939_p6), [#allocation9], 16   ;;  %p2940_p12 = pmov %p2937_p0 }
  0x55   : > { %2245 = vsyncadd (%p2940_p12), [#allocation9], 4294967280 }
  0x56   : > { %311 = sfence }
  0x57   : > { %p346_p10 = scmp.lt.s32.totalorder %s2337_s28, 3  ;;  %s354_s13 = sld [smem:[#allocation2]] }
  0x58   : > { %s1703_s23 = sld [smem:[#allocation2 + $0x1]]  ;;  %p2941_p11 = scmp.ne.s32.totalorder %s2929_s11, 0 }
  0x59   : > { %s2438_s20 = scalar_select %p346_p10, %s2337_s28, 3 }
  0x5a   : > { %s2446_s18 = sld [smem:[#allocation2 + $0x4]] }
  0x5b   : > { %s1701_s9 = sshll.u32 %s2438_s20, 3  ;;  %s367_s16 = sld [smem:[#allocation5]] }
  0x5c   : > { %s349_s17 = scalar_lea.vmem %s2921_s4, %s1701_s9  ;;  %s370_s21 = sld [smem:[#allocation7]] }
  0x5d   : > { %v361_v0 = vld [vmem:[%s349_s17] sm:$0xff]  ;;  %v362_v1 = vstv %s354_s13  ;;  %s374_s22 = sld [smem:[#allocation8]] }
  0x5e   : > { %v363_v2 = vmul.f32 %v362_v1, %v361_v0  ;;  %v364_v3 = vstv %s1703_s23  ;;  %s1709_s19 = sld [smem:[#allocation5 + $0x1]] }
  0x5f   : > { %s1710_s29 = sld [smem:[#allocation7 + $0x1]] }
  0x60   : > { %v2448_v4 = vadd.f32 %v364_v3, %v363_v2  ;;  %s2450_s8 = sld [smem:[#allocation8 + $0x1]]  ;;  %v366_v14 = vstv %s2446_s18 }
  0x61   : > { %v368_v5 = vstv %s367_s16  ;;  %s1712_s0 = sld [smem:[#allocation5 + $0x2]] }
  0x62   : > { %v369_v6 = vmul.f32 %v368_v5, %v2448_v4  ;;  %v371_v7 = vstv %s370_s21  ;;  %s1713_s13 = sld [smem:[#allocation7 + $0x2]] }
  0x63   : > { %s2453_s14 = sld [smem:[#allocation8 + $0x2]]  ;;  %v375_v10 = vstv %s374_s22 }
  0x64   : > { %v372_v8 = vadd.f32 %v371_v7, %v369_v6  ;;  %v379_v9 = vstv %s1709_s19  ;;  %s1715_s23 = sld [smem:[#allocation5 + $0x3]] }
  0x65   : > { %v380_v11 = vmul.f32 %v379_v9, %v2448_v4  ;;  %v382_v12 = vstv %s1710_s29  ;;  %s1716_s15 = sld [smem:[#allocation7 + $0x3]] }
  0x66   : > { %v373_v13 = vmax.f32 %v372_v8, 0.0  ;;  %s2456_s17 = sld [smem:[#allocation8 + $0x3]]  ;;  %v386_v18 = vstv %s2450_s8 }
  0x67   : > { %v383_v15 = vadd.f32 %v382_v12, %v380_v11  ;;  %v390_v16 = vstv %s1712_s0  ;;  %s1718_s16 = sld [smem:[#allocation5 + $0x4]] }
  0x68   : > { %v376_v17 = vmul.f32 %v375_v10, %v373_v13  ;;  %v391_v19 = vmul.f32 %v390_v16, %v2448_v4  ;;  %v393_v20 = vstv %s1713_s13  ;;  %s1719_s21 = sld [smem:[#allocation7 + $0x4]] }
  0x69   : > { %v384_v21 = vmax.f32 %v383_v15, 0.0  ;;  %s2461_s22 = sld [smem:[#allocation8 + $0x4]]  ;;  %v397_v26 = vstv %s2453_s14 }
  0x6a   : > { %v377_v22 = vadd.f32 %v376_v17, %v366_v14  ;;  %v394_v23 = vadd.f32 %v393_v20, %v391_v19  ;;  %v401_v24 = vstv %s1715_s23  ;;  %s1721_s19 = sld [smem:[#allocation5 + $0x5]] }
  0x6b   : > { %v387_v25 = vmul.f32 %v386_v18, %v384_v21  ;;  %v402_v27 = vmul.f32 %v401_v24, %v2448_v4  ;;  %v404_v28 = vstv %s1716_s15  ;;  %s1722_s0 = sld [smem:[#allocation7 + $0x5]] }
  0x6c   : > { %v395_v29 = vmax.f32 %v394_v23, 0.0  ;;  %s2465_s18 = sld [smem:[#allocation8 + $0x5]]  ;;  %v408_v34 = vstv %s2456_s17 }
  0x6d   : > { %v388_v30 = vadd.f32 %v387_v25, %v377_v22  ;;  %v405_v31 = vadd.f32 %v404_v28, %v402_v27  ;;  %v412_v32 = vstv %s1718_s16  ;;  %s1724_s29 = sld [smem:[#allocation5 + $0x6]] }
  0x6e   : > { %v398_v33 = vmul.f32 %v397_v26, %v395_v29  ;;  %v413_v35 = vmul.f32 %v412_v32, %v2448_v4  ;;  %v415_v36 = vstv %s1719_s21  ;;  %s1725_s8 = sld [smem:[#allocation7 + $0x6]] }
  0x6f   : > { %v406_v37 = vmax.f32 %v405_v31, 0.0  ;;  %s2469_s13 = sld [smem:[#allocation8 + $0x6]]  ;;  %v419_v42 = vstv %s2461_s22 }
  0x70   : > { %v399_v38 = vadd.f32 %v398_v33, %v388_v30  ;;  %v416_v39 = vadd.f32 %v415_v36, %v413_v35  ;;  %v423_v40 = vstv %s1721_s19  ;;  %s1727_s14 = sld [smem:[#allocation5 + $0x7]] }
  0x71   : > { %v409_v41 = vmul.f32 %v408_v34, %v406_v37  ;;  %v424_v43 = vmul.f32 %v423_v40, %v2448_v4  ;;  %v426_v44 = vstv %s1722_s0  ;;  %s1728_s23 = sld [smem:[#allocation7 + $0x7]] }
  0x72   : > { %v417_v45 = vmax.f32 %v416_v39, 0.0  ;;  %s2473_s15 = sld [smem:[#allocation8 + $0x7]]  ;;  %v430_v50 = vstv %s2465_s18 }
  0x73   : > { %v410_v46 = vadd.f32 %v409_v41, %v399_v38  ;;  %v427_v47 = vadd.f32 %v426_v44, %v424_v43  ;;  %v434_v48 = vstv %s1724_s29  ;;  %s1730_s17 = sld [smem:[#allocation5 + $0x8]] }
  0x74   : > { %v420_v49 = vmul.f32 %v419_v42, %v417_v45  ;;  %v435_v51 = vmul.f32 %v434_v48, %v2448_v4  ;;  %v437_v52 = vstv %s1725_s8  ;;  %s1731_s16 = sld [smem:[#allocation7 + $0x8]] }
  0x75   : > { %v428_v53 = vmax.f32 %v427_v47, 0.0  ;;  %s2477_s21 = sld [smem:[#allocation8 + $0x8]]  ;;  %v441_v58 = vstv %s2469_s13 }
  0x76   : > { %v421_v54 = vadd.f32 %v420_v49, %v410_v46  ;;  %v438_v55 = vadd.f32 %v437_v52, %v435_v51  ;;  %v445_v56 = vstv %s1727_s14  ;;  %s1733_s22 = sld [smem:[#allocation5 + $0x9]] }
  0x77   : > { %v431_v57 = vmul.f32 %v430_v50, %v428_v53  ;;  %v446_v59 = vmul.f32 %v445_v56, %v2448_v4  ;;  %v448_v60 = vstv %s1728_s23  ;;  %s1734_s19 = sld [smem:[#allocation7 + $0x9]] }
  0x78   : > { %v439_v61 = vmax.f32 %v438_v55, 0.0  ;;  %s2481_s0 = sld [smem:[#allocation8 + $0x9]]  ;;  %v452_v2 = vstv %s2473_s15 }
  0x79   : > { %v432_v62 = vadd.f32 %v431_v57, %v421_v54  ;;  %v449_v63 = vadd.f32 %v448_v60, %v446_v59  ;;  %v456_v0 = vstv %s1730_s17  ;;  %s1736_s18 = sld [smem:[#allocation5 + $0xa]] }
  0x7a   : > { %v442_v1 = vmul.f32 %v441_v58, %v439_v61  ;;  %v457_v3 = vmul.f32 %v456_v0, %v2448_v4  ;;  %v459_v5 = vstv %s1731_s16  ;;  %s1737_s29 = sld [smem:[#allocation7 + $0xa]] }
  0x7b   : > { %v450_v6 = vmax.f32 %v449_v63, 0.0  ;;  %s2485_s8 = sld [smem:[#allocation8 + $0xa]]  ;;  %v463_v11 = vstv %s2477_s21 }
  0x7c   : > { %v443_v7 = vadd.f32 %v442_v1, %v432_v62  ;;  %v460_v8 = vadd.f32 %v459_v5, %v457_v3  ;;  %v467_v9 = vstv %s1733_s22  ;;  %s1739_s13 = sld [smem:[#allocation5 + $0xb]] }
  0x7d   : > { %v453_v10 = vmul.f32 %v452_v2, %v450_v6  ;;  %v468_v12 = vmul.f32 %v467_v9, %v2448_v4  ;;  %v470_v13 = vstv %s1734_s19  ;;  %s1740_s14 = sld [smem:[#allocation7 + $0xb]] }
  0x7e   : > { %v461_v14 = vmax.f32 %v460_v8, 0.0  ;;  %s2489_s23 = sld [smem:[#allocation8 + $0xb]]  ;;  %v474_v19 = vstv %s2481_s0 }
  0x7f   : > { %v454_v15 = vadd.f32 %v453_v10, %v443_v7  ;;  %v471_v16 = vadd.f32 %v470_v13, %v468_v12  ;;  %v478_v17 = vstv %s1736_s18  ;;  %s1742_s15 = sld [smem:[#allocation5 + $0xc]] }
  0x80   : > { %v464_v18 = vmul.f32 %v463_v11, %v461_v14  ;;  %v479_v20 = vmul.f32 %v478_v17, %v2448_v4  ;;  %v481_v21 = vstv %s1737_s29  ;;  %s1743_s17 = sld [smem:[#allocation7 + $0xc]] }
  0x81   : > { %v472_v22 = vmax.f32 %v471_v16, 0.0  ;;  %s2493_s16 = sld [smem:[#allocation8 + $0xc]]  ;;  %v485_v27 = vstv %s2485_s8 }
  0x82   : > { %v465_v23 = vadd.f32 %v464_v18, %v454_v15  ;;  %v482_v24 = vadd.f32 %v481_v21, %v479_v20  ;;  %v489_v25 = vstv %s1739_s13  ;;  %s1745_s21 = sld [smem:[#allocation5 + $0xd]] }
  0x83   : > { %v475_v26 = vmul.f32 %v474_v19, %v472_v22  ;;  %v490_v28 = vmul.f32 %v489_v25, %v2448_v4  ;;  %v492_v29 = vstv %s1740_s14  ;;  %s1746_s22 = sld [smem:[#allocation7 + $0xd]] }
  0x84   : > { %v483_v30 = vmax.f32 %v482_v24, 0.0  ;;  %s2497_s19 = sld [smem:[#allocation8 + $0xd]]  ;;  %v496_v35 = vstv %s2489_s23 }
  0x85   : > { %v476_v31 = vadd.f32 %v475_v26, %v465_v23  ;;  %v493_v32 = vadd.f32 %v492_v29, %v490_v28  ;;  %v500_v33 = vstv %s1742_s15  ;;  %s1748_s0 = sld [smem:[#allocation5 + $0xe]] }
  0x86   : > { %v486_v34 = vmul.f32 %v485_v27, %v483_v30  ;;  %v501_v36 = vmul.f32 %v500_v33, %v2448_v4  ;;  %v503_v37 = vstv %s1743_s17  ;;  %s1749_s18 = sld [smem:[#allocation7 + $0xe]] }
  0x87   : > { %v494_v38 = vmax.f32 %v493_v32, 0.0  ;;  %s2501_s29 = sld [smem:[#allocation8 + $0xe]]  ;;  %v507_v43 = vstv %s2493_s16 }
  0x88   : > { %v487_v39 = vadd.f32 %v486_v34, %v476_v31  ;;  %v504_v40 = vadd.f32 %v503_v37, %v501_v36  ;;  %v511_v41 = vstv %s1745_s21  ;;  %s1751_s8 = sld [smem:[#allocation5 + $0xf]] }
  0x89   : > { %v497_v42 = vmul.f32 %v496_v35, %v494_v38  ;;  %v512_v44 = vmul.f32 %v511_v41, %v2448_v4  ;;  %v514_v45 = vstv %s1746_s22  ;;  %s1752_s13 = sld [smem:[#allocation7 + $0xf]] }
  0x8a   : > { %v505_v46 = vmax.f32 %v504_v40, 0.0  ;;  %s2505_s14 = sld [smem:[#allocation8 + $0xf]]  ;;  %v518_v51 = vstv %s2497_s19 }
  0x8b   : > { %v498_v47 = vadd.f32 %v497_v42, %v487_v39  ;;  %v515_v48 = vadd.f32 %v514_v45, %v512_v44  ;;  %v522_v49 = vstv %s1748_s0  ;;  %s1754_s23 = sld [smem:[#allocation5 + $0x10]] }
  0x8c   : > { %v508_v50 = vmul.f32 %v507_v43, %v505_v46  ;;  %v523_v52 = vmul.f32 %v522_v49, %v2448_v4  ;;  %v525_v53 = vstv %s1749_s18  ;;  %s1755_s15 = sld [smem:[#allocation7 + $0x10]] }
  0x8d   : > { %v516_v54 = vmax.f32 %v515_v48, 0.0  ;;  %s2509_s17 = sld [smem:[#allocation8 + $0x10]]  ;;  %v529_v59 = vstv %s2501_s29 }
  0x8e   : > { %v509_v55 = vadd.f32 %v508_v50, %v498_v47  ;;  %v526_v56 = vadd.f32 %v525_v53, %v523_v52  ;;  %v533_v57 = vstv %s1751_s8  ;;  %s1757_s16 = sld [smem:[#allocation5 + $0x11]] }
  0x8f   : > { %v519_v58 = vmul.f32 %v518_v51, %v516_v54  ;;  %v534_v60 = vmul.f32 %v533_v57, %v2448_v4  ;;  %v536_v61 = vstv %s1752_s13  ;;  %s1758_s21 = sld [smem:[#allocation7 + $0x11]] }
  0x90   : > { %v527_v62 = vmax.f32 %v526_v56, 0.0  ;;  %s2513_s22 = sld [smem:[#allocation8 + $0x11]]  ;;  %v540_v3 = vstv %s2505_s14 }
  0x91   : > { %v520_v63 = vadd.f32 %v519_v58, %v509_v55  ;;  %v537_v0 = vadd.f32 %v536_v61, %v534_v60  ;;  %v544_v1 = vstv %s1754_s23  ;;  %s1760_s19 = sld [smem:[#allocation5 + $0x12]] }
  0x92   : > { %v530_v2 = vmul.f32 %v529_v59, %v527_v62  ;;  %v545_v5 = vmul.f32 %v544_v1, %v2448_v4  ;;  %v547_v6 = vstv %s1755_s15  ;;  %s1761_s0 = sld [smem:[#allocation7 + $0x12]] }
  0x93   : > { %v538_v7 = vmax.f32 %v537_v0, 0.0  ;;  %s2517_s18 = sld [smem:[#allocation8 + $0x12]]  ;;  %v551_v12 = vstv %s2509_s17 }
  0x94   : > { %v531_v8 = vadd.f32 %v530_v2, %v520_v63  ;;  %v548_v9 = vadd.f32 %v547_v6, %v545_v5  ;;  %v555_v10 = vstv %s1757_s16  ;;  %s1763_s29 = sld [smem:[#allocation5 + $0x13]] }
  0x95   : > { %v541_v11 = vmul.f32 %v540_v3, %v538_v7  ;;  %v556_v13 = vmul.f32 %v555_v10, %v2448_v4  ;;  %v558_v14 = vstv %s1758_s21  ;;  %s1764_s8 = sld [smem:[#allocation7 + $0x13]] }
  0x96   : > { %v549_v15 = vmax.f32 %v548_v9, 0.0  ;;  %s2521_s13 = sld [smem:[#allocation8 + $0x13]]  ;;  %v562_v20 = vstv %s2513_s22 }
  0x97   : > { %v542_v16 = vadd.f32 %v541_v11, %v531_v8  ;;  %v559_v17 = vadd.f32 %v558_v14, %v556_v13  ;;  %v566_v18 = vstv %s1760_s19  ;;  %s1766_s14 = sld [smem:[#allocation5 + $0x14]] }
  0x98   : > { %v552_v19 = vmul.f32 %v551_v12, %v549_v15  ;;  %v567_v21 = vmul.f32 %v566_v18, %v2448_v4  ;;  %v569_v22 = vstv %s1761_s0  ;;  %s1767_s23 = sld [smem:[#allocation7 + $0x14]] }
  0x99   : > { %v560_v23 = vmax.f32 %v559_v17, 0.0  ;;  %s2525_s15 = sld [smem:[#allocation8 + $0x14]]  ;;  %v573_v28 = vstv %s2517_s18 }
  0x9a   : > { %v553_v24 = vadd.f32 %v552_v19, %v542_v16  ;;  %v570_v25 = vadd.f32 %v569_v22, %v567_v21  ;;  %v577_v26 = vstv %s1763_s29  ;;  %s1769_s17 = sld [smem:[#allocation5 + $0x15]] }
  0x9b   : > { %v563_v27 = vmul.f32 %v562_v20, %v560_v23  ;;  %v578_v29 = vmul.f32 %v577_v26, %v2448_v4  ;;  %v580_v30 = vstv %s1764_s8  ;;  %s1770_s16 = sld [smem:[#allocation7 + $0x15]] }
  0x9c   : > { %v571_v31 = vmax.f32 %v570_v25, 0.0  ;;  %s2529_s21 = sld [smem:[#allocation8 + $0x15]]  ;;  %v584_v36 = vstv %s2521_s13 }
  0x9d   : > { %v564_v32 = vadd.f32 %v563_v27, %v553_v24  ;;  %v581_v33 = vadd.f32 %v580_v30, %v578_v29  ;;  %v588_v34 = vstv %s1766_s14  ;;  %s1772_s22 = sld [smem:[#allocation5 + $0x16]] }
  0x9e   : > { %v574_v35 = vmul.f32 %v573_v28, %v571_v31  ;;  %v589_v37 = vmul.f32 %v588_v34, %v2448_v4  ;;  %v591_v38 = vstv %s1767_s23  ;;  %s1773_s19 = sld [smem:[#allocation7 + $0x16]] }
  0x9f   : > { %v582_v39 = vmax.f32 %v581_v33, 0.0  ;;  %s2533_s0 = sld [smem:[#allocation8 + $0x16]]  ;;  %v595_v44 = vstv %s2525_s15 }
  0xa0   : > { %v575_v40 = vadd.f32 %v574_v35, %v564_v32  ;;  %v592_v41 = vadd.f32 %v591_v38, %v589_v37  ;;  %v599_v42 = vstv %s1769_s17  ;;  %s1775_s18 = sld [smem:[#allocation5 + $0x17]] }
  0xa1   : > { %v585_v43 = vmul.f32 %v584_v36, %v582_v39  ;;  %v600_v45 = vmul.f32 %v599_v42, %v2448_v4  ;;  %v602_v46 = vstv %s1770_s16  ;;  %s1776_s29 = sld [smem:[#allocation7 + $0x17]] }
  0xa2   : > { %v593_v47 = vmax.f32 %v592_v41, 0.0  ;;  %s2537_s8 = sld [smem:[#allocation8 + $0x17]]  ;;  %v606_v52 = vstv %s2529_s21 }
  0xa3   : > { %v586_v48 = vadd.f32 %v585_v43, %v575_v40  ;;  %v603_v49 = vadd.f32 %v602_v46, %v600_v45  ;;  %v610_v50 = vstv %s1772_s22  ;;  %s1778_s13 = sld [smem:[#allocation5 + $0x18]] }
  0xa4   : > { %v596_v51 = vmul.f32 %v595_v44, %v593_v47  ;;  %v611_v53 = vmul.f32 %v610_v50, %v2448_v4  ;;  %v613_v54 = vstv %s1773_s19  ;;  %s1779_s14 = sld [smem:[#allocation7 + $0x18]] }
  0xa5   : > { %v604_v55 = vmax.f32 %v603_v49, 0.0  ;;  %s2541_s23 = sld [smem:[#allocation8 + $0x18]]  ;;  %v617_v60 = vstv %s2533_s0 }
  0xa6   : > { %v597_v56 = vadd.f32 %v596_v51, %v586_v48  ;;  %v614_v57 = vadd.f32 %v613_v54, %v611_v53  ;;  %v621_v58 = vstv %s1775_s18  ;;  %s1781_s15 = sld [smem:[#allocation5 + $0x19]] }
  0xa7   : > { %v607_v59 = vmul.f32 %v606_v52, %v604_v55  ;;  %v622_v61 = vmul.f32 %v621_v58, %v2448_v4  ;;  %v624_v62 = vstv %s1776_s29  ;;  %s1782_s17 = sld [smem:[#allocation7 + $0x19]] }
  0xa8   : > { %v615_v63 = vmax.f32 %v614_v57, 0.0  ;;  %s2545_s16 = sld [smem:[#allocation8 + $0x19]]  ;;  %v628_v5 = vstv %s2537_s8 }
  0xa9   : > { %v608_v0 = vadd.f32 %v607_v59, %v597_v56  ;;  %v625_v1 = vadd.f32 %v624_v62, %v622_v61  ;;  %v632_v2 = vstv %s1778_s13  ;;  %s1784_s21 = sld [smem:[#allocation5 + $0x1a]] }
  0xaa   : > { %v618_v3 = vmul.f32 %v617_v60, %v615_v63  ;;  %v633_v6 = vmul.f32 %v632_v2, %v2448_v4  ;;  %v635_v7 = vstv %s1779_s14  ;;  %s1785_s22 = sld [smem:[#allocation7 + $0x1a]] }
  0xab   : > { %v626_v8 = vmax.f32 %v625_v1, 0.0  ;;  %s2549_s19 = sld [smem:[#allocation8 + $0x1a]]  ;;  %v639_v13 = vstv %s2541_s23 }
  0xac   : > { %v619_v9 = vadd.f32 %v618_v3, %v608_v0  ;;  %v636_v10 = vadd.f32 %v635_v7, %v633_v6  ;;  %v643_v11 = vstv %s1781_s15  ;;  %s1787_s0 = sld [smem:[#allocation5 + $0x1b]] }
  0xad   : > { %v629_v12 = vmul.f32 %v628_v5, %v626_v8  ;;  %v644_v14 = vmul.f32 %v643_v11, %v2448_v4  ;;  %v646_v15 = vstv %s1782_s17  ;;  %s1788_s18 = sld [smem:[#allocation7 + $0x1b]] }
  0xae   : > { %v637_v16 = vmax.f32 %v636_v10, 0.0  ;;  %s2553_s29 = sld [smem:[#allocation8 + $0x1b]]  ;;  %v650_v21 = vstv %s2545_s16 }
  0xaf   : > { %v630_v17 = vadd.f32 %v629_v12, %v619_v9  ;;  %v647_v18 = vadd.f32 %v646_v15, %v644_v14  ;;  %v654_v19 = vstv %s1784_s21  ;;  %s1790_s8 = sld [smem:[#allocation5 + $0x1c]] }
  0xb0   : > { %v640_v20 = vmul.f32 %v639_v13, %v637_v16  ;;  %v655_v22 = vmul.f32 %v654_v19, %v2448_v4  ;;  %v657_v23 = vstv %s1785_s22  ;;  %s1791_s13 = sld [smem:[#allocation7 + $0x1c]] }
  0xb1   : > { %v648_v24 = vmax.f32 %v647_v18, 0.0  ;;  %s2557_s14 = sld [smem:[#allocation8 + $0x1c]]  ;;  %v661_v29 = vstv %s2549_s19 }
  0xb2   : > { %v641_v25 = vadd.f32 %v640_v20, %v630_v17  ;;  %v658_v26 = vadd.f32 %v657_v23, %v655_v22  ;;  %v665_v27 = vstv %s1787_s0  ;;  %s1793_s23 = sld [smem:[#allocation5 + $0x1d]] }
  0xb3   : > { %v651_v28 = vmul.f32 %v650_v21, %v648_v24  ;;  %v666_v30 = vmul.f32 %v665_v27, %v2448_v4  ;;  %v668_v31 = vstv %s1788_s18  ;;  %s1794_s15 = sld [smem:[#allocation7 + $0x1d]] }
  0xb4   : > { %v659_v32 = vmax.f32 %v658_v26, 0.0  ;;  %s2561_s17 = sld [smem:[#allocation8 + $0x1d]]  ;;  %v672_v37 = vstv %s2553_s29 }
  0xb5   : > { %v652_v33 = vadd.f32 %v651_v28, %v641_v25  ;;  %v669_v34 = vadd.f32 %v668_v31, %v666_v30  ;;  %v676_v35 = vstv %s1790_s8  ;;  %s1796_s16 = sld [smem:[#allocation5 + $0x1e]] }
  0xb6   : > { %v662_v36 = vmul.f32 %v661_v29, %v659_v32  ;;  %v677_v38 = vmul.f32 %v676_v35, %v2448_v4  ;;  %v679_v39 = vstv %s1791_s13  ;;  %s1797_s21 = sld [smem:[#allocation7 + $0x1e]] }
  0xb7   : > { %v670_v40 = vmax.f32 %v669_v34, 0.0  ;;  %s2565_s22 = sld [smem:[#allocation8 + $0x1e]]  ;;  %v683_v45 = vstv %s2557_s14 }
  0xb8   : > { %v663_v41 = vadd.f32 %v662_v36, %v652_v33  ;;  %v680_v42 = vadd.f32 %v679_v39, %v677_v38  ;;  %v687_v43 = vstv %s1793_s23  ;;  %s1799_s19 = sld [smem:[#allocation5 + $0x1f]] }
  0xb9   : > { %v673_v44 = vmul.f32 %v672_v37, %v670_v40  ;;  %v688_v46 = vmul.f32 %v687_v43, %v2448_v4  ;;  %v690_v47 = vstv %s1794_s15  ;;  %s1800_s0 = sld [smem:[#allocation7 + $0x1f]] }
  0xba   : > { %v681_v48 = vmax.f32 %v680_v42, 0.0  ;;  %s2569_s18 = sld [smem:[#allocation8 + $0x1f]]  ;;  %v694_v53 = vstv %s2561_s17 }
  0xbb   : > { %v674_v49 = vadd.f32 %v673_v44, %v663_v41  ;;  %v691_v50 = vadd.f32 %v690_v47, %v688_v46  ;;  %v698_v51 = vstv %s1796_s16  ;;  %s1802_s29 = sld [smem:[#allocation5 + $0x20]] }
  0xbc   : > { %v684_v52 = vmul.f32 %v683_v45, %v681_v48  ;;  %v699_v54 = vmul.f32 %v698_v51, %v2448_v4  ;;  %v701_v55 = vstv %s1797_s21  ;;  %s1803_s8 = sld [smem:[#allocation7 + $0x20]] }
  0xbd   : > { %v692_v56 = vmax.f32 %v691_v50, 0.0  ;;  %s2573_s13 = sld [smem:[#allocation8 + $0x20]]  ;;  %v705_v61 = vstv %s2565_s22 }
  0xbe   : > { %v685_v57 = vadd.f32 %v684_v52, %v674_v49  ;;  %v702_v58 = vadd.f32 %v701_v55, %v699_v54  ;;  %v709_v59 = vstv %s1799_s19  ;;  %s1805_s14 = sld [smem:[#allocation5 + $0x21]] }
  0xbf   : > { %v695_v60 = vmul.f32 %v694_v53, %v692_v56  ;;  %v710_v62 = vmul.f32 %v709_v59, %v2448_v4  ;;  %v712_v63 = vstv %s1800_s0  ;;  %s1806_s23 = sld [smem:[#allocation7 + $0x21]] }
  0xc0   : > { %v703_v0 = vmax.f32 %v702_v58, 0.0  ;;  %s2577_s15 = sld [smem:[#allocation8 + $0x21]]  ;;  %v716_v6 = vstv %s2569_s18 }
  0xc1   : > { %v696_v1 = vadd.f32 %v695_v60, %v685_v57  ;;  %v713_v2 = vadd.f32 %v712_v63, %v710_v62  ;;  %v720_v3 = vstv %s1802_s29  ;;  %s1808_s17 = sld [smem:[#allocation5 + $0x22]] }
  0xc2   : > { %v706_v5 = vmul.f32 %v705_v61, %v703_v0  ;;  %v721_v7 = vmul.f32 %v720_v3, %v2448_v4  ;;  %v723_v8 = vstv %s1803_s8  ;;  %s1809_s16 = sld [smem:[#allocation7 + $0x22]] }
  0xc3   : > { %v714_v9 = vmax.f32 %v713_v2, 0.0  ;;  %s2581_s21 = sld [smem:[#allocation8 + $0x22]]  ;;  %v727_v14 = vstv %s2573_s13 }
  0xc4   : > { %v707_v10 = vadd.f32 %v706_v5, %v696_v1  ;;  %v724_v11 = vadd.f32 %v723_v8, %v721_v7  ;;  %v731_v12 = vstv %s1805_s14  ;;  %s1811_s22 = sld [smem:[#allocation5 + $0x23]] }
  0xc5   : > { %v717_v13 = vmul.f32 %v716_v6, %v714_v9  ;;  %v732_v15 = vmul.f32 %v731_v12, %v2448_v4  ;;  %v734_v16 = vstv %s1806_s23  ;;  %s1812_s19 = sld [smem:[#allocation7 + $0x23]] }
  0xc6   : > { %v725_v17 = vmax.f32 %v724_v11, 0.0  ;;  %s2585_s0 = sld [smem:[#allocation8 + $0x23]]  ;;  %v738_v22 = vstv %s2577_s15 }
  0xc7   : > { %v718_v18 = vadd.f32 %v717_v13, %v707_v10  ;;  %v735_v19 = vadd.f32 %v734_v16, %v732_v15  ;;  %v742_v20 = vstv %s1808_s17  ;;  %s1814_s18 = sld [smem:[#allocation5 + $0x24]] }
  0xc8   : > { %v728_v21 = vmul.f32 %v727_v14, %v725_v17  ;;  %v743_v23 = vmul.f32 %v742_v20, %v2448_v4  ;;  %v745_v24 = vstv %s1809_s16  ;;  %s1815_s29 = sld [smem:[#allocation7 + $0x24]] }
  0xc9   : > { %v736_v25 = vmax.f32 %v735_v19, 0.0  ;;  %s2589_s8 = sld [smem:[#allocation8 + $0x24]]  ;;  %v749_v30 = vstv %s2581_s21 }
  0xca   : > { %v729_v26 = vadd.f32 %v728_v21, %v718_v18  ;;  %v746_v27 = vadd.f32 %v745_v24, %v743_v23  ;;  %v753_v28 = vstv %s1811_s22  ;;  %s1817_s13 = sld [smem:[#allocation5 + $0x25]] }
  0xcb   : > { %v739_v29 = vmul.f32 %v738_v22, %v736_v25  ;;  %v754_v31 = vmul.f32 %v753_v28, %v2448_v4  ;;  %v756_v32 = vstv %s1812_s19  ;;  %s1818_s14 = sld [smem:[#allocation7 + $0x25]] }
  0xcc   : > { %v747_v33 = vmax.f32 %v746_v27, 0.0  ;;  %s2593_s23 = sld [smem:[#allocation8 + $0x25]]  ;;  %v760_v38 = vstv %s2585_s0 }
  0xcd   : > { %v740_v34 = vadd.f32 %v739_v29, %v729_v26  ;;  %v757_v35 = vadd.f32 %v756_v32, %v754_v31  ;;  %v764_v36 = vstv %s1814_s18  ;;  %s1820_s15 = sld [smem:[#allocation5 + $0x26]] }
  0xce   : > { %v750_v37 = vmul.f32 %v749_v30, %v747_v33  ;;  %v765_v39 = vmul.f32 %v764_v36, %v2448_v4  ;;  %v767_v40 = vstv %s1815_s29  ;;  %s1821_s17 = sld [smem:[#allocation7 + $0x26]] }
  0xcf   : > { %v758_v41 = vmax.f32 %v757_v35, 0.0  ;;  %s2597_s16 = sld [smem:[#allocation8 + $0x26]]  ;;  %v771_v46 = vstv %s2589_s8 }
  0xd0   : > { %v751_v42 = vadd.f32 %v750_v37, %v740_v34  ;;  %v768_v43 = vadd.f32 %v767_v40, %v765_v39  ;;  %v775_v44 = vstv %s1817_s13  ;;  %s1823_s21 = sld [smem:[#allocation5 + $0x27]] }
  0xd1   : > { %v761_v45 = vmul.f32 %v760_v38, %v758_v41  ;;  %v776_v47 = vmul.f32 %v775_v44, %v2448_v4  ;;  %v778_v48 = vstv %s1818_s14  ;;  %s1824_s22 = sld [smem:[#allocation7 + $0x27]] }
  0xd2   : > { %v769_v49 = vmax.f32 %v768_v43, 0.0  ;;  %s2601_s19 = sld [smem:[#allocation8 + $0x27]]  ;;  %v782_v54 = vstv %s2593_s23 }
  0xd3   : > { %v762_v50 = vadd.f32 %v761_v45, %v751_v42  ;;  %v779_v51 = vadd.f32 %v778_v48, %v776_v47  ;;  %v786_v52 = vstv %s1820_s15  ;;  %s1826_s0 = sld [smem:[#allocation5 + $0x28]] }
  0xd4   : > { %v772_v53 = vmul.f32 %v771_v46, %v769_v49  ;;  %v787_v55 = vmul.f32 %v786_v52, %v2448_v4  ;;  %v789_v56 = vstv %s1821_s17  ;;  %s1827_s18 = sld [smem:[#allocation7 + $0x28]] }
  0xd5   : > { %v780_v57 = vmax.f32 %v779_v51, 0.0  ;;  %s2605_s29 = sld [smem:[#allocation8 + $0x28]]  ;;  %v793_v62 = vstv %s2597_s16 }
  0xd6   : > { %v773_v58 = vadd.f32 %v772_v53, %v762_v50  ;;  %v790_v59 = vadd.f32 %v789_v56, %v787_v55  ;;  %v797_v60 = vstv %s1823_s21  ;;  %s1829_s8 = sld [smem:[#allocation5 + $0x29]] }
  0xd7   : > { %v783_v61 = vmul.f32 %v782_v54, %v780_v57  ;;  %v798_v63 = vmul.f32 %v797_v60, %v2448_v4  ;;  %v800_v0 = vstv %s1824_s22  ;;  %s1830_s13 = sld [smem:[#allocation7 + $0x29]] }
  0xd8   : > { %v791_v1 = vmax.f32 %v790_v59, 0.0  ;;  %s2609_s14 = sld [smem:[#allocation8 + $0x29]]  ;;  %v804_v7 = vstv %s2601_s19 }
  0xd9   : > { %v784_v2 = vadd.f32 %v783_v61, %v773_v58  ;;  %v801_v3 = vadd.f32 %v800_v0, %v798_v63  ;;  %v808_v5 = vstv %s1826_s0  ;;  %s1832_s23 = sld [smem:[#allocation5 + $0x2a]] }
  0xda   : > { %v794_v6 = vmul.f32 %v793_v62, %v791_v1  ;;  %v809_v8 = vmul.f32 %v808_v5, %v2448_v4  ;;  %v811_v9 = vstv %s1827_s18  ;;  %s1833_s15 = sld [smem:[#allocation7 + $0x2a]] }
  0xdb   : > { %v802_v10 = vmax.f32 %v801_v3, 0.0  ;;  %s2613_s17 = sld [smem:[#allocation8 + $0x2a]]  ;;  %v815_v15 = vstv %s2605_s29 }
  0xdc   : > { %v795_v11 = vadd.f32 %v794_v6, %v784_v2  ;;  %v812_v12 = vadd.f32 %v811_v9, %v809_v8  ;;  %v819_v13 = vstv %s1829_s8  ;;  %s1835_s16 = sld [smem:[#allocation5 + $0x2b]] }
  0xdd   : > { %v805_v14 = vmul.f32 %v804_v7, %v802_v10  ;;  %v820_v16 = vmul.f32 %v819_v13, %v2448_v4  ;;  %v822_v17 = vstv %s1830_s13  ;;  %s1836_s21 = sld [smem:[#allocation7 + $0x2b]] }
  0xde   : > { %v813_v18 = vmax.f32 %v812_v12, 0.0  ;;  %s2617_s22 = sld [smem:[#allocation8 + $0x2b]]  ;;  %v826_v23 = vstv %s2609_s14 }
  0xdf   : > { %v806_v19 = vadd.f32 %v805_v14, %v795_v11  ;;  %v823_v20 = vadd.f32 %v822_v17, %v820_v16  ;;  %v830_v21 = vstv %s1832_s23  ;;  %s1838_s19 = sld [smem:[#allocation5 + $0x2c]] }
  0xe0   : > { %v816_v22 = vmul.f32 %v815_v15, %v813_v18  ;;  %v831_v24 = vmul.f32 %v830_v21, %v2448_v4  ;;  %v833_v25 = vstv %s1833_s15  ;;  %s1839_s0 = sld [smem:[#allocation7 + $0x2c]] }
  0xe1   : > { %v824_v26 = vmax.f32 %v823_v20, 0.0  ;;  %s2621_s18 = sld [smem:[#allocation8 + $0x2c]]  ;;  %v837_v31 = vstv %s2613_s17 }
  0xe2   : > { %v817_v27 = vadd.f32 %v816_v22, %v806_v19  ;;  %v834_v28 = vadd.f32 %v833_v25, %v831_v24  ;;  %v841_v29 = vstv %s1835_s16  ;;  %s1841_s29 = sld [smem:[#allocation5 + $0x2d]] }
  0xe3   : > { %v827_v30 = vmul.f32 %v826_v23, %v824_v26  ;;  %v842_v32 = vmul.f32 %v841_v29, %v2448_v4  ;;  %v844_v33 = vstv %s1836_s21  ;;  %s1842_s8 = sld [smem:[#allocation7 + $0x2d]] }
  0xe4   : > { %v835_v34 = vmax.f32 %v834_v28, 0.0  ;;  %s2625_s13 = sld [smem:[#allocation8 + $0x2d]]  ;;  %v848_v39 = vstv %s2617_s22 }
  0xe5   : > { %v828_v35 = vadd.f32 %v827_v30, %v817_v27  ;;  %v845_v36 = vadd.f32 %v844_v33, %v842_v32  ;;  %v852_v37 = vstv %s1838_s19  ;;  %s1844_s14 = sld [smem:[#allocation5 + $0x2e]] }
  0xe6   : > { %v838_v38 = vmul.f32 %v837_v31, %v835_v34  ;;  %v853_v40 = vmul.f32 %v852_v37, %v2448_v4  ;;  %v855_v41 = vstv %s1839_s0  ;;  %s1845_s23 = sld [smem:[#allocation7 + $0x2e]] }
  0xe7   : > { %v846_v42 = vmax.f32 %v845_v36, 0.0  ;;  %s2629_s15 = sld [smem:[#allocation8 + $0x2e]]  ;;  %v859_v47 = vstv %s2621_s18 }
  0xe8   : > { %v839_v43 = vadd.f32 %v838_v38, %v828_v35  ;;  %v856_v44 = vadd.f32 %v855_v41, %v853_v40  ;;  %v863_v45 = vstv %s1841_s29  ;;  %s1847_s17 = sld [smem:[#allocation5 + $0x2f]] }
  0xe9   : > { %v849_v46 = vmul.f32 %v848_v39, %v846_v42  ;;  %v864_v48 = vmul.f32 %v863_v45, %v2448_v4  ;;  %v866_v49 = vstv %s1842_s8  ;;  %s1848_s16 = sld [smem:[#allocation7 + $0x2f]] }
  0xea   : > { %v857_v50 = vmax.f32 %v856_v44, 0.0  ;;  %s2633_s21 = sld [smem:[#allocation8 + $0x2f]]  ;;  %v870_v55 = vstv %s2625_s13 }
  0xeb   : > { %v850_v51 = vadd.f32 %v849_v46, %v839_v43  ;;  %v867_v52 = vadd.f32 %v866_v49, %v864_v48  ;;  %v874_v53 = vstv %s1844_s14  ;;  %s1850_s22 = sld [smem:[#allocation5 + $0x30]] }
  0xec   : > { %v860_v54 = vmul.f32 %v859_v47, %v857_v50  ;;  %v875_v56 = vmul.f32 %v874_v53, %v2448_v4  ;;  %v877_v57 = vstv %s1845_s23  ;;  %s1851_s19 = sld [smem:[#allocation7 + $0x30]] }
  0xed   : > { %v868_v58 = vmax.f32 %v867_v52, 0.0  ;;  %s2637_s0 = sld [smem:[#allocation8 + $0x30]]  ;;  %v881_v63 = vstv %s2629_s15 }
  0xee   : > { %v861_v59 = vadd.f32 %v860_v54, %v850_v51  ;;  %v878_v60 = vadd.f32 %v877_v57, %v875_v56  ;;  %v885_v61 = vstv %s1847_s17  ;;  %s1853_s18 = sld [smem:[#allocation5 + $0x31]] }
  0xef   : > { %v871_v62 = vmul.f32 %v870_v55, %v868_v58  ;;  %v886_v0 = vmul.f32 %v885_v61, %v2448_v4  ;;  %v888_v1 = vstv %s1848_s16  ;;  %s1854_s29 = sld [smem:[#allocation7 + $0x31]] }
  0xf0   : > { %v879_v2 = vmax.f32 %v878_v60, 0.0  ;;  %s2641_s8 = sld [smem:[#allocation8 + $0x31]]  ;;  %v892_v8 = vstv %s2633_s21 }
  0xf1   : > { %v872_v3 = vadd.f32 %v871_v62, %v861_v59  ;;  %v889_v5 = vadd.f32 %v888_v1, %v886_v0  ;;  %v896_v6 = vstv %s1850_s22  ;;  %s1856_s13 = sld [smem:[#allocation5 + $0x32]] }
  0xf2   : > { %v882_v7 = vmul.f32 %v881_v63, %v879_v2  ;;  %v897_v9 = vmul.f32 %v896_v6, %v2448_v4  ;;  %v899_v10 = vstv %s1851_s19  ;;  %s1857_s14 = sld [smem:[#allocation7 + $0x32]] }
  0xf3   : > { %v890_v11 = vmax.f32 %v889_v5, 0.0  ;;  %s2645_s23 = sld [smem:[#allocation8 + $0x32]]  ;;  %v903_v16 = vstv %s2637_s0 }
  0xf4   : > { %v883_v12 = vadd.f32 %v882_v7, %v872_v3  ;;  %v900_v13 = vadd.f32 %v899_v10, %v897_v9  ;;  %v907_v14 = vstv %s1853_s18  ;;  %s1859_s15 = sld [smem:[#allocation5 + $0x33]] }
  0xf5   : > { %v893_v15 = vmul.f32 %v892_v8, %v890_v11  ;;  %v908_v17 = vmul.f32 %v907_v14, %v2448_v4  ;;  %v910_v18 = vstv %s1854_s29  ;;  %s1860_s17 = sld [smem:[#allocation7 + $0x33]] }
  0xf6   : > { %v901_v19 = vmax.f32 %v900_v13, 0.0  ;;  %s2649_s16 = sld [smem:[#allocation8 + $0x33]]  ;;  %v914_v24 = vstv %s2641_s8 }
  0xf7   : > { %v894_v20 = vadd.f32 %v893_v15, %v883_v12  ;;  %v911_v21 = vadd.f32 %v910_v18, %v908_v17  ;;  %v918_v22 = vstv %s1856_s13  ;;  %s1862_s21 = sld [smem:[#allocation5 + $0x34]] }
  0xf8   : > { %v904_v23 = vmul.f32 %v903_v16, %v901_v19  ;;  %v919_v25 = vmul.f32 %v918_v22, %v2448_v4  ;;  %v921_v26 = vstv %s1857_s14  ;;  %s1863_s22 = sld [smem:[#allocation7 + $0x34]] }
  0xf9   : > { %v912_v27 = vmax.f32 %v911_v21, 0.0  ;;  %s2653_s19 = sld [smem:[#allocation8 + $0x34]]  ;;  %v925_v32 = vstv %s2645_s23 }
  0xfa   : > { %v905_v28 = vadd.f32 %v904_v23, %v894_v20  ;;  %v922_v29 = vadd.f32 %v921_v26, %v919_v25  ;;  %v929_v30 = vstv %s1859_s15  ;;  %s1865_s0 = sld [smem:[#allocation5 + $0x35]] }
  0xfb   : > { %v915_v31 = vmul.f32 %v914_v24, %v912_v27  ;;  %v930_v33 = vmul.f32 %v929_v30, %v2448_v4  ;;  %v932_v34 = vstv %s1860_s17  ;;  %s1866_s18 = sld [smem:[#allocation7 + $0x35]] }
  0xfc   : > { %v923_v35 = vmax.f32 %v922_v29, 0.0  ;;  %s2657_s29 = sld [smem:[#allocation8 + $0x35]]  ;;  %v936_v40 = vstv %s2649_s16 }
  0xfd   : > { %v916_v36 = vadd.f32 %v915_v31, %v905_v28  ;;  %v933_v37 = vadd.f32 %v932_v34, %v930_v33  ;;  %v940_v38 = vstv %s1862_s21  ;;  %s1868_s8 = sld [smem:[#allocation5 + $0x36]] }
  0xfe   : > { %v926_v39 = vmul.f32 %v925_v32, %v923_v35  ;;  %v941_v41 = vmul.f32 %v940_v38, %v2448_v4  ;;  %v943_v42 = vstv %s1863_s22  ;;  %s1869_s13 = sld [smem:[#allocation7 + $0x36]] }
  0xff   : > { %v934_v43 = vmax.f32 %v933_v37, 0.0  ;;  %s2661_s14 = sld [smem:[#allocation8 + $0x36]]  ;;  %v947_v48 = vstv %s2653_s19 }
 0x100   : > { %v927_v44 = vadd.f32 %v926_v39, %v916_v36  ;;  %v944_v45 = vadd.f32 %v943_v42, %v941_v41  ;;  %v951_v46 = vstv %s1865_s0  ;;  %s1871_s23 = sld [smem:[#allocation5 + $0x37]] }
 0x101   : > { %v937_v47 = vmul.f32 %v936_v40, %v934_v43  ;;  %v952_v49 = vmul.f32 %v951_v46, %v2448_v4  ;;  %v954_v50 = vstv %s1866_s18  ;;  %s1872_s15 = sld [smem:[#allocation7 + $0x37]] }
 0x102   : > { %v945_v51 = vmax.f32 %v944_v45, 0.0  ;;  %s2665_s17 = sld [smem:[#allocation8 + $0x37]]  ;;  %v958_v56 = vstv %s2657_s29 }
 0x103   : > { %v938_v52 = vadd.f32 %v937_v47, %v927_v44  ;;  %v955_v53 = vadd.f32 %v954_v50, %v952_v49  ;;  %v962_v54 = vstv %s1868_s8  ;;  %s1874_s16 = sld [smem:[#allocation5 + $0x38]] }
 0x104   : > { %v948_v55 = vmul.f32 %v947_v48, %v945_v51  ;;  %v963_v57 = vmul.f32 %v962_v54, %v2448_v4  ;;  %v965_v58 = vstv %s1869_s13  ;;  %s1875_s21 = sld [smem:[#allocation7 + $0x38]] }
 0x105   : > { %v956_v59 = vmax.f32 %v955_v53, 0.0  ;;  %s2669_s22 = sld [smem:[#allocation8 + $0x38]]  ;;  %v969_v0 = vstv %s2661_s14 }
 0x106   : > { %v949_v60 = vadd.f32 %v948_v55, %v938_v52  ;;  %v966_v61 = vadd.f32 %v965_v58, %v963_v57  ;;  %v973_v62 = vstv %s1871_s23  ;;  %s1877_s19 = sld [smem:[#allocation5 + $0x39]] }
 0x107   : > { %v959_v63 = vmul.f32 %v958_v56, %v956_v59  ;;  %v974_v1 = vmul.f32 %v973_v62, %v2448_v4  ;;  %v976_v2 = vstv %s1872_s15  ;;  %s1878_s0 = sld [smem:[#allocation7 + $0x39]] }
 0x108   : > { %v967_v3 = vmax.f32 %v966_v61, 0.0  ;;  %s2673_s18 = sld [smem:[#allocation8 + $0x39]]  ;;  %v980_v9 = vstv %s2665_s17 }
 0x109   : > { %v960_v5 = vadd.f32 %v959_v63, %v949_v60  ;;  %v977_v6 = vadd.f32 %v976_v2, %v974_v1  ;;  %v984_v7 = vstv %s1874_s16  ;;  %s1880_s29 = sld [smem:[#allocation5 + $0x3a]] }
 0x10a   : > { %v970_v8 = vmul.f32 %v969_v0, %v967_v3  ;;  %v985_v10 = vmul.f32 %v984_v7, %v2448_v4  ;;  %v987_v11 = vstv %s1875_s21  ;;  %s1881_s8 = sld [smem:[#allocation7 + $0x3a]] }
 0x10b   : > { %v978_v12 = vmax.f32 %v977_v6, 0.0  ;;  %s2677_s13 = sld [smem:[#allocation8 + $0x3a]]  ;;  %v991_v17 = vstv %s2669_s22 }
 0x10c   : > { %v971_v13 = vadd.f32 %v970_v8, %v960_v5  ;;  %v988_v14 = vadd.f32 %v987_v11, %v985_v10  ;;  %v995_v15 = vstv %s1877_s19  ;;  %s1883_s14 = sld [smem:[#allocation5 + $0x3b]] }
 0x10d   : > { %v981_v16 = vmul.f32 %v980_v9, %v978_v12  ;;  %v996_v18 = vmul.f32 %v995_v15, %v2448_v4  ;;  %v998_v19 = vstv %s1878_s0  ;;  %s1884_s23 = sld [smem:[#allocation7 + $0x3b]] }
 0x10e   : > { %v989_v20 = vmax.f32 %v988_v14, 0.0  ;;  %s2681_s15 = sld [smem:[#allocation8 + $0x3b]]  ;;  %v1002_v25 = vstv %s2673_s18 }
 0x10f   : > { %v982_v21 = vadd.f32 %v981_v16, %v971_v13  ;;  %v999_v22 = vadd.f32 %v998_v19, %v996_v18  ;;  %v1006_v23 = vstv %s1880_s29  ;;  %s1886_s17 = sld [smem:[#allocation5 + $0x3c]] }
 0x110   : > { %v992_v24 = vmul.f32 %v991_v17, %v989_v20  ;;  %v1007_v26 = vmul.f32 %v1006_v23, %v2448_v4  ;;  %v1009_v27 = vstv %s1881_s8  ;;  %s1887_s16 = sld [smem:[#allocation7 + $0x3c]] }
 0x111   : > { %v1000_v28 = vmax.f32 %v999_v22, 0.0  ;;  %s2685_s21 = sld [smem:[#allocation8 + $0x3c]]  ;;  %v1013_v33 = vstv %s2677_s13 }
 0x112   : > { %v993_v29 = vadd.f32 %v992_v24, %v982_v21  ;;  %v1010_v30 = vadd.f32 %v1009_v27, %v1007_v26  ;;  %v1017_v31 = vstv %s1883_s14  ;;  %s1889_s22 = sld [smem:[#allocation5 + $0x3d]] }
 0x113   : > { %v1003_v32 = vmul.f32 %v1002_v25, %v1000_v28  ;;  %v1018_v34 = vmul.f32 %v1017_v31, %v2448_v4  ;;  %v1020_v35 = vstv %s1884_s23  ;;  %s1890_s19 = sld [smem:[#allocation7 + $0x3d]] }
 0x114   : > { %v1011_v36 = vmax.f32 %v1010_v30, 0.0  ;;  %s2689_s0 = sld [smem:[#allocation8 + $0x3d]]  ;;  %v1024_v41 = vstv %s2681_s15 }
 0x115   : > { %v1004_v37 = vadd.f32 %v1003_v32, %v993_v29  ;;  %v1021_v38 = vadd.f32 %v1020_v35, %v1018_v34  ;;  %v1028_v39 = vstv %s1886_s17  ;;  %s1892_s18 = sld [smem:[#allocation5 + $0x3e]] }
 0x116   : > { %v1014_v40 = vmul.f32 %v1013_v33, %v1011_v36  ;;  %v1029_v42 = vmul.f32 %v1028_v39, %v2448_v4  ;;  %v1031_v43 = vstv %s1887_s16  ;;  %s1893_s29 = sld [smem:[#allocation7 + $0x3e]] }
 0x117   : > { %v1022_v44 = vmax.f32 %v1021_v38, 0.0  ;;  %s2693_s8 = sld [smem:[#allocation8 + $0x3e]]  ;;  %v1035_v49 = vstv %s2685_s21 }
 0x118   : > { %v1015_v45 = vadd.f32 %v1014_v40, %v1004_v37  ;;  %v1032_v46 = vadd.f32 %v1031_v43, %v1029_v42  ;;  %v1039_v47 = vstv %s1889_s22  ;;  %s1895_s13 = sld [smem:[#allocation5 + $0x3f]] }
 0x119   : > { %v1025_v48 = vmul.f32 %v1024_v41, %v1022_v44  ;;  %v1040_v50 = vmul.f32 %v1039_v47, %v2448_v4  ;;  %v1042_v51 = vstv %s1890_s19  ;;  %s1896_s14 = sld [smem:[#allocation7 + $0x3f]] }
 0x11a   : > { %v1033_v52 = vmax.f32 %v1032_v46, 0.0  ;;  %s2697_s23 = sld [smem:[#allocation8 + $0x3f]]  ;;  %v1046_v57 = vstv %s2689_s0 }
 0x11b   : > { %v1026_v53 = vadd.f32 %v1025_v48, %v1015_v45  ;;  %v1043_v54 = vadd.f32 %v1042_v51, %v1040_v50  ;;  %v1050_v55 = vstv %s1892_s18  ;;  %s1898_s15 = sld [smem:[#allocation5 + $0x40]] }
 0x11c   : > { %v1036_v56 = vmul.f32 %v1035_v49, %v1033_v52  ;;  %v1051_v58 = vmul.f32 %v1050_v55, %v2448_v4  ;;  %v1053_v59 = vstv %s1893_s29  ;;  %s1899_s17 = sld [smem:[#allocation7 + $0x40]] }
 0x11d   : > { %v1044_v60 = vmax.f32 %v1043_v54, 0.0  ;;  %s2701_s16 = sld [smem:[#allocation8 + $0x40]]  ;;  %v1057_v1 = vstv %s2693_s8 }
 0x11e   : > { %v1037_v61 = vadd.f32 %v1036_v56, %v1026_v53  ;;  %v1054_v62 = vadd.f32 %v1053_v59, %v1051_v58  ;;  %v1061_v63 = vstv %s1895_s13  ;;  %s1901_s21 = sld [smem:[#allocation5 + $0x41]] }
 0x11f   : > { %v1047_v0 = vmul.f32 %v1046_v57, %v1044_v60  ;;  %v1062_v2 = vmul.f32 %v1061_v63, %v2448_v4  ;;  %v1064_v3 = vstv %s1896_s14  ;;  %s1902_s22 = sld [smem:[#allocation7 + $0x41]] }
 0x120   : > { %v1055_v5 = vmax.f32 %v1054_v62, 0.0  ;;  %s2705_s19 = sld [smem:[#allocation8 + $0x41]]  ;;  %v1068_v10 = vstv %s2697_s23 }
 0x121   : > { %v1048_v6 = vadd.f32 %v1047_v0, %v1037_v61  ;;  %v1065_v7 = vadd.f32 %v1064_v3, %v1062_v2  ;;  %v1072_v8 = vstv %s1898_s15  ;;  %s1904_s0 = sld [smem:[#allocation5 + $0x42]] }
 0x122   : > { %v1058_v9 = vmul.f32 %v1057_v1, %v1055_v5  ;;  %v1073_v11 = vmul.f32 %v1072_v8, %v2448_v4  ;;  %v1075_v12 = vstv %s1899_s17  ;;  %s1905_s18 = sld [smem:[#allocation7 + $0x42]] }
 0x123   : > { %v1066_v13 = vmax.f32 %v1065_v7, 0.0  ;;  %s2709_s29 = sld [smem:[#allocation8 + $0x42]]  ;;  %v1079_v18 = vstv %s2701_s16 }
 0x124   : > { %v1059_v14 = vadd.f32 %v1058_v9, %v1048_v6  ;;  %v1076_v15 = vadd.f32 %v1075_v12, %v1073_v11  ;;  %v1083_v16 = vstv %s1901_s21  ;;  %s1907_s8 = sld [smem:[#allocation5 + $0x43]] }
 0x125   : > { %v1069_v17 = vmul.f32 %v1068_v10, %v1066_v13  ;;  %v1084_v19 = vmul.f32 %v1083_v16, %v2448_v4  ;;  %v1086_v20 = vstv %s1902_s22  ;;  %s1908_s13 = sld [smem:[#allocation7 + $0x43]] }
 0x126   : > { %v1077_v21 = vmax.f32 %v1076_v15, 0.0  ;;  %s2713_s14 = sld [smem:[#allocation8 + $0x43]]  ;;  %v1090_v26 = vstv %s2705_s19 }
 0x127   : > { %v1070_v22 = vadd.f32 %v1069_v17, %v1059_v14  ;;  %v1087_v23 = vadd.f32 %v1086_v20, %v1084_v19  ;;  %v1094_v24 = vstv %s1904_s0  ;;  %s1910_s23 = sld [smem:[#allocation5 + $0x44]] }
 0x128   : > { %v1080_v25 = vmul.f32 %v1079_v18, %v1077_v21  ;;  %v1095_v27 = vmul.f32 %v1094_v24, %v2448_v4  ;;  %v1097_v28 = vstv %s1905_s18  ;;  %s1911_s15 = sld [smem:[#allocation7 + $0x44]] }
 0x129   : > { %v1088_v29 = vmax.f32 %v1087_v23, 0.0  ;;  %s2717_s17 = sld [smem:[#allocation8 + $0x44]]  ;;  %v1101_v34 = vstv %s2709_s29 }
 0x12a   : > { %v1081_v30 = vadd.f32 %v1080_v25, %v1070_v22  ;;  %v1098_v31 = vadd.f32 %v1097_v28, %v1095_v27  ;;  %v1105_v32 = vstv %s1907_s8  ;;  %s1913_s16 = sld [smem:[#allocation5 + $0x45]] }
 0x12b   : > { %v1091_v33 = vmul.f32 %v1090_v26, %v1088_v29  ;;  %v1106_v35 = vmul.f32 %v1105_v32, %v2448_v4  ;;  %v1108_v36 = vstv %s1908_s13  ;;  %s1914_s21 = sld [smem:[#allocation7 + $0x45]] }
 0x12c   : > { %v1099_v37 = vmax.f32 %v1098_v31, 0.0  ;;  %s2721_s22 = sld [smem:[#allocation8 + $0x45]]  ;;  %v1112_v42 = vstv %s2713_s14 }
 0x12d   : > { %v1092_v38 = vadd.f32 %v1091_v33, %v1081_v30  ;;  %v1109_v39 = vadd.f32 %v1108_v36, %v1106_v35  ;;  %v1116_v40 = vstv %s1910_s23  ;;  %s1916_s19 = sld [smem:[#allocation5 + $0x46]] }
 0x12e   : > { %v1102_v41 = vmul.f32 %v1101_v34, %v1099_v37  ;;  %v1117_v43 = vmul.f32 %v1116_v40, %v2448_v4  ;;  %v1119_v44 = vstv %s1911_s15  ;;  %s1917_s0 = sld [smem:[#allocation7 + $0x46]] }
 0x12f   : > { %v1110_v45 = vmax.f32 %v1109_v39, 0.0  ;;  %s2725_s18 = sld [smem:[#allocation8 + $0x46]]  ;;  %v1123_v50 = vstv %s2717_s17 }
 0x130   : > { %v1103_v46 = vadd.f32 %v1102_v41, %v1092_v38  ;;  %v1120_v47 = vadd.f32 %v1119_v44, %v1117_v43  ;;  %v1127_v48 = vstv %s1913_s16  ;;  %s1919_s29 = sld [smem:[#allocation5 + $0x47]] }
 0x131   : > { %v1113_v49 = vmul.f32 %v1112_v42, %v1110_v45  ;;  %v1128_v51 = vmul.f32 %v1127_v48, %v2448_v4  ;;  %v1130_v52 = vstv %s1914_s21  ;;  %s1920_s8 = sld [smem:[#allocation7 + $0x47]] }
 0x132   : > { %v1121_v53 = vmax.f32 %v1120_v47, 0.0  ;;  %s2729_s13 = sld [smem:[#allocation8 + $0x47]]  ;;  %v1134_v58 = vstv %s2721_s22 }
 0x133   : > { %v1114_v54 = vadd.f32 %v1113_v49, %v1103_v46  ;;  %v1131_v55 = vadd.f32 %v1130_v52, %v1128_v51  ;;  %v1138_v56 = vstv %s1916_s19  ;;  %s1922_s14 = sld [smem:[#allocation5 + $0x48]] }
 0x134   : > { %v1124_v57 = vmul.f32 %v1123_v50, %v1121_v53  ;;  %v1139_v59 = vmul.f32 %v1138_v56, %v2448_v4  ;;  %v1141_v60 = vstv %s1917_s0  ;;  %s1923_s23 = sld [smem:[#allocation7 + $0x48]] }
 0x135   : > { %v1132_v61 = vmax.f32 %v1131_v55, 0.0  ;;  %s2733_s15 = sld [smem:[#allocation8 + $0x48]]  ;;  %v1145_v2 = vstv %s2725_s18 }
 0x136   : > { %v1125_v62 = vadd.f32 %v1124_v57, %v1114_v54  ;;  %v1142_v63 = vadd.f32 %v1141_v60, %v1139_v59  ;;  %v1149_v0 = vstv %s1919_s29  ;;  %s1925_s17 = sld [smem:[#allocation5 + $0x49]] }
 0x137   : > { %v1135_v1 = vmul.f32 %v1134_v58, %v1132_v61  ;;  %v1150_v3 = vmul.f32 %v1149_v0, %v2448_v4  ;;  %v1152_v5 = vstv %s1920_s8  ;;  %s1926_s16 = sld [smem:[#allocation7 + $0x49]] }
 0x138   : > { %v1143_v6 = vmax.f32 %v1142_v63, 0.0  ;;  %s2737_s21 = sld [smem:[#allocation8 + $0x49]]  ;;  %v1156_v11 = vstv %s2729_s13 }
 0x139   : > { %v1136_v7 = vadd.f32 %v1135_v1, %v1125_v62  ;;  %v1153_v8 = vadd.f32 %v1152_v5, %v1150_v3  ;;  %v1160_v9 = vstv %s1922_s14  ;;  %s1928_s22 = sld [smem:[#allocation5 + $0x4a]] }
 0x13a   : > { %v1146_v10 = vmul.f32 %v1145_v2, %v1143_v6  ;;  %v1161_v12 = vmul.f32 %v1160_v9, %v2448_v4  ;;  %v1163_v13 = vstv %s1923_s23  ;;  %s1929_s19 = sld [smem:[#allocation7 + $0x4a]] }
 0x13b   : > { %v1154_v14 = vmax.f32 %v1153_v8, 0.0  ;;  %s2741_s0 = sld [smem:[#allocation8 + $0x4a]]  ;;  %v1167_v19 = vstv %s2733_s15 }
 0x13c   : > { %v1147_v15 = vadd.f32 %v1146_v10, %v1136_v7  ;;  %v1164_v16 = vadd.f32 %v1163_v13, %v1161_v12  ;;  %v1171_v17 = vstv %s1925_s17  ;;  %s1931_s18 = sld [smem:[#allocation5 + $0x4b]] }
 0x13d   : > { %v1157_v18 = vmul.f32 %v1156_v11, %v1154_v14  ;;  %v1172_v20 = vmul.f32 %v1171_v17, %v2448_v4  ;;  %v1174_v21 = vstv %s1926_s16  ;;  %s1932_s29 = sld [smem:[#allocation7 + $0x4b]] }
 0x13e   : > { %v1165_v22 = vmax.f32 %v1164_v16, 0.0  ;;  %s2745_s8 = sld [smem:[#allocation8 + $0x4b]]  ;;  %v1178_v27 = vstv %s2737_s21 }
 0x13f   : > { %v1158_v23 = vadd.f32 %v1157_v18, %v1147_v15  ;;  %v1175_v24 = vadd.f32 %v1174_v21, %v1172_v20  ;;  %v1182_v25 = vstv %s1928_s22  ;;  %s1934_s13 = sld [smem:[#allocation5 + $0x4c]] }
 0x140   : > { %v1168_v26 = vmul.f32 %v1167_v19, %v1165_v22  ;;  %v1183_v28 = vmul.f32 %v1182_v25, %v2448_v4  ;;  %v1185_v29 = vstv %s1929_s19  ;;  %s1935_s14 = sld [smem:[#allocation7 + $0x4c]] }
 0x141   : > { %v1176_v30 = vmax.f32 %v1175_v24, 0.0  ;;  %s2749_s23 = sld [smem:[#allocation8 + $0x4c]]  ;;  %v1189_v35 = vstv %s2741_s0 }
 0x142   : > { %v1169_v31 = vadd.f32 %v1168_v26, %v1158_v23  ;;  %v1186_v32 = vadd.f32 %v1185_v29, %v1183_v28  ;;  %v1193_v33 = vstv %s1931_s18  ;;  %s1937_s15 = sld [smem:[#allocation5 + $0x4d]] }
 0x143   : > { %v1179_v34 = vmul.f32 %v1178_v27, %v1176_v30  ;;  %v1194_v36 = vmul.f32 %v1193_v33, %v2448_v4  ;;  %v1196_v37 = vstv %s1932_s29  ;;  %s1938_s17 = sld [smem:[#allocation7 + $0x4d]] }
 0x144   : > { %v1187_v38 = vmax.f32 %v1186_v32, 0.0  ;;  %s2753_s16 = sld [smem:[#allocation8 + $0x4d]]  ;;  %v1200_v43 = vstv %s2745_s8 }
 0x145   : > { %v1180_v39 = vadd.f32 %v1179_v34, %v1169_v31  ;;  %v1197_v40 = vadd.f32 %v1196_v37, %v1194_v36  ;;  %v1204_v41 = vstv %s1934_s13  ;;  %s1940_s21 = sld [smem:[#allocation5 + $0x4e]] }
 0x146   : > { %v1190_v42 = vmul.f32 %v1189_v35, %v1187_v38  ;;  %v1205_v44 = vmul.f32 %v1204_v41, %v2448_v4  ;;  %v1207_v45 = vstv %s1935_s14  ;;  %s1941_s22 = sld [smem:[#allocation7 + $0x4e]] }
 0x147   : > { %v1198_v46 = vmax.f32 %v1197_v40, 0.0  ;;  %s2757_s19 = sld [smem:[#allocation8 + $0x4e]]  ;;  %v1211_v51 = vstv %s2749_s23 }
 0x148   : > { %v1191_v47 = vadd.f32 %v1190_v42, %v1180_v39  ;;  %v1208_v48 = vadd.f32 %v1207_v45, %v1205_v44  ;;  %v1215_v49 = vstv %s1937_s15  ;;  %s1943_s0 = sld [smem:[#allocation5 + $0x4f]] }
 0x149   : > { %v1201_v50 = vmul.f32 %v1200_v43, %v1198_v46  ;;  %v1216_v52 = vmul.f32 %v1215_v49, %v2448_v4  ;;  %v1218_v53 = vstv %s1938_s17  ;;  %s1944_s18 = sld [smem:[#allocation7 + $0x4f]] }
 0x14a   : > { %v1209_v54 = vmax.f32 %v1208_v48, 0.0  ;;  %s2761_s29 = sld [smem:[#allocation8 + $0x4f]]  ;;  %v1222_v59 = vstv %s2753_s16 }
 0x14b   : > { %v1202_v55 = vadd.f32 %v1201_v50, %v1191_v47  ;;  %v1219_v56 = vadd.f32 %v1218_v53, %v1216_v52  ;;  %v1226_v57 = vstv %s1940_s21  ;;  %s1946_s8 = sld [smem:[#allocation5 + $0x50]] }
 0x14c   : > { %v1212_v58 = vmul.f32 %v1211_v51, %v1209_v54  ;;  %v1227_v60 = vmul.f32 %v1226_v57, %v2448_v4  ;;  %v1229_v61 = vstv %s1941_s22  ;;  %s1947_s13 = sld [smem:[#allocation7 + $0x50]] }
 0x14d   : > { %v1220_v62 = vmax.f32 %v1219_v56, 0.0  ;;  %s2765_s14 = sld [smem:[#allocation8 + $0x50]]  ;;  %v1233_v3 = vstv %s2757_s19 }
 0x14e   : > { %v1213_v63 = vadd.f32 %v1212_v58, %v1202_v55  ;;  %v1230_v0 = vadd.f32 %v1229_v61, %v1227_v60  ;;  %v1237_v1 = vstv %s1943_s0  ;;  %s1949_s23 = sld [smem:[#allocation5 + $0x51]] }
 0x14f   : > { %v1223_v2 = vmul.f32 %v1222_v59, %v1220_v62  ;;  %v1238_v5 = vmul.f32 %v1237_v1, %v2448_v4  ;;  %v1240_v6 = vstv %s1944_s18  ;;  %s1950_s15 = sld [smem:[#allocation7 + $0x51]] }
 0x150   : > { %v1231_v7 = vmax.f32 %v1230_v0, 0.0  ;;  %s2769_s17 = sld [smem:[#allocation8 + $0x51]]  ;;  %v1244_v12 = vstv %s2761_s29 }
 0x151   : > { %v1224_v8 = vadd.f32 %v1223_v2, %v1213_v63  ;;  %v1241_v9 = vadd.f32 %v1240_v6, %v1238_v5  ;;  %v1248_v10 = vstv %s1946_s8  ;;  %s1952_s16 = sld [smem:[#allocation5 + $0x52]] }
 0x152   : > { %v1234_v11 = vmul.f32 %v1233_v3, %v1231_v7  ;;  %v1249_v13 = vmul.f32 %v1248_v10, %v2448_v4  ;;  %v1251_v14 = vstv %s1947_s13  ;;  %s1953_s21 = sld [smem:[#allocation7 + $0x52]] }
 0x153   : > { %v1242_v15 = vmax.f32 %v1241_v9, 0.0  ;;  %s2773_s22 = sld [smem:[#allocation8 + $0x52]]  ;;  %v1255_v20 = vstv %s2765_s14 }
 0x154   : > { %v1235_v16 = vadd.f32 %v1234_v11, %v1224_v8  ;;  %v1252_v17 = vadd.f32 %v1251_v14, %v1249_v13  ;;  %v1259_v18 = vstv %s1949_s23  ;;  %s1955_s19 = sld [smem:[#allocation5 + $0x53]] }
 0x155   : > { %v1245_v19 = vmul.f32 %v1244_v12, %v1242_v15  ;;  %v1260_v21 = vmul.f32 %v1259_v18, %v2448_v4  ;;  %v1262_v22 = vstv %s1950_s15  ;;  %s1956_s0 = sld [smem:[#allocation7 + $0x53]] }
 0x156   : > { %v1253_v23 = vmax.f32 %v1252_v17, 0.0  ;;  %s2777_s18 = sld [smem:[#allocation8 + $0x53]]  ;;  %v1266_v28 = vstv %s2769_s17 }
 0x157   : > { %v1246_v24 = vadd.f32 %v1245_v19, %v1235_v16  ;;  %v1263_v25 = vadd.f32 %v1262_v22, %v1260_v21  ;;  %v1270_v26 = vstv %s1952_s16  ;;  %s1958_s29 = sld [smem:[#allocation5 + $0x54]] }
 0x158   : > { %v1256_v27 = vmul.f32 %v1255_v20, %v1253_v23  ;;  %v1271_v29 = vmul.f32 %v1270_v26, %v2448_v4  ;;  %v1273_v30 = vstv %s1953_s21  ;;  %s1959_s8 = sld [smem:[#allocation7 + $0x54]] }
 0x159   : > { %v1264_v31 = vmax.f32 %v1263_v25, 0.0  ;;  %s2781_s13 = sld [smem:[#allocation8 + $0x54]]  ;;  %v1277_v36 = vstv %s2773_s22 }
 0x15a   : > { %v1257_v32 = vadd.f32 %v1256_v27, %v1246_v24  ;;  %v1274_v33 = vadd.f32 %v1273_v30, %v1271_v29  ;;  %v1281_v34 = vstv %s1955_s19  ;;  %s1961_s14 = sld [smem:[#allocation5 + $0x55]] }
 0x15b   : > { %v1267_v35 = vmul.f32 %v1266_v28, %v1264_v31  ;;  %v1282_v37 = vmul.f32 %v1281_v34, %v2448_v4  ;;  %v1284_v38 = vstv %s1956_s0  ;;  %s1962_s23 = sld [smem:[#allocation7 + $0x55]] }
 0x15c   : > { %v1275_v39 = vmax.f32 %v1274_v33, 0.0  ;;  %s2785_s15 = sld [smem:[#allocation8 + $0x55]]  ;;  %v1288_v44 = vstv %s2777_s18 }
 0x15d   : > { %v1268_v40 = vadd.f32 %v1267_v35, %v1257_v32  ;;  %v1285_v41 = vadd.f32 %v1284_v38, %v1282_v37  ;;  %v1292_v42 = vstv %s1958_s29  ;;  %s1964_s17 = sld [smem:[#allocation5 + $0x56]] }
 0x15e   : > { %v1278_v43 = vmul.f32 %v1277_v36, %v1275_v39  ;;  %v1293_v45 = vmul.f32 %v1292_v42, %v2448_v4  ;;  %v1295_v46 = vstv %s1959_s8  ;;  %s1965_s16 = sld [smem:[#allocation7 + $0x56]] }
 0x15f   : > { %v1286_v47 = vmax.f32 %v1285_v41, 0.0  ;;  %s2789_s21 = sld [smem:[#allocation8 + $0x56]]  ;;  %v1299_v52 = vstv %s2781_s13 }
 0x160   : > { %v1279_v48 = vadd.f32 %v1278_v43, %v1268_v40  ;;  %v1296_v49 = vadd.f32 %v1295_v46, %v1293_v45  ;;  %v1303_v50 = vstv %s1961_s14  ;;  %s1967_s22 = sld [smem:[#allocation5 + $0x57]] }
 0x161   : > { %v1289_v51 = vmul.f32 %v1288_v44, %v1286_v47  ;;  %v1304_v53 = vmul.f32 %v1303_v50, %v2448_v4  ;;  %v1306_v54 = vstv %s1962_s23  ;;  %s1968_s19 = sld [smem:[#allocation7 + $0x57]] }
 0x162   : > { %v1297_v55 = vmax.f32 %v1296_v49, 0.0  ;;  %s2793_s0 = sld [smem:[#allocation8 + $0x57]]  ;;  %v1310_v60 = vstv %s2785_s15 }
 0x163   : > { %v1290_v56 = vadd.f32 %v1289_v51, %v1279_v48  ;;  %v1307_v57 = vadd.f32 %v1306_v54, %v1304_v53  ;;  %v1314_v58 = vstv %s1964_s17  ;;  %s1970_s18 = sld [smem:[#allocation5 + $0x58]] }
 0x164   : > { %v1300_v59 = vmul.f32 %v1299_v52, %v1297_v55  ;;  %v1315_v61 = vmul.f32 %v1314_v58, %v2448_v4  ;;  %v1317_v62 = vstv %s1965_s16  ;;  %s1971_s29 = sld [smem:[#allocation7 + $0x58]] }
 0x165   : > { %v1308_v63 = vmax.f32 %v1307_v57, 0.0  ;;  %s2797_s8 = sld [smem:[#allocation8 + $0x58]]  ;;  %v1321_v5 = vstv %s2789_s21 }
 0x166   : > { %v1301_v0 = vadd.f32 %v1300_v59, %v1290_v56  ;;  %v1318_v1 = vadd.f32 %v1317_v62, %v1315_v61  ;;  %v1325_v2 = vstv %s1967_s22  ;;  %s1973_s13 = sld [smem:[#allocation5 + $0x59]] }
 0x167   : > { %v1311_v3 = vmul.f32 %v1310_v60, %v1308_v63  ;;  %v1326_v6 = vmul.f32 %v1325_v2, %v2448_v4  ;;  %v1328_v7 = vstv %s1968_s19  ;;  %s1974_s14 = sld [smem:[#allocation7 + $0x59]] }
 0x168   : > { %v1319_v8 = vmax.f32 %v1318_v1, 0.0  ;;  %s2801_s23 = sld [smem:[#allocation8 + $0x59]]  ;;  %v1332_v13 = vstv %s2793_s0 }
 0x169   : > { %v1312_v9 = vadd.f32 %v1311_v3, %v1301_v0  ;;  %v1329_v10 = vadd.f32 %v1328_v7, %v1326_v6  ;;  %v1336_v11 = vstv %s1970_s18  ;;  %s1976_s15 = sld [smem:[#allocation5 + $0x5a]] }
 0x16a   : > { %v1322_v12 = vmul.f32 %v1321_v5, %v1319_v8  ;;  %v1337_v14 = vmul.f32 %v1336_v11, %v2448_v4  ;;  %v1339_v15 = vstv %s1971_s29  ;;  %s1977_s17 = sld [smem:[#allocation7 + $0x5a]] }
 0x16b   : > { %v1330_v16 = vmax.f32 %v1329_v10, 0.0  ;;  %s2805_s16 = sld [smem:[#allocation8 + $0x5a]]  ;;  %v1343_v21 = vstv %s2797_s8 }
 0x16c   : > { %v1323_v17 = vadd.f32 %v1322_v12, %v1312_v9  ;;  %v1340_v18 = vadd.f32 %v1339_v15, %v1337_v14  ;;  %v1347_v19 = vstv %s1973_s13  ;;  %s1979_s21 = sld [smem:[#allocation5 + $0x5b]] }
 0x16d   : > { %v1333_v20 = vmul.f32 %v1332_v13, %v1330_v16  ;;  %v1348_v22 = vmul.f32 %v1347_v19, %v2448_v4  ;;  %v1350_v23 = vstv %s1974_s14  ;;  %s1980_s22 = sld [smem:[#allocation7 + $0x5b]] }
 0x16e   : > { %v1341_v24 = vmax.f32 %v1340_v18, 0.0  ;;  %s2809_s19 = sld [smem:[#allocation8 + $0x5b]]  ;;  %v1354_v29 = vstv %s2801_s23 }
 0x16f   : > { %v1334_v25 = vadd.f32 %v1333_v20, %v1323_v17  ;;  %v1351_v26 = vadd.f32 %v1350_v23, %v1348_v22  ;;  %v1358_v27 = vstv %s1976_s15  ;;  %s1982_s0 = sld [smem:[#allocation5 + $0x5c]] }
 0x170   : > { %v1344_v28 = vmul.f32 %v1343_v21, %v1341_v24  ;;  %v1359_v30 = vmul.f32 %v1358_v27, %v2448_v4  ;;  %v1361_v31 = vstv %s1977_s17  ;;  %s1983_s18 = sld [smem:[#allocation7 + $0x5c]] }
 0x171   : > { %v1352_v32 = vmax.f32 %v1351_v26, 0.0  ;;  %s2813_s29 = sld [smem:[#allocation8 + $0x5c]]  ;;  %v1365_v37 = vstv %s2805_s16 }
 0x172   : > { %v1345_v33 = vadd.f32 %v1344_v28, %v1334_v25  ;;  %v1362_v34 = vadd.f32 %v1361_v31, %v1359_v30  ;;  %v1369_v35 = vstv %s1979_s21  ;;  %s1985_s8 = sld [smem:[#allocation5 + $0x5d]] }
 0x173   : > { %v1355_v36 = vmul.f32 %v1354_v29, %v1352_v32  ;;  %v1370_v38 = vmul.f32 %v1369_v35, %v2448_v4  ;;  %v1372_v39 = vstv %s1980_s22  ;;  %s1986_s13 = sld [smem:[#allocation7 + $0x5d]] }
 0x174   : > { %v1363_v40 = vmax.f32 %v1362_v34, 0.0  ;;  %s2817_s14 = sld [smem:[#allocation8 + $0x5d]]  ;;  %v1376_v45 = vstv %s2809_s19 }
 0x175   : > { %v1356_v41 = vadd.f32 %v1355_v36, %v1345_v33  ;;  %v1373_v42 = vadd.f32 %v1372_v39, %v1370_v38  ;;  %v1380_v43 = vstv %s1982_s0  ;;  %s1988_s23 = sld [smem:[#allocation5 + $0x5e]] }
 0x176   : > { %v1366_v44 = vmul.f32 %v1365_v37, %v1363_v40  ;;  %v1381_v46 = vmul.f32 %v1380_v43, %v2448_v4  ;;  %v1383_v47 = vstv %s1983_s18  ;;  %s1989_s15 = sld [smem:[#allocation7 + $0x5e]] }
 0x177   : > { %v1374_v48 = vmax.f32 %v1373_v42, 0.0  ;;  %s2821_s17 = sld [smem:[#allocation8 + $0x5e]]  ;;  %v1387_v53 = vstv %s2813_s29 }
 0x178   : > { %v1367_v49 = vadd.f32 %v1366_v44, %v1356_v41  ;;  %v1384_v50 = vadd.f32 %v1383_v47, %v1381_v46  ;;  %v1391_v51 = vstv %s1985_s8  ;;  %s1991_s16 = sld [smem:[#allocation5 + $0x5f]] }
 0x179   : > { %v1377_v52 = vmul.f32 %v1376_v45, %v1374_v48  ;;  %v1392_v54 = vmul.f32 %v1391_v51, %v2448_v4  ;;  %v1394_v55 = vstv %s1986_s13  ;;  %s1992_s21 = sld [smem:[#allocation7 + $0x5f]] }
 0x17a   : > { %v1385_v56 = vmax.f32 %v1384_v50, 0.0  ;;  %s2825_s22 = sld [smem:[#allocation8 + $0x5f]]  ;;  %v1398_v61 = vstv %s2817_s14 }
 0x17b   : > { %v1378_v57 = vadd.f32 %v1377_v52, %v1367_v49  ;;  %v1395_v58 = vadd.f32 %v1394_v55, %v1392_v54  ;;  %v1402_v59 = vstv %s1988_s23  ;;  %s1994_s19 = sld [smem:[#allocation5 + $0x60]] }
 0x17c   : > { %v1388_v60 = vmul.f32 %v1387_v53, %v1385_v56  ;;  %v1403_v62 = vmul.f32 %v1402_v59, %v2448_v4  ;;  %v1405_v63 = vstv %s1989_s15  ;;  %s1995_s0 = sld [smem:[#allocation7 + $0x60]] }
 0x17d   : > { %v1396_v0 = vmax.f32 %v1395_v58, 0.0  ;;  %s2829_s18 = sld [smem:[#allocation8 + $0x60]]  ;;  %v1409_v6 = vstv %s2821_s17 }
 0x17e   : > { %v1389_v1 = vadd.f32 %v1388_v60, %v1378_v57  ;;  %v1406_v2 = vadd.f32 %v1405_v63, %v1403_v62  ;;  %v1413_v3 = vstv %s1991_s16  ;;  %s1997_s29 = sld [smem:[#allocation5 + $0x61]] }
 0x17f   : > { %v1399_v5 = vmul.f32 %v1398_v61, %v1396_v0  ;;  %v1414_v7 = vmul.f32 %v1413_v3, %v2448_v4  ;;  %v1416_v8 = vstv %s1992_s21  ;;  %s1998_s8 = sld [smem:[#allocation7 + $0x61]] }
 0x180   : > { %v1407_v9 = vmax.f32 %v1406_v2, 0.0  ;;  %s2833_s13 = sld [smem:[#allocation8 + $0x61]]  ;;  %v1420_v14 = vstv %s2825_s22 }
 0x181   : > { %v1400_v10 = vadd.f32 %v1399_v5, %v1389_v1  ;;  %v1417_v11 = vadd.f32 %v1416_v8, %v1414_v7  ;;  %v1424_v12 = vstv %s1994_s19  ;;  %s2000_s14 = sld [smem:[#allocation5 + $0x62]] }
 0x182   : > { %v1410_v13 = vmul.f32 %v1409_v6, %v1407_v9  ;;  %v1425_v15 = vmul.f32 %v1424_v12, %v2448_v4  ;;  %v1427_v16 = vstv %s1995_s0  ;;  %s2001_s23 = sld [smem:[#allocation7 + $0x62]]  ;;  %s2274_s0 = smov [#allocation10]  }
 0x183   : > { %v1418_v17 = vmax.f32 %v1417_v11, 0.0  ;;  %s2002_s15 = sld [smem:[#allocation8 + $0x62]]  ;;  %v1431_v22 = vstv %s2829_s18  ;;  %s2170_s18 = sshll.u32 %s2274_s0, 4  ;;  %s2171_s18 = int_to_ptr.vmem [resolvable:$false] %s2170_s18 }
 0x184   : > { %v1411_v18 = vadd.f32 %v1410_v13, %v1400_v10  ;;  %v1428_v19 = vadd.f32 %v1427_v16, %v1425_v15  ;;  %v1435_v20 = vstv %s1997_s29  ;;  %s2003_s17 = sld [smem:[#allocation5 + $0x63]]  ;;  %s353_s29 = scalar_lea.vmem %s2922_s5, %s1701_s9 }
 0x185   : > { %v1421_v21 = vmul.f32 %v1420_v14, %v1418_v17  ;;  %v1436_v23 = vmul.f32 %v1435_v20, %v2448_v4  ;;  %v1438_v24 = vstv %s1998_s8  ;;  %s2004_s16 = sld [smem:[#allocation7 + $0x63]]  ;;  %v1482_v61 = vld [vmem:[%s353_s29] sm:$0xff]  ;;  %s2009_s9 = sshll.u32 %s2337_s28, 7 }
 0x186   : > { %v1429_v25 = vmax.f32 %v1428_v19, 0.0  ;;  %s2005_s21 = sld [smem:[#allocation8 + $0x63]]  ;;  %v1442_v30 = vstv %s2833_s13  ;;  %s2849_s13 = sand.u32 1, %s2260_s25  }
 0x187   : > { %v1422_v26 = vadd.f32 %v1421_v21, %v1411_v18  ;;  %v1439_v27 = vadd.f32 %v1438_v24, %v1436_v23  ;;  %v1446_v28 = vstv %s2000_s14  ;;  %s1704_s22 = sld [smem:[#allocation2 + $0x2]]  ;;  %s1699_s20 = sshll.u32 %s2849_s13, 3 }
 0x188   : > { %v1432_v29 = vmul.f32 %v1431_v22, %v1429_v25  ;;  %v1447_v31 = vmul.f32 %v1446_v28, %v2448_v4  ;;  %v1449_v32 = vstv %s2001_s23  ;;  %s1705_s19 = sld [smem:[#allocation2 + $0x3]]  ;;  %s338_s23 = scalar_lea.vmem [#allocation10], %s1699_s20 }
 0x189   : > { %v1440_v33 = vmax.f32 %v1439_v27, 0.0  ;;  %v1453_v38 = vstv %s2002_s15  ;;  %s1707_s8 = sld [smem:[#allocation2 + $0x5]]  ;;  %s1530_s15 = sshll.u32 %s338_s23, 4  ;;  %s1531_s15 = int_to_ptr.vmem [resolvable:$true] %s1530_s15 }
 0x18a   : > { %v1433_v34 = vadd.f32 %v1432_v29, %v1422_v26  ;;  %v1450_v35 = vadd.f32 %v1449_v32, %v1447_v31  ;;  %v1457_v36 = vstv %s2003_s17  ;;  %s1708_s14 = sld [smem:[#allocation2 + $0x6]]  ;;  %s2172_s29 = scalar_lea.vmem %s2171_s18, 256 }
 0x18b   : > { %v1443_v37 = vmul.f32 %v1442_v30, %v1440_v33  ;;  %v1458_v39 = vmul.f32 %v1457_v36, %v2448_v4  ;;  %v1460_v40 = vstv %s2004_s16  ;;  %p2173_p2 = scmp.lt.s32.totalorder %s1531_s15, %s2171_s18 }
 0x18c   : > { %v1451_v41 = vmax.f32 %v1450_v35, 0.0  ;;  %v1464_v45 = vstv %s2005_s21  ;;  %s2861_s21 = scalar_lea.hbm %s2923_s6, %s2009_s9 }
 0x18d   : > { %v1444_v42 = vadd.f32 %v1443_v37, %v1433_v34  ;;  %v1461_v43 = vadd.f32 %v1460_v40, %v1458_v39  ;;  %v1474_v52 = vstv %s1704_s22  ;;  %s1512_s22 = scalar_lea.sflag [#allocation3], %s2849_s13 }
 0x18e   : > { %v1454_v44 = vmul.f32 %v1453_v38, %v1451_v41  ;;  %v1475_v54 = vmul.f32 %v1474_v52, %v2448_v4  ;;  %v1476_v55 = vstv %s1705_s19  ;;  %s2166_s19 = scalar_lea.vmem %s1531_s15, 128 }
 0x18f   : > { %v1462_v46 = vmax.f32 %v1461_v43, 0.0  ;;  %v1486_v2 = vstv %s1707_s8  ;;  %p2167_p8 = scmp.ne.s32.totalorder %s1531_s15, %s2166_s19  ;;  %p2174_p3 = scmp.lt.s32.totalorder %s2172_s29, %s2166_s19 }
 0x190   : > { %v1455_v47 = vadd.f32 %v1454_v44, %v1444_v42  ;;  %v1477_v56 = vadd.f32 %v1476_v55, %v1475_v54  ;;  %v1488_v5 = vstv %s1708_s14 }
 0x191   : > { %v1465_v48 = vmul.f32 %v1464_v45, %v1462_v46  ;;  %p2168_p13 = pnand %p2167_p8, %p2941_p11  ;;  %p2175_p4 = por %p2174_p3, %p2173_p2 }
 0x192   : > { %v1478_v57 = vmax.f32 %v1477_v56, 0.0 }
 0x193   : > { %v1466_v49 = vadd.f32 %v1465_v48, %v1455_v47  ;;  %p2169_p1 = pneg %p2168_p13 }
 0x194   : > { %v1479_v58 = vmul.f32 4.0, %v1478_v57 }
 0x195   : > { %v2006_v50 = vmul.f32 -1.442695, %v1466_v49  ;;  %p2176_p9 = pnand %p2175_p4, %p2169_p1 }
 0x196   : > { %v1480_v62 = vadd.f32 %v1479_v58, %v2448_v4 }
 0x197   : > { %2098 = vpow2.f32 %v2006_v50 }
 0x1a4   : > { %v2099_v51 = vpop.eup %2098 }
 0x1a5   : > { %v1470_v53 = vadd.f32 1.0, %v2099_v51 }
 0x1a7   : > { %2100 = vrcp.f32 %v1470_v53 }
 0x1b4   : > { %v2101_v59 = vpop.eup %2100 }
 0x1b5   : > { %v1473_v60 = vmul.f32 0.5, %v2101_v59 }
 0x1b7   : > { %v1481_v63 = vmul.f32 0.8164966, %v1473_v60 }
 0x1b9   : > { %v1483_v0 = vmul.f32 %v1482_v61, %v1481_v63 }
 0x1bb   : > { %v1484_v1 = vadd.f32 %v1483_v0, %v1480_v62 }
 0x1bd   : > { %v1485_v3 = vmax.f32 %v1484_v1, 0.0 }
 0x1bf   : > { %v1487_v6 = vmul.f32 %v1486_v2, %v1485_v3 }
 0x1c1   : > { %v1489_v7 = vadd.f32 %v1488_v5, %v1487_v6 }
 0x1c3   : > { %1490 = vst [vmem:[%s338_s23] sm:$0xff] %v1489_v7  ;;  %v1494_v4 = vand.u32 2147483647, %v1489_v7 }
 0x1c4   : > { %2179 = shalt.err (!%p2176_p9)
}
 0x1c5   : > { %s2180_s8 = scalar_lea.hbm %s2861_s21, 128  ;;  %s2184_s17 = scalar_lea.hbm %s2923_s6, 512 }
 0x1c6   : > { %p2181_p7 = scmp.ne.s32.totalorder %s2861_s21, %s2180_s8  ;;  %p2185_p6 = scmp.lt.s32.totalorder %s2861_s21, %s2923_s6 }
 0x1c7   : > { %p2186_p12 = scmp.lt.s32.totalorder %s2184_s17, %s2180_s8 }
 0x1c8   : > { %p2182_p0 = pnand %p2181_p7, %p2941_p11 }
 0x1c9   : > { %p2187_p10 = por %p2186_p12, %p2185_p6 }
 0x1ca   : > { %p2183_p5 = pneg %p2182_p0 }
 0x1cc   : > { %p2188_p8 = pnand %p2187_p10, %p2183_p5 }
 0x1ce   : > { %2191 = shalt.err (!%p2188_p8)
}
 0x1cf   : > { %2029 = dma.vmem_to_hbm [thread:$0]  (%p2941_p11), %s1531_s15, 128, %s2861_s21, %s1512_s22   ;;  %v1495_v8 = vsub.f32 0.0, %v1494_v4  ;;  %v1491_v17 = vmax.f32 %v1489_v7, 0.0  ;;  %vm1492_vm1 = vcmp.ne.f32.partialorder %v1489_v7, %v1489_v7 }
 0x1d0   : > { %s345_s15 = scalar_lea.vmem [#allocation11], %s1699_s20  ;;  %s1541_s18 = scalar_lea.hbm %s2924_s7, %s2009_s9 }
 0x1d1   : > { %v1496_v9 = vmul.f32 1.442695, %v1495_v8  ;;  %s1543_s21 = sshll.u32 %s345_s15, 4  ;;  %s1517_s29 = scalar_lea.sflag [#allocation12], %s2849_s13  ;;  %s1544_s21 = int_to_ptr.vmem [resolvable:$true] %s1543_s21 }
 0x1d2   : > { %s2192_s8 = scalar_lea.vmem %s1544_s21, 128  ;;  %s2275_s14 = smov [#allocation11]  }
 0x1d3   : > { %2102 = vpow2.f32 %v1496_v9  ;;  %p2193_p13 = scmp.ne.s32.totalorder %s1544_s21, %s2192_s8  ;;  %s2196_s23 = sshll.u32 %s2275_s14, 4  ;;  %s2197_s23 = int_to_ptr.vmem [resolvable:$false] %s2196_s23 }
 0x1d4   : > { %s2198_s20 = scalar_lea.vmem %s2197_s23, 256  ;;  %p2199_p3 = scmp.lt.s32.totalorder %s1544_s21, %s2197_s23 }
 0x1d5   : > { %p2194_p1 = pnand %p2193_p13, %p2941_p11  ;;  %p2200_p4 = scmp.lt.s32.totalorder %s2198_s20, %s2192_s8 }
 0x1d7   : > { %p2195_p2 = pneg %p2194_p1  ;;  %p2201_p9 = por %p2200_p4, %p2199_p3 }
 0x1d9   : > { %p2202_p7 = pnand %p2201_p9, %p2195_p2 }
 0x1e0   : > { %v2103_v10 = vpop.eup %2102 }
 0x1e1   : > { %v1498_v11 = vadd.f32 1.0, %v2103_v10  ;;  %v1501_v12 = vmul.f32 -0.5, %v2103_v10  ;;  %v1504_v14 = vand.u32 2147483647, %v2103_v10 }
 0x1e3   : > { %2104 = vlog2.f32 %v1498_v11  ;;  %v1502_v13 = vadd.f32 1.0, %v1501_v12  ;;  %vm1505_vm0 = vcmp.lt.f32.partialorder %v1504_v14, 0.0004427343 }
 0x1e5   : > { %v1503_v15 = vmul.f32 %v2103_v10, %v1502_v13 }
 0x1f0   : > { %v2105_v16 = vpop.eup %2104 }
 0x1f1   : > { %v1500_v18 = vmul.f32 0.6931472, %v2105_v16 }
 0x1f3   : > { %v1506_v19 = vsel %vm1505_vm0, %v1503_v15, %v1500_v18 }
 0x1f4   : > { %v1507_v20 = vadd.f32 %v1506_v19, %v1491_v17 }
 0x1f6   : > { %v1508_v21 = vsel %vm1492_vm1, %v1489_v7, %v1507_v20 }
 0x1f7   : > { %v1509_v22 = vadd.f32 0.001, %v1508_v21 }
 0x1f9   : > { %1510 = vst [vmem:[%s345_s15] sm:$0xff] %v1509_v22 }
 0x1fa   : > { %2205 = shalt.err (!%p2202_p7)
}
 0x1fb   : > { %s2206_s28 = scalar_lea.hbm %s1541_s18, 128  ;;  %s2210_s17 = scalar_lea.hbm %s2924_s7, 512 }
 0x1fc   : > { %p2207_p0 = scmp.ne.s32.totalorder %s1541_s18, %s2206_s28  ;;  %p2211_p12 = scmp.lt.s32.totalorder %s1541_s18, %s2924_s7 }
 0x1fd   : > { %p2212_p10 = scmp.lt.s32.totalorder %s2210_s17, %s2206_s28 }
 0x1fe   : > { %p2208_p5 = pnand %p2207_p0, %p2941_p11 }
 0x1ff   : > { %p2213_p8 = por %p2212_p10, %p2211_p12 }
 0x200   : > { %p2209_p6 = pneg %p2208_p5 }
 0x202   : > { %p2214_p13 = pnand %p2213_p8, %p2209_p6 }
 0x204   : > { %2217 = shalt.err (!%p2214_p13)
}
 0x205   : > { %2030 = dma.vmem_to_hbm [thread:$0]  (%p2941_p11), %s1544_s21, 128, %s1541_s18, %s1517_s29  }
 0x206 PF: > { %p2061_p1 = scmp.ge.s32.totalorder %s2268_s27, 2  ;;  %s1555_s15 = sand.u32 1, %s2256_s24  }
 0x207   : > { %p2942_p2 = scmp.ne.s32.totalorder %s2930_s12, 0  ;;  %s1556_s22 = scalar_lea.sflag [#allocation3], %s1555_s15 }
 0x209   : > { %p2047_p3 = pnand %p2061_p1, %p2942_p2 }
 0x20b   : > { %p2048_p4 = pneg %p2047_p3 }
 0x20d   : > { %2247 = dma.done.wait (%p2048_p4), %s1556_s22, 128  }
 0x20e   : > { %2249 = vsyncadd (%p2048_p4), %s1556_s22, 4294967168  ;;  %s1565_s19 = scalar_lea.sflag [#allocation12], %s1555_s15 }
 0x20f   : > { %2251 = dma.done.wait (%p2048_p4), %s1565_s19, 128  }
 0x210   : > { %2253 = vsyncadd (%p2048_p4), %s1565_s19, 4294967168  ;;  %p24_p11 = scmp.ge.s32.totalorder %s2341_s30, 6   ;;  %s2943_s24 = smov %s2260_s25 }
 0x211   : > { %s2944_s25 = smov %s2264_s26  ;;  %s2945_s26 = smov %s2352_s10 }
 0x212   : > { %s2946_s27 = smov %s2341_s30  ;;  %26 = sbr.rel (!%p24_p11) target bundleno = 10 (0xa), region = 116 }
 0x217   :  { %1570 = vsyncpa [#allocation3], 1 }
 0x218   :  { %1572 = vsyncpa [#allocation3 + $0x1], 1 }
 0x219   :  { %1573 = vsyncpa [#allocation12], 1 }
 0x21a   :  { %1575 = vsyncpa [#allocation12 + $0x1], 1 }
 0x21b   :  { %1576 = vsyncpa [#allocation4], 1 }
 0x21c   :  { %1578 = vsyncpa [#allocation4 + $0x1], 1 }
 0x21d   :  { %1579 = vsyncpa [#allocation6], 1 }
 0x21e   :  { %1580 = vsyncpa [#allocation9], 1 }

</bundles_post_ra>
